<compile_context>
chip_gen: v7x
topology: tpu7x:2x2x1
jax: 0.10.0
libtpu: 0.0.40
codegen_flags: <defaults>
</compile_context>

<pallas_src>
import functools

import jax
import jax.numpy as jnp
from jax.experimental import pallas as pl
from jax.experimental.pallas import tpu as pltpu

_MAX_TILE_L = 2048                 # lane tile for non-BN convs (multiple of 128)
_VMEM_LIMIT = 32 * 1024 * 1024     # safe on v5e/v6e/v7x
_BN_EPS = 1e-5


# ---------------------------------------------------------------------------
# Pallas kernel: matmul + bias + (BN) + (PReLU) + (residual add), fully fused
# ---------------------------------------------------------------------------
def _conv_fused_kernel(*refs, use_bn, use_prelu, use_res):
    it = iter(refs)
    w_ref = next(it)           # (C_out, K)   bf16
    p_ref = next(it)           # (K, TL)      bf16
    bias_ref = next(it)        # (C_out, 1)   f32
    slope_ref = next(it)       # (1, 1)       f32
    gamma_ref = next(it) if use_bn else None
    beta_ref = next(it) if use_bn else None
    res_ref = next(it) if use_res else None
    o_ref = next(it)           # (C_out, TL)  f32

    acc = jnp.dot(w_ref[...], p_ref[...], preferred_element_type=jnp.float32)
    acc = acc + bias_ref[...]                       # broadcast over lanes

    if use_bn:
        # Training-mode BatchNorm (biased variance), single pass E[x^2]-E[x]^2.
        inv_l = 1.0 / acc.shape[1]
        mean = jnp.sum(acc, axis=1, keepdims=True) * inv_l
        mean_sq = jnp.sum(acc * acc, axis=1, keepdims=True) * inv_l
        var = jnp.maximum(mean_sq - mean * mean, 0.0)
        acc = (acc - mean) * jax.lax.rsqrt(var + _BN_EPS)
        acc = acc * gamma_ref[...] + beta_ref[...]

    if use_prelu:
        s = slope_ref[...]                          # (1, 1) broadcast
        acc = jnp.where(acc > 0, acc, acc * s)

    if use_res:
        acc = acc + res_ref[...]

    o_ref[...] = acc.astype(o_ref.dtype)


# ---------------------------------------------------------------------------
# Wrappers
# ---------------------------------------------------------------------------
def _choose_tile_l(L, max_tile=_MAX_TILE_L):
    if L <= max_tile:
        return L
    t = (max_tile // 128) * 128
    while t >= 128:
        if L % t == 0:
            return t
        t -= 128
    return L


def _fused_matmul(w2d, rhs, bias, *, prelu_slope=None, bn=None, residual2d=None):
    """(C_out, L) = w2d(C_out, K) @ rhs(K, L) + bias, fused BN/PReLU/residual."""
    C_out, K = w2d.shape
    _, L = rhs.shape
    use_bn = bn is not None
    use_prelu = prelu_slope is not None
    use_res = residual2d is not None

    # BN needs the full lane extent resident for exact batch statistics.
    tl = L if use_bn else _choose_tile_l(L)
    num_l = L // tl

    slope = jnp.reshape(
        jnp.asarray(prelu_slope if use_prelu else 0.0, jnp.float32), (1, 1))
    args = [w2d.astype(jnp.bfloat16), rhs.astype(jnp.bfloat16),
            bias.reshape(C_out, 1).astype(jnp.float32), slope]
    in_specs = [
        pl.BlockSpec((C_out, K), lambda l: (0, 0)),     # weights resident
        pl.BlockSpec((K, tl), lambda l: (0, l)),        # patches, lane tiled
        pl.BlockSpec((C_out, 1), lambda l: (0, 0)),
        pl.BlockSpec((1, 1), lambda l: (0, 0)),
    ]
    if use_bn:
        gamma, beta = bn
        args += [gamma.reshape(C_out, 1).astype(jnp.float32),
                 beta.reshape(C_out, 1).astype(jnp.float32)]
        in_specs += [pl.BlockSpec((C_out, 1), lambda l: (0, 0)),
                     pl.BlockSpec((C_out, 1), lambda l: (0, 0))]
    if use_res:
        args.append(residual2d.astype(jnp.float32))
        in_specs.append(pl.BlockSpec((C_out, tl), lambda l: (0, l)))

    bytes_accessed = (2 * C_out * K + 2 * K * L + 4 * C_out * L
                      + (4 * C_out * L if use_res else 0) + 16 * C_out)
    cost = pl.CostEstimate(flops=2 * C_out * K * L,
                           transcendentals=C_out if use_bn else 0,
                           bytes_accessed=int(bytes_accessed))

    return pl.pallas_call(
        functools.partial(_conv_fused_kernel, use_bn=use_bn,
                          use_prelu=use_prelu, use_res=use_res),
        out_shape=jax.ShapeDtypeStruct((C_out, L), jnp.float32),
        grid=(num_l,),
        in_specs=in_specs,
        out_specs=pl.BlockSpec((C_out, tl), lambda l: (0, l)),
        compiler_params=pltpu.CompilerParams(
            dimension_semantics=("parallel",),
            vmem_limit_bytes=_VMEM_LIMIT),
        cost_estimate=cost,
    )(*args)


def _im2col(x, KH, KW, pad):
    """Channel-leading im2col: (C, N, H, W) -> (C*KH*KW, N*H*W), stride 1,
    'same' size.  Row order (c, ki, kj) matches w.reshape(C_out, C_in*KH*KW);
    built with pad + static slices + stack -> no transposes, bf16 patches."""
    C, N, H, W = x.shape
    xp = jnp.pad(x.astype(jnp.bfloat16),
                 ((0, 0), (0, 0), (pad, pad), (pad, pad)))
    cols = [xp[:, :, ki:ki + H, kj:kj + W]
            for ki in range(KH) for kj in range(KW)]
    patches = jnp.stack(cols, axis=1)               # (C, KH*KW, N, H, W)
    return patches.reshape(C * KH * KW, N * H * W)


def conv2d_fused(x, w, b, *, pad, prelu_slope=None, bn=None, residual=None):
    """x: (C_in, N, H, W) f32 channel-leading.  Returns (C_out, N, H, W) f32."""
    C_in, N, H, W = x.shape
    C_out, _, KH, KW = w.shape
    patches = _im2col(x, KH, KW, pad)
    res2d = None if residual is None else residual.reshape(C_out, N * H * W)
    out2d = _fused_matmul(w.reshape(C_out, C_in * KH * KW), patches, b,
                          prelu_slope=prelu_slope, bn=bn, residual2d=res2d)
    return out2d.reshape(C_out, N, H, W)


# ---------------------------------------------------------------------------
# Model
# ---------------------------------------------------------------------------
def residual_block(x, p):
    h = conv2d_fused(x, p["w1"], p["b1"], pad=1,
                     prelu_slope=p["slope"], bn=(p["g1"], p["be1"]))
    # Second conv: BN (no PReLU) and the "+ x" skip fused into the kernel.
    return conv2d_fused(h, p["w2"], p["b2"], pad=1,
                        bn=(p["g2"], p["be2"]), residual=x)


def csnet_forward(x, params, blocksize):
    """x: (N, 1, H, W) NCHW.  Returns (N, 1, H, W)."""
    N, _, H, W = x.shape
    B = blocksize
    hb, wb = H // B, W // B

    # ---- sampling (stride-B conv) + 1x1 upsampling folded into one matmul.
    m = params["sampling_w"].shape[0]
    w_comb = jnp.dot(params["up_w"].reshape(B * B, m),
                     params["sampling_w"].reshape(m, B * B))     # (B^2, B^2)
    blocks = x.transpose(1, 0, 2, 3).reshape(1, N, hb, B, wb, B)
    blocks = blocks.transpose(0, 3, 5, 1, 2, 4).reshape(B * B, N * hb * wb)
    z2d = _fused_matmul(w_comb, blocks, params["up_b"])          # (B^2, N*hb*wb)

    # ---- My_Reshape_Adap: depth-to-space back to a (1, N, H, W) image.
    y = z2d.reshape(B, B, N, hb, wb).transpose(2, 3, 0, 4, 1)
    y = y.reshape(N, H, W)[None]                                 # (1, N, H, W)

    block1 = conv2d_fused(y, params["b1_w"], params["b1_b"], pad=3,
                          prelu_slope=params["b1_slope"])
    h = block1
    for i in range(2, 7):                                        # block2..block6
        h = residual_block(h, params[f"res{i}"])
    # block7 with the "+ block1" skip fused into its epilogue -> block8 input.
    b8_in = conv2d_fused(h, params["b7_w"], params["b7_b"], pad=1,
                         prelu_slope=params["b7_slope"], residual=block1)
    out = conv2d_fused(b8_in, params["b8_w"], params["b8_b"], pad=1)  # (1,N,H,W)
    return out.transpose(1, 0, 2, 3)                             # back to NCHW


def init_params(key, blocksize, subrate):
    m = int(round(blocksize * blocksize * subrate))
    keys = iter(jax.random.split(key, 128))

    def rnd(shape, scale=0.05):
        return scale * jax.random.normal(next(keys), shape, jnp.float32)

    params = {
        "sampling_w": rnd((m, 1, blocksize, blocksize)),
        "up_w": rnd((blocksize * blocksize, m, 1, 1)),
        "up_b": rnd((blocksize * blocksize,)),
        "b1_w": rnd((64, 1, 7, 7)),
        "b1_b": rnd((64,)),
        "b1_slope": jnp.float32(0.25),
        "b7_w": rnd((64, 64, 3, 3)),
        "b7_b": rnd((64,)),
        "b7_slope": jnp.float32(0.25),
        "b8_w": rnd((1, 64, 3, 3)),
        "b8_b": rnd((1,)),
    }
    for i in range(2, 7):
        params[f"res{i}"] = {
            "w1": rnd((64, 64, 3, 3)), "b1": rnd((64,)),
            "g1": 1.0 + rnd((64,)), "be1": rnd((64,)),
            "slope": jnp.float32(0.25),
            "w2": rnd((64, 64, 3, 3)), "b2": rnd((64,)),
            "g2": 1.0 + rnd((64,)), "be2": rnd((64,)),
        }
    return params


if __name__ == "__main__":
    # Config consistent with the module: blocksize=8, subrate=0.25
    #   -> sampling: Conv2d(1, 16, 8, stride=8), upsampling: Conv2d(16, 64, 1)
    blocksize = 8
    subrate = 0.25
    key = jax.random.PRNGKey(0)
    k_params, k_x = jax.random.split(key)

    params = init_params(k_params, blocksize, subrate)
    x = jax.random.normal(k_x, (2, 1, 16, 16), jnp.float32)   # NCHW input batch

    fwd = jax.jit(functools.partial(csnet_forward, blocksize=blocksize))
    out = jax.block_until_ready(fwd(x, params))

    assert out.shape == (2, 1, 16, 16), out.shape
    assert bool(jnp.all(jnp.isfinite(out)))
    print("KERNEL_OK")
</pallas_src>

<mosaic_0001>
module attributes {stable_mosaic.version = 11 : i64} {
  func.func @_conv_fused_kernel(%arg0: i32, %arg1: memref<64x64xbf16, #tpu.memory_space<vmem>>, %arg2: memref<64x8xbf16, #tpu.memory_space<vmem>>, %arg3: memref<64x1xf32, #tpu.memory_space<vmem>>, %arg4: memref<1x1xf32, #tpu.memory_space<vmem>>, %arg5: memref<64x8xf32, #tpu.memory_space<vmem>>) attributes {dimension_semantics = [#tpu.dimension_semantics<parallel>], iteration_bounds = array<i64: 1>, scalar_prefetch = 0 : i64, scratch_operands = 0 : i64, tpu.core_type = #tpu.core_type<tc>, window_params = [{pipeline_mode = #tpu.pipeline_mode<synchronous>, transform_indices = @transform_0, window_bounds = array<i64: 64, 64>}, {transform_indices = @transform_1, window_bounds = array<i64: 64, 8>}, {pipeline_mode = #tpu.pipeline_mode<synchronous>, transform_indices = @transform_2, window_bounds = array<i64: 64, 1>}, {pipeline_mode = #tpu.pipeline_mode<synchronous>, transform_indices = @transform_3, window_bounds = array<i64: 1, 1>}, {transform_indices = @transform_4, window_bounds = array<i64: 64, 8>}]} {
    %c0 = arith.constant 0 : index
    %c0_0 = arith.constant 0 : index
    %0 = vector.load %arg1[%c0, %c0_0] : memref<64x64xbf16, #tpu.memory_space<vmem>>, vector<64x64xbf16>
    %c0_1 = arith.constant 0 : index
    %c0_2 = arith.constant 0 : index
    %1 = vector.load %arg2[%c0_1, %c0_2] : memref<64x8xbf16, #tpu.memory_space<vmem>>, vector<64x8xbf16>
    %cst = arith.constant dense<0.000000e+00> : vector<64x8xf32>
    %2 = tpu.matmul %0, %1, %cst {dimension_numbers = #tpu.dot_dimension_numbers<[1], [0], [0], [1], [0, 0, 1, 1], [], []>} : vector<64x64xbf16>, vector<64x8xbf16>, vector<64x8xf32> -> vector<64x8xf32>
    %c0_3 = arith.constant 0 : index
    %c0_4 = arith.constant 0 : index
    %3 = vector.load %arg3[%c0_3, %c0_4] : memref<64x1xf32, #tpu.memory_space<vmem>>, vector<64x1xf32>
    %4 = vector.broadcast %3 : vector<64x1xf32> to vector<64x8xf32>
    %5 = arith.addf %2, %4 : vector<64x8xf32>
    %c0_5 = arith.constant 0 : index
    %c0_6 = arith.constant 0 : index
    %6 = vector.load %arg5[%c0_5, %c0_6] : memref<64x8xf32, #tpu.memory_space<vmem>>, vector<64x8xf32>
    tpu.vector_store %arg5[%c0_5, %c0_6], %5 {strides = array<i32>} : memref<64x8xf32, #tpu.memory_space<vmem>>, vector<64x8xf32>,
    return
  }
  func.func @transform_0(%arg0: i32) -> (i32, i32) {
    %c0_i32 = arith.constant 0 : i32
    %c0_i32_0 = arith.constant 0 : i32
    %c0_i32_1 = arith.constant 0 : i32
    return %c0_i32, %c0_i32_0 : i32, i32
  }
  func.func @transform_1(%arg0: i32) -> (i32, i32) {
    %c0_i32 = arith.constant 0 : i32
    %c0_i32_0 = arith.constant 0 : i32
    return %c0_i32, %arg0 : i32, i32
  }
  func.func @transform_2(%arg0: i32) -> (i32, i32) {
    %c0_i32 = arith.constant 0 : i32
    %c0_i32_0 = arith.constant 0 : i32
    %c0_i32_1 = arith.constant 0 : i32
    return %c0_i32, %c0_i32_0 : i32, i32
  }
  func.func @transform_3(%arg0: i32) -> (i32, i32) {
    %c0_i32 = arith.constant 0 : i32
    %c0_i32_0 = arith.constant 0 : i32
    %c0_i32_1 = arith.constant 0 : i32
    return %c0_i32, %c0_i32_0 : i32, i32
  }
  func.func @transform_4(%arg0: i32) -> (i32, i32) {
    %c0_i32 = arith.constant 0 : i32
    %c0_i32_0 = arith.constant 0 : i32
    return %c0_i32, %arg0 : i32, i32
  }
}

module attributes {stable_mosaic.version = 11 : i64} {
  func.func @_conv_fused_kernel(%arg0: i32, %arg1: memref<64x49xbf16, #tpu.memory_space<vmem>>, %arg2: memref<49x512xbf16, #tpu.memory_space<vmem>>, %arg3: memref<64x1xf32, #tpu.memory_space<vmem>>, %arg4: memref<1x1xf32, #tpu.memory_space<vmem>>, %arg5: memref<64x512xf32, #tpu.memory_space<vmem>>) attributes {dimension_semantics = [#tpu.dimension_semantics<parallel>], iteration_bounds = array<i64: 1>, scalar_prefetch = 0 : i64, scratch_operands = 0 : i64, tpu.core_type = #tpu.core_type<tc>, window_params = [{pipeline_mode = #tpu.pipeline_mode<synchronous>, transform_indices = @transform_0, window_bounds = array<i64: 64, 49>}, {transform_indices = @transform_1, window_bounds = array<i64: 49, 512>}, {pipeline_mode = #tpu.pipeline_mode<synchronous>, transform_indices = @transform_2, window_bounds = array<i64: 64, 1>}, {pipeline_mode = #tpu.pipeline_mode<synchronous>, transform_indices = @transform_3, window_bounds = array<i64: 1, 1>}, {transform_indices = @transform_4, window_bounds = array<i64: 64, 512>}]} {
    %c0 = arith.constant 0 : index
    %c0_0 = arith.constant 0 : index
    %0 = vector.load %arg1[%c0, %c0_0] : memref<64x49xbf16, #tpu.memory_space<vmem>>, vector<64x49xbf16>
    %c0_1 = arith.constant 0 : index
    %c0_2 = arith.constant 0 : index
    %1 = vector.load %arg2[%c0_1, %c0_2] : memref<49x512xbf16, #tpu.memory_space<vmem>>, vector<49x512xbf16>
    %cst = arith.constant dense<0.000000e+00> : vector<64x512xf32>
    %2 = tpu.matmul %0, %1, %cst {dimension_numbers = #tpu.dot_dimension_numbers<[1], [0], [0], [1], [0, 0, 1, 1], [], []>} : vector<64x49xbf16>, vector<49x512xbf16>, vector<64x512xf32> -> vector<64x512xf32>
    %c0_3 = arith.constant 0 : index
    %c0_4 = arith.constant 0 : index
    %3 = vector.load %arg3[%c0_3, %c0_4] : memref<64x1xf32, #tpu.memory_space<vmem>>, vector<64x1xf32>
    %4 = vector.broadcast %3 : vector<64x1xf32> to vector<64x512xf32>
    %5 = arith.addf %2, %4 : vector<64x512xf32>
    %c0_5 = arith.constant 0 : index
    %c0_6 = arith.constant 0 : index
    %6 = vector.load %arg4[%c0_5, %c0_6] : memref<1x1xf32, #tpu.memory_space<vmem>>, vector<1x1xf32>
    %cst_7 = arith.constant 0.000000e+00 : f32
    %7 = vector.broadcast %cst_7 : f32 to vector<64x512xf32>
    %8 = arith.cmpf ogt, %5, %7 : vector<64x512xf32>
    %9 = vector.broadcast %6 : vector<1x1xf32> to vector<64x512xf32>
    %10 = arith.mulf %5, %9 : vector<64x512xf32>
    %11 = arith.select %8, %5, %10 : vector<64x512xi1>, vector<64x512xf32>
    %c0_8 = arith.constant 0 : index
    %c0_9 = arith.constant 0 : index
    %12 = vector.load %arg5[%c0_8, %c0_9] : memref<64x512xf32, #tpu.memory_space<vmem>>, vector<64x512xf32>
    tpu.vector_store %arg5[%c0_8, %c0_9], %11 {strides = array<i32>} : memref<64x512xf32, #tpu.memory_space<vmem>>, vector<64x512xf32>,
    return
  }
  func.func @transform_0(%arg0: i32) -> (i32, i32) {
    %c0_i32 = arith.constant 0 : i32
    %c0_i32_0 = arith.constant 0 : i32
    %c0_i32_1 = arith.constant 0 : i32
    return %c0_i32, %c0_i32_0 : i32, i32
  }
  func.func @transform_1(%arg0: i32) -> (i32, i32) {
    %c0_i32 = arith.constant 0 : i32
    %c0_i32_0 = arith.constant 0 : i32
    return %c0_i32, %arg0 : i32, i32
  }
  func.func @transform_2(%arg0: i32) -> (i32, i32) {
    %c0_i32 = arith.constant 0 : i32
    %c0_i32_0 = arith.constant 0 : i32
    %c0_i32_1 = arith.constant 0 : i32
    return %c0_i32, %c0_i32_0 : i32, i32
  }
  func.func @transform_3(%arg0: i32) -> (i32, i32) {
    %c0_i32 = arith.constant 0 : i32
    %c0_i32_0 = arith.constant 0 : i32
    %c0_i32_1 = arith.constant 0 : i32
    return %c0_i32, %c0_i32_0 : i32, i32
  }
  func.func @transform_4(%arg0: i32) -> (i32, i32) {
    %c0_i32 = arith.constant 0 : i32
    %c0_i32_0 = arith.constant 0 : i32
    return %c0_i32, %arg0 : i32, i32
  }
}

module attributes {stable_mosaic.version = 11 : i64} {
  func.func @_conv_fused_kernel(%arg0: i32, %arg1: memref<64x576xbf16, #tpu.memory_space<vmem>>, %arg2: memref<576x512xbf16, #tpu.memory_space<vmem>>, %arg3: memref<64x1xf32, #tpu.memory_space<vmem>>, %arg4: memref<1x1xf32, #tpu.memory_space<vmem>>, %arg5: memref<64x1xf32, #tpu.memory_space<vmem>>, %arg6: memref<64x1xf32, #tpu.memory_space<vmem>>, %arg7: memref<64x512xf32, #tpu.memory_space<vmem>>) attributes {dimension_semantics = [#tpu.dimension_semantics<parallel>], iteration_bounds = array<i64: 1>, scalar_prefetch = 0 : i64, scratch_operands = 0 : i64, tpu.core_type = #tpu.core_type<tc>, window_params = [{pipeline_mode = #tpu.pipeline_mode<synchronous>, transform_indices = @transform_0, window_bounds = array<i64: 64, 576>}, {transform_indices = @transform_1, window_bounds = array<i64: 576, 512>}, {pipeline_mode = #tpu.pipeline_mode<synchronous>, transform_indices = @transform_2, window_bounds = array<i64: 64, 1>}, {pipeline_mode = #tpu.pipeline_mode<synchronous>, transform_indices = @transform_3, window_bounds = array<i64: 1, 1>}, {pipeline_mode = #tpu.pipeline_mode<synchronous>, transform_indices = @transform_4, window_bounds = array<i64: 64, 1>}, {pipeline_mode = #tpu.pipeline_mode<synchronous>, transform_indices = @transform_5, window_bounds = array<i64: 64, 1>}, {transform_indices = @transform_6, window_bounds = array<i64: 64, 512>}]} {
    %c0 = arith.constant 0 : index
    %c0_0 = arith.constant 0 : index
    %0 = vector.load %arg1[%c0, %c0_0] : memref<64x576xbf16, #tpu.memory_space<vmem>>, vector<64x576xbf16>
    %c0_1 = arith.constant 0 : index
    %c0_2 = arith.constant 0 : index
    %1 = vector.load %arg2[%c0_1, %c0_2] : memref<576x512xbf16, #tpu.memory_space<vmem>>, vector<576x512xbf16>
    %cst = arith.constant dense<0.000000e+00> : vector<64x512xf32>
    %2 = tpu.matmul %0, %1, %cst {dimension_numbers = #tpu.dot_dimension_numbers<[1], [0], [0], [1], [0, 0, 1, 1], [], []>} : vector<64x576xbf16>, vector<576x512xbf16>, vector<64x512xf32> -> vector<64x512xf32>
    %c0_3 = arith.constant 0 : index
    %c0_4 = arith.constant 0 : index
    %3 = vector.load %arg3[%c0_3, %c0_4] : memref<64x1xf32, #tpu.memory_space<vmem>>, vector<64x1xf32>
    %4 = vector.broadcast %3 : vector<64x1xf32> to vector<64x512xf32>
    %5 = arith.addf %2, %4 : vector<64x512xf32>
    %cst_5 = arith.constant dense<0.000000e+00> : vector<64xf32>
    %6 = vector.multi_reduction <add>, %5, %cst_5 [1] : vector<64x512xf32> to vector<64xf32>
    %7 = vector.shape_cast %6 : vector<64xf32> to vector<64x1xf32>
    %cst_6 = arith.constant 0.001953125 : f32
    %8 = vector.broadcast %cst_6 : f32 to vector<64x1xf32>
    %9 = arith.mulf %7, %8 : vector<64x1xf32>
    %10 = arith.mulf %5, %5 : vector<64x512xf32>
    %cst_7 = arith.constant dense<0.000000e+00> : vector<64xf32>
    %11 = vector.multi_reduction <add>, %10, %cst_7 [1] : vector<64x512xf32> to vector<64xf32>
    %12 = vector.shape_cast %11 : vector<64xf32> to vector<64x1xf32>
    %cst_8 = arith.constant 0.001953125 : f32
    %13 = vector.broadcast %cst_8 : f32 to vector<64x1xf32>
    %14 = arith.mulf %12, %13 : vector<64x1xf32>
    %15 = arith.mulf %9, %9 : vector<64x1xf32>
    %16 = arith.subf %14, %15 : vector<64x1xf32>
    %cst_9 = arith.constant 0.000000e+00 : f32
    %17 = vector.broadcast %cst_9 : f32 to vector<64x1xf32>
    %18 = arith.maximumf %16, %17 : vector<64x1xf32>
    %19 = vector.broadcast %9 : vector<64x1xf32> to vector<64x512xf32>
    %20 = arith.subf %5, %19 : vector<64x512xf32>
    %cst_10 = arith.constant 9.99999974E-6 : f32
    %21 = vector.broadcast %cst_10 : f32 to vector<64x1xf32>
    %22 = arith.addf %18, %21 : vector<64x1xf32>
    %23 = math.rsqrt %22 : vector<64x1xf32>
    %24 = vector.broadcast %23 : vector<64x1xf32> to vector<64x512xf32>
    %25 = arith.mulf %20, %24 : vector<64x512xf32>
    %c0_11 = arith.constant 0 : index
    %c0_12 = arith.constant 0 : index
    %26 = vector.load %arg5[%c0_11, %c0_12] : memref<64x1xf32, #tpu.memory_space<vmem>>, vector<64x1xf32>
    %27 = vector.broadcast %26 : vector<64x1xf32> to vector<64x512xf32>
    %28 = arith.mulf %25, %27 : vector<64x512xf32>
    %c0_13 = arith.constant 0 : index
    %c0_14 = arith.constant 0 : index
    %29 = vector.load %arg6[%c0_13, %c0_14] : memref<64x1xf32, #tpu.memory_space<vmem>>, vector<64x1xf32>
    %30 = vector.broadcast %29 : vector<64x1xf32> to vector<64x512xf32>
    %31 = arith.addf %28, %30 : vector<64x512xf32>
    %c0_15 = arith.constant 0 : index
    %c0_16 = arith.constant 0 : index
    %32 = vector.load %arg4[%c0_15, %c0_16] : memref<1x1xf32, #tpu.memory_space<vmem>>, vector<1x1xf32>
    %cst_17 = arith.constant 0.000000e+00 : f32
    %33 = vector.broadcast %cst_17 : f32 to vector<64x512xf32>
    %34 = arith.cmpf ogt, %31, %33 : vector<64x512xf32>
    %35 = vector.broadcast %32 : vector<1x1xf32> to vector<64x512xf32>
    %36 = arith.mulf %31, %35 : vector<64x512xf32>
    %37 = arith.select %34, %31, %36 : vector<64x512xi1>, vector<64x512xf32>
    %c0_18 = arith.constant 0 : index
    %c0_19 = arith.constant 0 : index
    %38 = vector.load %arg7[%c0_18, %c0_19] : memref<64x512xf32, #tpu.memory_space<vmem>>, vector<64x512xf32>
    tpu.vector_store %arg7[%c0_18, %c0_19], %37 {strides = array<i32>} : memref<64x512xf32, #tpu.memory_space<vmem>>, vector<64x512xf32>,
    return
  }
  func.func @transform_0(%arg0: i32) -> (i32, i32) {
    %c0_i32 = arith.constant 0 : i32
    %c0_i32_0 = arith.constant 0 : i32
    %c0_i32_1 = arith.constant 0 : i32
    return %c0_i32, %c0_i32_0 : i32, i32
  }
  func.func @transform_1(%arg0: i32) -> (i32, i32) {
    %c0_i32 = arith.constant 0 : i32
    %c0_i32_0 = arith.constant 0 : i32
    return %c0_i32, %arg0 : i32, i32
  }
  func.func @transform_2(%arg0: i32) -> (i32, i32) {
    %c0_i32 = arith.constant 0 : i32
    %c0_i32_0 = arith.constant 0 : i32
    %c0_i32_1 = arith.constant 0 : i32
    return %c0_i32, %c0_i32_0 : i32, i32
  }
  func.func @transform_3(%arg0: i32) -> (i32, i32) {
    %c0_i32 = arith.constant 0 : i32
    %c0_i32_0 = arith.constant 0 : i32
    %c0_i32_1 = arith.constant 0 : i32
    return %c0_i32, %c0_i32_0 : i32, i32
  }
  func.func @transform_4(%arg0: i32) -> (i32, i32) {
    %c0_i32 = arith.constant 0 : i32
    %c0_i32_0 = arith.constant 0 : i32
    %c0_i32_1 = arith.constant 0 : i32
    return %c0_i32, %c0_i32_0 : i32, i32
  }
  func.func @transform_5(%arg0: i32) -> (i32, i32) {
    %c0_i32 = arith.constant 0 : i32
    %c0_i32_0 = arith.constant 0 : i32
    %c0_i32_1 = arith.constant 0 : i32
    return %c0_i32, %c0_i32_0 : i32, i32
  }
  func.func @transform_6(%arg0: i32) -> (i32, i32) {
    %c0_i32 = arith.constant 0 : i32
    %c0_i32_0 = arith.constant 0 : i32
    return %c0_i32, %arg0 : i32, i32
  }
}

module attributes {stable_mosaic.version = 11 : i64} {
  func.func @_conv_fused_kernel(%arg0: i32, %arg1: memref<64x576xbf16, #tpu.memory_space<vmem>>, %arg2: memref<576x512xbf16, #tpu.memory_space<vmem>>, %arg3: memref<64x1xf32, #tpu.memory_space<vmem>>, %arg4: memref<1x1xf32, #tpu.memory_space<vmem>>, %arg5: memref<64x1xf32, #tpu.memory_space<vmem>>, %arg6: memref<64x1xf32, #tpu.memory_space<vmem>>, %arg7: memref<64x512xf32, #tpu.memory_space<vmem>>, %arg8: memref<64x512xf32, #tpu.memory_space<vmem>>) attributes {dimension_semantics = [#tpu.dimension_semantics<parallel>], iteration_bounds = array<i64: 1>, scalar_prefetch = 0 : i64, scratch_operands = 0 : i64, tpu.core_type = #tpu.core_type<tc>, window_params = [{pipeline_mode = #tpu.pipeline_mode<synchronous>, transform_indices = @transform_0, window_bounds = array<i64: 64, 576>}, {transform_indices = @transform_1, window_bounds = array<i64: 576, 512>}, {pipeline_mode = #tpu.pipeline_mode<synchronous>, transform_indices = @transform_2, window_bounds = array<i64: 64, 1>}, {pipeline_mode = #tpu.pipeline_mode<synchronous>, transform_indices = @transform_3, window_bounds = array<i64: 1, 1>}, {pipeline_mode = #tpu.pipeline_mode<synchronous>, transform_indices = @transform_4, window_bounds = array<i64: 64, 1>}, {pipeline_mode = #tpu.pipeline_mode<synchronous>, transform_indices = @transform_5, window_bounds = array<i64: 64, 1>}, {transform_indices = @transform_6, window_bounds = array<i64: 64, 512>}, {transform_indices = @transform_7, window_bounds = array<i64: 64, 512>}]} {
    %c0 = arith.constant 0 : index
    %c0_0 = arith.constant 0 : index
    %0 = vector.load %arg1[%c0, %c0_0] : memref<64x576xbf16, #tpu.memory_space<vmem>>, vector<64x576xbf16>
    %c0_1 = arith.constant 0 : index
    %c0_2 = arith.constant 0 : index
    %1 = vector.load %arg2[%c0_1, %c0_2] : memref<576x512xbf16, #tpu.memory_space<vmem>>, vector<576x512xbf16>
    %cst = arith.constant dense<0.000000e+00> : vector<64x512xf32>
    %2 = tpu.matmul %0, %1, %cst {dimension_numbers = #tpu.dot_dimension_numbers<[1], [0], [0], [1], [0, 0, 1, 1], [], []>} : vector<64x576xbf16>, vector<576x512xbf16>, vector<64x512xf32> -> vector<64x512xf32>
    %c0_3 = arith.constant 0 : index
    %c0_4 = arith.constant 0 : index
    %3 = vector.load %arg3[%c0_3, %c0_4] : memref<64x1xf32, #tpu.memory_space<vmem>>, vector<64x1xf32>
    %4 = vector.broadcast %3 : vector<64x1xf32> to vector<64x512xf32>
    %5 = arith.addf %2, %4 : vector<64x512xf32>
    %cst_5 = arith.constant dense<0.000000e+00> : vector<64xf32>
    %6 = vector.multi_reduction <add>, %5, %cst_5 [1] : vector<64x512xf32> to vector<64xf32>
    %7 = vector.shape_cast %6 : vector<64xf32> to vector<64x1xf32>
    %cst_6 = arith.constant 0.001953125 : f32
    %8 = vector.broadcast %cst_6 : f32 to vector<64x1xf32>
    %9 = arith.mulf %7, %8 : vector<64x1xf32>
    %10 = arith.mulf %5, %5 : vector<64x512xf32>
    %cst_7 = arith.constant dense<0.000000e+00> : vector<64xf32>
    %11 = vector.multi_reduction <add>, %10, %cst_7 [1] : vector<64x512xf32> to vector<64xf32>
    %12 = vector.shape_cast %11 : vector<64xf32> to vector<64x1xf32>
    %cst_8 = arith.constant 0.001953125 : f32
    %13 = vector.broadcast %cst_8 : f32 to vector<64x1xf32>
    %14 = arith.mulf %12, %13 : vector<64x1xf32>
    %15 = arith.mulf %9, %9 : vector<64x1xf32>
    %16 = arith.subf %14, %15 : vector<64x1xf32>
    %cst_9 = arith.constant 0.000000e+00 : f32
    %17 = vector.broadcast %cst_9 : f32 to vector<64x1xf32>
    %18 = arith.maximumf %16, %17 : vector<64x1xf32>
    %19 = vector.broadcast %9 : vector<64x1xf32> to vector<64x512xf32>
    %20 = arith.subf %5, %19 : vector<64x512xf32>
    %cst_10 = arith.constant 9.99999974E-6 : f32
    %21 = vector.broadcast %cst_10 : f32 to vector<64x1xf32>
    %22 = arith.addf %18, %21 : vector<64x1xf32>
    %23 = math.rsqrt %22 : vector<64x1xf32>
    %24 = vector.broadcast %23 : vector<64x1xf32> to vector<64x512xf32>
    %25 = arith.mulf %20, %24 : vector<64x512xf32>
    %c0_11 = arith.constant 0 : index
    %c0_12 = arith.constant 0 : index
    %26 = vector.load %arg5[%c0_11, %c0_12] : memref<64x1xf32, #tpu.memory_space<vmem>>, vector<64x1xf32>
    %27 = vector.broadcast %26 : vector<64x1xf32> to vector<64x512xf32>
    %28 = arith.mulf %25, %27 : vector<64x512xf32>
    %c0_13 = arith.constant 0 : index
    %c0_14 = arith.constant 0 : index
    %29 = vector.load %arg6[%c0_13, %c0_14] : memref<64x1xf32, #tpu.memory_space<vmem>>, vector<64x1xf32>
    %30 = vector.broadcast %29 : vector<64x1xf32> to vector<64x512xf32>
    %31 = arith.addf %28, %30 : vector<64x512xf32>
    %c0_15 = arith.constant 0 : index
    %c0_16 = arith.constant 0 : index
    %32 = vector.load %arg7[%c0_15, %c0_16] : memref<64x512xf32, #tpu.memory_space<vmem>>, vector<64x512xf32>
    %33 = arith.addf %31, %32 : vector<64x512xf32>
    %c0_17 = arith.constant 0 : index
    %c0_18 = arith.constant 0 : index
    %34 = vector.load %arg8[%c0_17, %c0_18] : memref<64x512xf32, #tpu.memory_space<vmem>>, vector<64x512xf32>
    tpu.vector_store %arg8[%c0_17, %c0_18], %33 {strides = array<i32>} : memref<64x512xf32, #tpu.memory_space<vmem>>, vector<64x512xf32>,
    return
  }
  func.func @transform_0(%arg0: i32) -> (i32, i32) {
    %c0_i32 = arith.constant 0 : i32
    %c0_i32_0 = arith.constant 0 : i32
    %c0_i32_1 = arith.constant 0 : i32
    return %c0_i32, %c0_i32_0 : i32, i32
  }
  func.func @transform_1(%arg0: i32) -> (i32, i32) {
    %c0_i32 = arith.constant 0 : i32
    %c0_i32_0 = arith.constant 0 : i32
    return %c0_i32, %arg0 : i32, i32
  }
  func.func @transform_2(%arg0: i32) -> (i32, i32) {
    %c0_i32 = arith.constant 0 : i32
    %c0_i32_0 = arith.constant 0 : i32
    %c0_i32_1 = arith.constant 0 : i32
    return %c0_i32, %c0_i32_0 : i32, i32
  }
  func.func @transform_3(%arg0: i32) -> (i32, i32) {
    %c0_i32 = arith.constant 0 : i32
    %c0_i32_0 = arith.constant 0 : i32
    %c0_i32_1 = arith.constant 0 : i32
    return %c0_i32, %c0_i32_0 : i32, i32
  }
  func.func @transform_4(%arg0: i32) -> (i32, i32) {
    %c0_i32 = arith.constant 0 : i32
    %c0_i32_0 = arith.constant 0 : i32
    %c0_i32_1 = arith.constant 0 : i32
    return %c0_i32, %c0_i32_0 : i32, i32
  }
  func.func @transform_5(%arg0: i32) -> (i32, i32) {
    %c0_i32 = arith.constant 0 : i32
    %c0_i32_0 = arith.constant 0 : i32
    %c0_i32_1 = arith.constant 0 : i32
    return %c0_i32, %c0_i32_0 : i32, i32
  }
  func.func @transform_6(%arg0: i32) -> (i32, i32) {
    %c0_i32 = arith.constant 0 : i32
    %c0_i32_0 = arith.constant 0 : i32
    return %c0_i32, %arg0 : i32, i32
  }
  func.func @transform_7(%arg0: i32) -> (i32, i32) {
    %c0_i32 = arith.constant 0 : i32
    %c0_i32_0 = arith.constant 0 : i32
    return %c0_i32, %arg0 : i32, i32
  }
}

module attributes {stable_mosaic.version = 11 : i64} {
  func.func @_conv_fused_kernel(%arg0: i32, %arg1: memref<64x576xbf16, #tpu.memory_space<vmem>>, %arg2: memref<576x512xbf16, #tpu.memory_space<vmem>>, %arg3: memref<64x1xf32, #tpu.memory_space<vmem>>, %arg4: memref<1x1xf32, #tpu.memory_space<vmem>>, %arg5: memref<64x512xf32, #tpu.memory_space<vmem>>, %arg6: memref<64x512xf32, #tpu.memory_space<vmem>>) attributes {dimension_semantics = [#tpu.dimension_semantics<parallel>], iteration_bounds = array<i64: 1>, scalar_prefetch = 0 : i64, scratch_operands = 0 : i64, tpu.core_type = #tpu.core_type<tc>, window_params = [{pipeline_mode = #tpu.pipeline_mode<synchronous>, transform_indices = @transform_0, window_bounds = array<i64: 64, 576>}, {transform_indices = @transform_1, window_bounds = array<i64: 576, 512>}, {pipeline_mode = #tpu.pipeline_mode<synchronous>, transform_indices = @transform_2, window_bounds = array<i64: 64, 1>}, {pipeline_mode = #tpu.pipeline_mode<synchronous>, transform_indices = @transform_3, window_bounds = array<i64: 1, 1>}, {transform_indices = @transform_4, window_bounds = array<i64: 64, 512>}, {transform_indices = @transform_5, window_bounds = array<i64: 64, 512>}]} {
    %c0 = arith.constant 0 : index
    %c0_0 = arith.constant 0 : index
    %0 = vector.load %arg1[%c0, %c0_0] : memref<64x576xbf16, #tpu.memory_space<vmem>>, vector<64x576xbf16>
    %c0_1 = arith.constant 0 : index
    %c0_2 = arith.constant 0 : index
    %1 = vector.load %arg2[%c0_1, %c0_2] : memref<576x512xbf16, #tpu.memory_space<vmem>>, vector<576x512xbf16>
    %cst = arith.constant dense<0.000000e+00> : vector<64x512xf32>
    %2 = tpu.matmul %0, %1, %cst {dimension_numbers = #tpu.dot_dimension_numbers<[1], [0], [0], [1], [0, 0, 1, 1], [], []>} : vector<64x576xbf16>, vector<576x512xbf16>, vector<64x512xf32> -> vector<64x512xf32>
    %c0_3 = arith.constant 0 : index
    %c0_4 = arith.constant 0 : index
    %3 = vector.load %arg3[%c0_3, %c0_4] : memref<64x1xf32, #tpu.memory_space<vmem>>, vector<64x1xf32>
    %4 = vector.broadcast %3 : vector<64x1xf32> to vector<64x512xf32>
    %5 = arith.addf %2, %4 : vector<64x512xf32>
    %c0_5 = arith.constant 0 : index
    %c0_6 = arith.constant 0 : index
    %6 = vector.load %arg4[%c0_5, %c0_6] : memref<1x1xf32, #tpu.memory_space<vmem>>, vector<1x1xf32>
    %cst_7 = arith.constant 0.000000e+00 : f32
    %7 = vector.broadcast %cst_7 : f32 to vector<64x512xf32>
    %8 = arith.cmpf ogt, %5, %7 : vector<64x512xf32>
    %9 = vector.broadcast %6 : vector<1x1xf32> to vector<64x512xf32>
    %10 = arith.mulf %5, %9 : vector<64x512xf32>
    %11 = arith.select %8, %5, %10 : vector<64x512xi1>, vector<64x512xf32>
    %c0_8 = arith.constant 0 : index
    %c0_9 = arith.constant 0 : index
    %12 = vector.load %arg5[%c0_8, %c0_9] : memref<64x512xf32, #tpu.memory_space<vmem>>, vector<64x512xf32>
    %13 = arith.addf %11, %12 : vector<64x512xf32>
    %c0_10 = arith.constant 0 : index
    %c0_11 = arith.constant 0 : index
    %14 = vector.load %arg6[%c0_10, %c0_11] : memref<64x512xf32, #tpu.memory_space<vmem>>, vector<64x512xf32>
    tpu.vector_store %arg6[%c0_10, %c0_11], %13 {strides = array<i32>} : memref<64x512xf32, #tpu.memory_space<vmem>>, vector<64x512xf32>,
    return
  }
  func.func @transform_0(%arg0: i32) -> (i32, i32) {
    %c0_i32 = arith.constant 0 : i32
    %c0_i32_0 = arith.constant 0 : i32
    %c0_i32_1 = arith.constant 0 : i32
    return %c0_i32, %c0_i32_0 : i32, i32
  }
  func.func @transform_1(%arg0: i32) -> (i32, i32) {
    %c0_i32 = arith.constant 0 : i32
    %c0_i32_0 = arith.constant 0 : i32
    return %c0_i32, %arg0 : i32, i32
  }
  func.func @transform_2(%arg0: i32) -> (i32, i32) {
    %c0_i32 = arith.constant 0 : i32
    %c0_i32_0 = arith.constant 0 : i32
    %c0_i32_1 = arith.constant 0 : i32
    return %c0_i32, %c0_i32_0 : i32, i32
  }
  func.func @transform_3(%arg0: i32) -> (i32, i32) {
    %c0_i32 = arith.constant 0 : i32
    %c0_i32_0 = arith.constant 0 : i32
    %c0_i32_1 = arith.constant 0 : i32
    return %c0_i32, %c0_i32_0 : i32, i32
  }
  func.func @transform_4(%arg0: i32) -> (i32, i32) {
    %c0_i32 = arith.constant 0 : i32
    %c0_i32_0 = arith.constant 0 : i32
    return %c0_i32, %arg0 : i32, i32
  }
  func.func @transform_5(%arg0: i32) -> (i32, i32) {
    %c0_i32 = arith.constant 0 : i32
    %c0_i32_0 = arith.constant 0 : i32
    return %c0_i32, %arg0 : i32, i32
  }
}

module attributes {stable_mosaic.version = 11 : i64} {
  func.func @_conv_fused_kernel(%arg0: i32, %arg1: memref<1x576xbf16, #tpu.memory_space<vmem>>, %arg2: memref<576x512xbf16, #tpu.memory_space<vmem>>, %arg3: memref<1x1xf32, #tpu.memory_space<vmem>>, %arg4: memref<1x1xf32, #tpu.memory_space<vmem>>, %arg5: memref<1x512xf32, #tpu.memory_space<vmem>>) attributes {dimension_semantics = [#tpu.dimension_semantics<parallel>], iteration_bounds = array<i64: 1>, scalar_prefetch = 0 : i64, scratch_operands = 0 : i64, tpu.core_type = #tpu.core_type<tc>, window_params = [{pipeline_mode = #tpu.pipeline_mode<synchronous>, transform_indices = @transform_0, window_bounds = array<i64: 1, 576>}, {transform_indices = @transform_1, window_bounds = array<i64: 576, 512>}, {pipeline_mode = #tpu.pipeline_mode<synchronous>, transform_indices = @transform_2, window_bounds = array<i64: 1, 1>}, {pipeline_mode = #tpu.pipeline_mode<synchronous>, transform_indices = @transform_3, window_bounds = array<i64: 1, 1>}, {transform_indices = @transform_4, window_bounds = array<i64: 1, 512>}]} {
    %c0 = arith.constant 0 : index
    %c0_0 = arith.constant 0 : index
    %0 = vector.load %arg1[%c0, %c0_0] : memref<1x576xbf16, #tpu.memory_space<vmem>>, vector<1x576xbf16>
    %c0_1 = arith.constant 0 : index
    %c0_2 = arith.constant 0 : index
    %1 = vector.load %arg2[%c0_1, %c0_2] : memref<576x512xbf16, #tpu.memory_space<vmem>>, vector<576x512xbf16>
    %cst = arith.constant dense<0.000000e+00> : vector<1x512xf32>
    %2 = tpu.matmul %0, %1, %cst {dimension_numbers = #tpu.dot_dimension_numbers<[1], [0], [0], [1], [0, 0, 1, 1], [], []>} : vector<1x576xbf16>, vector<576x512xbf16>, vector<1x512xf32> -> vector<1x512xf32>
    %c0_3 = arith.constant 0 : index
    %c0_4 = arith.constant 0 : index
    %3 = vector.load %arg3[%c0_3, %c0_4] : memref<1x1xf32, #tpu.memory_space<vmem>>, vector<1x1xf32>
    %4 = vector.broadcast %3 : vector<1x1xf32> to vector<1x512xf32>
    %5 = arith.addf %2, %4 : vector<1x512xf32>
    %c0_5 = arith.constant 0 : index
    %c0_6 = arith.constant 0 : index
    %6 = vector.load %arg5[%c0_5, %c0_6] : memref<1x512xf32, #tpu.memory_space<vmem>>, vector<1x512xf32>
    tpu.vector_store %arg5[%c0_5, %c0_6], %5 {strides = array<i32>} : memref<1x512xf32, #tpu.memory_space<vmem>>, vector<1x512xf32>,
    return
  }
  func.func @transform_0(%arg0: i32) -> (i32, i32) {
    %c0_i32 = arith.constant 0 : i32
    %c0_i32_0 = arith.constant 0 : i32
    %c0_i32_1 = arith.constant 0 : i32
    return %c0_i32, %c0_i32_0 : i32, i32
  }
  func.func @transform_1(%arg0: i32) -> (i32, i32) {
    %c0_i32 = arith.constant 0 : i32
    %c0_i32_0 = arith.constant 0 : i32
    return %c0_i32, %arg0 : i32, i32
  }
  func.func @transform_2(%arg0: i32) -> (i32, i32) {
    %c0_i32 = arith.constant 0 : i32
    %c0_i32_0 = arith.constant 0 : i32
    %c0_i32_1 = arith.constant 0 : i32
    return %c0_i32, %c0_i32_0 : i32, i32
  }
  func.func @transform_3(%arg0: i32) -> (i32, i32) {
    %c0_i32 = arith.constant 0 : i32
    %c0_i32_0 = arith.constant 0 : i32
    %c0_i32_1 = arith.constant 0 : i32
    return %c0_i32, %c0_i32_0 : i32, i32
  }
  func.func @transform_4(%arg0: i32) -> (i32, i32) {
    %c0_i32 = arith.constant 0 : i32
    %c0_i32_0 = arith.constant 0 : i32
    return %c0_i32, %arg0 : i32, i32
  }
}

</mosaic_0001>

<bundles_post_ra>
// kernel: csnet_forward.14
= control target key start
LH: loop header
LB: loop body
LE: loop exit
PB: predicated region body
PF: predicated region fallthrough
CT: control target
= control target key end

     0   :  { %v274_v1 = vmov 0   ;;  %vm128_vm0 = vcmask 523264   ;;  %vm206_vm1 = vcmask 64512   ;;  %s384_s1 = inlined_call_operand.vmem [shape: bf16[64,8], index: 1, kind: input, shape index: {}]   ;;  %s385_s3 = inlined_call_operand.<no memory space> [shape: f32[1,1], index: 3, kind: input, shape index: {}]   ;;  %s386_s0 = inlined_call_operand.vmem [shape: bf16[64,64], index: 0, kind: input, shape index: {}]   ;;  %s387_s2 = inlined_call_operand.vmem [shape: f32[64,1], index: 2, kind: input, shape index: {}]   ;;  %s388_s4 = inlined_call_operand.vmem [shape: f32[64,8], index: 4, kind: output, shape index: {}]  }
   0x1   :  { %v266_v0 = vld [vmem:[%s384_s1] sm:$0xff]   ;;  %265 = vset.pattern.permute.xlu1 %v274_v1  ;;  %264 = vset.pattern.permute.xlu0 %v274_v1  ;;  %v267_v2 = vld [vmem:[%s384_s1 + $0x8] sm:$0xff]   ;;  %v268_v3 = vld [vmem:[%s384_s1 + $0x10] sm:$0xff]  }
   0x2   :  { %239 = vmatprep.subr.bf16.mxu0 %v266_v0  ;;  %255 = vmatprep.subr.bf16.mxu1 %v266_v0  ;;  %v270_v4 = vld [vmem:[%s386_s0] sm:$0xff]   ;;  %v271_v5 = vld [vmem:[%s386_s0 + $0x10] sm:$0xff]   ;;  %v269_v6 = vld [vmem:[%s384_s1 + $0x18] sm:$0xff]  }
   0x3   :  { %240 = vmatpush3.bf16.msra.mxu0 %v266_v0  ;;  %259 = vmatpush3.bf16.msra.mxu1 %v266_v0  ;;  %v38_v7 = vld [vmem:[%s387_s2 + $0x10] sm:$0xff]  ;;  %v36_v8 = vld [vmem:[%s387_s2] sm:$0xff]  ;;  %v39_v9 = vld [vmem:[%s387_s2 + $0x18] sm:$0xff] }
   0x4   :  { %241 = vmatprep.subr.bf16.mxu0 %v267_v2  ;;  %256 = vmatprep.subr.bf16.mxu1 %v267_v2  ;;  %v37_v10 = vld [vmem:[%s387_s2 + $0x8] sm:$0xff]  ;;  %v273_v12 = vld [vmem:[%s386_s0 + $0x18] sm:$0xff]   ;;  %v40_v14 = vld [vmem:[%s387_s2 + $0x20] sm:$0xff] }
   0x5   :  { %247 = vmatprep.mubr.msk.bf16.mxu0 %vm128_vm0, %v270_v4  ;;  %251 = vmatprep.mubr.msk.bf16.mxu1 %vm128_vm0, %v271_v5  ;;  %v272_v11 = vld [vmem:[%s386_s0 + $0x8] sm:$0xff]   ;;  %v43_v15 = vld [vmem:[%s387_s2 + $0x38] sm:$0xff]  ;;  %v42_v16 = vld [vmem:[%s387_s2 + $0x30] sm:$0xff] }
   0x6   :  { %56 = vperm.xlu1 %265, %v38_v7   ;;  %46 = vperm.xlu0 %264, %v36_v8   ;;  %v41_v13 = vld [vmem:[%s387_s2 + $0x28] sm:$0xff] }
   0x7   :  { %242 = vmatpush3.bf16.msra.mxu0 %v267_v2  ;;  %260 = vmatpush3.bf16.msra.mxu1 %v267_v2 }
   0x8   :  { %243 = vmatprep.subr.bf16.mxu0 %v268_v3  ;;  %257 = vmatprep.subr.bf16.mxu1 %v268_v3 }
   0xa   :  { %61 = vperm.xlu1 %265, %v39_v9   ;;  %51 = vperm.xlu0 %264, %v37_v10  }
   0xb   :  { %244 = vmatpush3.bf16.msra.mxu0 %v268_v3  ;;  %261 = vmatpush3.bf16.msra.mxu1 %v268_v3 }
   0xc   :  { %245 = vmatprep.subr.bf16.mxu0 %v269_v6  ;;  %258 = vmatprep.subr.bf16.mxu1 %v269_v6 }
   0xe   :  { %71 = vperm.xlu1 %265, %v41_v13   ;;  %66 = vperm.xlu0 %264, %v40_v14  }
   0xf   :  { %246 = vmatpush3.bf16.msra.mxu0 %v269_v6  ;;  %262 = vmatpush3.bf16.msra.mxu1 %v269_v6 }
  0x12   :  { %248 = vmatmul.mubr.msk.bf16.vlgmr.msra.gmra.mrb[0].mxu0 %vm128_vm0, %v272_v11  ;;  %252 = vmatmul.mubr.msk.bf16.vlgmr.msra.gmra.mrb[0].mxu1 %vm128_vm0, %v273_v12 }
  0x13   :  { %81 = vperm.xlu1 %265, %v43_v15   ;;  %76 = vperm.xlu0 %264, %v42_v16  }
  0x85   :  { %v57_v17 = vpop.permute.xlu1 %56  ;;  %v47_v18 = vpop.permute.xlu0 %46 }
  0x89   :  { %v62_v19 = vpop.permute.xlu1 %61  ;;  %v52_v20 = vpop.permute.xlu0 %51 }
  0x8d   :  { %v72_v21 = vpop.permute.xlu1 %71  ;;  %v67_v22 = vpop.permute.xlu0 %66 }
  0x92   :  { %v82_v23 = vpop.permute.xlu1 %81  ;;  %v77_v24 = vpop.permute.xlu0 %76 }
  0xe5   :  { %v249_v25 = vpop.f32.mrb[0].mxu0  ;;  %v253_v26 = vpop.f32.mrb[0].mxu1 }
  0xe6   :  { %v184_v27 = vadd.f32 %v249_v25, %v57_v17  ;;  %v200_v28 = vadd.f32 %v253_v26, %v77_v24  ;;  %v175_v29 = vpop.f32.mrb[1].mxu0  ;;  %v191_v30 = vpop.f32.mrb[1].mxu1 }
  0xe7   :  { %v176_v31 = vadd.f32 %v175_v29, %v47_v18  ;;  %v192_v32 = vadd.f32 %v191_v30, %v67_v22  ;;  %v250_v33 = vpop.f32.mrb[2].mxu0  ;;  %v254_v34 = vpop.f32.mrb[2].mxu1 }
  0xe8   :  { %209 = vst.msk [vmem:[%s388_s4 + $0x10] sm:$0xff] %vm206_vm1, %v184_v27  ;;  %213 = vst.msk [vmem:[%s388_s4 + $0x30] sm:$0xff] %vm206_vm1, %v200_v28  ;;  %v187_v35 = vadd.f32 %v250_v33, %v62_v19  ;;  %v203_v36 = vadd.f32 %v254_v34, %v82_v23  ;;  %v178_v37 = vpop.f32.mrb[3].mxu0  ;;  %v194_v38 = vpop.f32.mrb[3].mxu1 }
  0xe9   :  { %207 = vst.msk [vmem:[%s388_s4] sm:$0xff] %vm206_vm1, %v176_v31  ;;  %211 = vst.msk [vmem:[%s388_s4 + $0x20] sm:$0xff] %vm206_vm1, %v192_v32  ;;  %v179_v39 = vadd.f32 %v178_v37, %v52_v20  ;;  %v195_v40 = vadd.f32 %v194_v38, %v72_v21 }
  0xea   :  { %210 = vst.msk [vmem:[%s388_s4 + $0x18] sm:$0xff] %vm206_vm1, %v187_v35  ;;  %214 = vst.msk [vmem:[%s388_s4 + $0x38] sm:$0xff] %vm206_vm1, %v203_v36 }
  0xeb   :  { %208 = vst.msk [vmem:[%s388_s4 + $0x8] sm:$0xff] %vm206_vm1, %v179_v39  ;;  %212 = vst.msk [vmem:[%s388_s4 + $0x28] sm:$0xff] %vm206_vm1, %v195_v40 }

// kernel: csnet_forward.15
= control target key start
LH: loop header
LB: loop body
LE: loop exit
PB: predicated region body
PF: predicated region fallthrough
CT: control target
= control target key end

     0   :  { %v554_v1 = vmov 0   ;;  %vm193_vm0 = vcmask 1040384   ;;  %vm180_vm1 = vcmask 400384   ;;  %s822_s1 = inlined_call_operand.vmem [shape: bf16[49,512], index: 1, kind: input, shape index: {}]   ;;  %s823_s3 = inlined_call_operand.<no memory space> [shape: f32[1,1], index: 3, kind: input, shape index: {}]   ;;  %s824_s0 = inlined_call_operand.vmem [shape: bf16[64,49], index: 0, kind: input, shape index: {}]   ;;  %s825_s2 = inlined_call_operand.vmem [shape: f32[64,1], index: 2, kind: input, shape index: {}]   ;;  %s826_s4 = inlined_call_operand.vmem [shape: f32[64,512], index: 4, kind: output, shape index: {}]  }
   0x1   :  { %v528_v0 = vld [vmem:[%s822_s1 + $0x4] ss:$16 sps:$4 sm:$0xff]   ;;  %240 = vmatprep.mubr.bf16.mxu0 %v554_v1  ;;  %313 = vmatprep.mubr.bf16.mxu1 %v554_v1  ;;  %v9_v2 = vstv %s823_s3  ;;  %v530_v3 = vld [vmem:[%s822_s1 + $0xc] ss:$16 sps:$4 sm:$0xff]   ;;  %v532_v4 = vld [vmem:[%s822_s1] ss:$16 sps:$4 sm:$0xff]  }
   0x2   :  { %526 = vset.pattern.permute.xlu0 %v554_v1  ;;  %527 = vset.pattern.permute.xlu1 %v554_v1  ;;  %10 = vst [vmem:[#allocation2] sm:$0x1] %v9_v2  ;;  %v533_v5 = vld [vmem:[%s822_s1 + $0x8] ss:$16 sps:$4 sm:$0xff]   ;;  %v534_v6 = vld [vmem:[%s822_s1 + $0x24] ss:$16 sps:$4 sm:$0xff]  }
   0x3   :  { %208 = vmatprep.subr.bf16.mxu0 %v528_v0  ;;  %281 = vmatprep.subr.bf16.mxu1 %v530_v3  ;;  %v536_v7 = vld [vmem:[%s822_s1 + $0x2c] ss:$16 sps:$4 sm:$0xff]   ;;  %v538_v8 = vld [vmem:[%s822_s1 + $0x20] ss:$16 sps:$4 sm:$0xff]   ;;  %v539_v9 = vld [vmem:[%s822_s1 + $0x28] ss:$16 sps:$4 sm:$0xff]  }
   0x4   :  { %209 = vmatpush1.bf16.msra.mxu0 %v532_v4  ;;  %282 = vmatpush1.bf16.msra.mxu1 %v533_v5  ;;  %v540_v10 = vld [vmem:[%s822_s1 + $0x44] ss:$16 sps:$4 sm:$0xff]   ;;  %v195_v11 = vsel %vm193_vm0, 65535, %v554_v1  ;;  %v542_v12 = vld [vmem:[%s822_s1 + $0x4c] ss:$16 sps:$4 sm:$0xff]  }
   0x5   :  { %210 = vmatprep.subr.bf16.mxu0 %v534_v6  ;;  %283 = vmatprep.subr.bf16.mxu1 %v536_v7  ;;  %v544_v13 = vld [vmem:[%s822_s1 + $0x40] ss:$16 sps:$4 sm:$0xff]   ;;  %v545_v14 = vld [vmem:[%s822_s1 + $0x48] ss:$16 sps:$4 sm:$0xff]  }
   0x6   :  { %v40_v15 = vld [vmem:[%s822_s1 + $0x60] sm:$0x11]  ;;  %v41_v16 = vld [vmem:[%s822_s1 + $0x68] sm:$0x11]  ;;  %v44_v26 = vld [vmem:[%s825_s2 + $0x10] sm:$0xff] }
   0x7   :  { %v513_v17 = vcombine.high %v40_v15, %v40_v15  ;;  %v515_v18 = vcombine.high %v41_v16, %v41_v16  ;;  %v512_v19 = vcombine.low %v40_v15, %v40_v15  ;;  %v514_v20 = vcombine.low %v41_v16, %v41_v16  ;;  %v42_v25 = vld [vmem:[%s825_s2] sm:$0xff]  ;;  %v43_v28 = vld [vmem:[%s825_s2 + $0x8] sm:$0xff]  ;;  %62 = vperm.xlu1 %527, %v44_v26   ;;  %v45_v29 = vld [vmem:[%s825_s2 + $0x18] sm:$0xff] }
   0x8   :  { %211 = vmatpush1.bf16.msra.mxu0 %v538_v8  ;;  %284 = vmatpush1.bf16.msra.mxu1 %v539_v9  ;;  %v550_v27 = vld [vmem:[%s824_s0] sm:$0xff]   ;;  %v47_v31 = vld [vmem:[%s825_s2 + $0x28] sm:$0xff]  ;;  %v48_v33 = vld [vmem:[%s825_s2 + $0x30] sm:$0xff] }
   0x9   :  { %212 = vmatprep.subr.bf16.mxu0 %v540_v10  ;;  %285 = vmatprep.subr.bf16.mxu1 %v542_v12  ;;  %v200_v21 = vand.u32 %v513_v17, %v195_v11  ;;  %v206_v22 = vand.u32 %v515_v18, %v195_v11  ;;  %v197_v23 = vand.u32 %v512_v19, %v195_v11  ;;  %v46_v30 = vld [vmem:[%s825_s2 + $0x20] sm:$0xff]  ;;  %v551_v32 = vld [vmem:[%s824_s0 + $0x8] sm:$0xff]   ;;  %v49_v34 = vld [vmem:[%s825_s2 + $0x38] sm:$0xff] }
   0xa   :  { %v203_v24 = vand.u32 %v514_v20, %v195_v11  ;;  %52 = vperm.xlu0 %526, %v42_v25   ;;  %v524_v35 = vld [vmem:[#allocation2] ss:$0 sm:$0xff]  ;;  %v552_v36 = vld [vmem:[%s824_s0 + $0x10] sm:$0xff]   ;;  %v553_v37 = vld [vmem:[%s824_s0 + $0x18] sm:$0xff]  }
   0xb   :  { %67 = vperm.xlu1 %527, %v45_v29  }
   0xc   :  { %213 = vmatpush1.bf16.msra.mxu0 %v544_v13  ;;  %286 = vmatpush1.bf16.msra.mxu1 %v545_v14 }
   0xd   :  { %214 = vmatprep.subr.bf16.mxu0 %v200_v21  ;;  %287 = vmatprep.subr.bf16.mxu1 %v206_v22 }
   0xe   :  { %57 = vperm.xlu0 %526, %v43_v28  }
   0xf   :  { %77 = vperm.xlu1 %527, %v47_v31  }
  0x10   :  { %215 = vmatpush1.bf16.msra.mxu0 %v197_v23  ;;  %288 = vmatpush1.bf16.msra.mxu1 %v203_v24 }
  0x12   :  { %72 = vperm.xlu0 %526, %v46_v30  }
  0x13   :  { %516 = vmatmul.mubr.msk.bf16.vlgmr.msra.gmra.mrb[0].mxu0 %vm180_vm1, %v550_v27  ;;  %520 = vmatmul.mubr.msk.bf16.vlgmr.msra.gmra.mrb[0].mxu1 %vm180_vm1, %v550_v27 }
  0x14   :  { %250 = vmatprep.mubr.bf16.mxu0 %v554_v1  ;;  %323 = vmatprep.mubr.bf16.mxu1 %v554_v1 }
  0x15   :  { %87 = vperm.xlu1 %527, %v49_v34  }
  0x16   :  { %82 = vperm.xlu0 %526, %v48_v33  }
  0x1a   :  { %393 = vperm.xlu0 %526, %v524_v35  }
  0x1b   :  { %517 = vmatmul.mubr.msk.bf16.gmra.mrb[4].mxu0 %vm180_vm1, %v551_v32  ;;  %521 = vmatmul.mubr.msk.bf16.gmra.mrb[4].mxu1 %vm180_vm1, %v551_v32 }
  0x1c   :  { %260 = vmatprep.mubr.bf16.mxu0 %v554_v1  ;;  %333 = vmatprep.mubr.bf16.mxu1 %v554_v1 }
  0x23   :  { %518 = vmatmul.mubr.msk.bf16.gmra.mrb[8].mxu0 %vm180_vm1, %v552_v36  ;;  %522 = vmatmul.mubr.msk.bf16.gmra.mrb[8].mxu1 %vm180_vm1, %v552_v36 }
  0x24   :  { %270 = vmatprep.mubr.bf16.mxu0 %v554_v1  ;;  %343 = vmatprep.mubr.bf16.mxu1 %v554_v1 }
  0x2b   :  { %519 = vmatmul.mubr.msk.bf16.gmra.mrb[12].mxu0 %vm180_vm1, %v553_v37  ;;  %523 = vmatmul.mubr.msk.bf16.gmra.mrb[12].mxu1 %vm180_vm1, %v553_v37 }
  0x86   :  { %v63_v1 = vpop.permute.xlu1 %62 }
  0x89   :  { %v53_v38 = vpop.permute.xlu0 %52 }
  0x8a   :  { %v68_v26 = vpop.permute.xlu1 %67 }
  0x8d   :  { %v58_v39 = vpop.permute.xlu0 %57 }
  0x91   :  { %v680_v40 = vpop.permute.xlu0 %72 }
  0x95   :  { %v682_v41 = vpop.permute.xlu0 %82 }
  0x99   :  { %v684_v42 = vpop.permute.xlu0 %393 }
  0xe6   :  { %v242_v43 = vpop.f32.mrb[0].mxu0  ;;  %v315_v44 = vpop.f32.mrb[0].mxu1 }
  0xe7   :  { %v243_v45 = vadd.f32 %v242_v43, %v53_v38  ;;  %v316_v46 = vadd.f32 %v315_v44, %v53_v38  ;;  %v244_v47 = vpop.f32.mrb[1].mxu0  ;;  %v317_v48 = vpop.f32.mrb[1].mxu1 }
  0xe8   :  { %v245_v49 = vadd.f32 %v244_v47, %v53_v38  ;;  %v318_v50 = vadd.f32 %v317_v48, %v53_v38  ;;  %v246_v51 = vpop.f32.mrb[2].mxu0  ;;  %v319_v52 = vpop.f32.mrb[2].mxu1 }
  0xe9   :  { %vm355_vm2 = vcmp.gt.f32.partialorder %v243_v45, 0.0  ;;  %vm357_vm3 = vcmp.gt.f32.partialorder %v316_v46, 0.0  ;;  %v396_v53 = vmul.f32 %v684_v42, %v243_v45  ;;  %v398_v54 = vmul.f32 %v684_v42, %v316_v46  ;;  %v248_v55 = vpop.f32.mrb[3].mxu0  ;;  %v321_v56 = vpop.f32.mrb[3].mxu1 }
  0xea   :  { %vm356_vm4 = vcmp.gt.f32.partialorder %v245_v49, 0.0  ;;  %vm358_vm5 = vcmp.gt.f32.partialorder %v318_v50, 0.0  ;;  %v397_v57 = vmul.f32 %v684_v42, %v245_v49  ;;  %v399_v58 = vmul.f32 %v684_v42, %v318_v50 }
  0xeb   :  { %v428_v59 = vsel %vm355_vm2, %v243_v45, %v396_v53  ;;  %v430_v60 = vsel %vm357_vm3, %v316_v46, %v398_v54  ;;  %v247_v61 = vadd.f32 %v246_v51, %v58_v39  ;;  %v320_v62 = vadd.f32 %v319_v52, %v58_v39 }
  0xec   :  { %v429_v63 = vsel %vm356_vm4, %v245_v49, %v397_v57  ;;  %v431_v0 = vsel %vm358_vm5, %v318_v50, %v399_v58  ;;  %460 = vst [vmem:[%s826_s4] sm:$0xff] %v428_v59  ;;  %462 = vst [vmem:[%s826_s4 + $0x10] sm:$0xff] %v430_v60  ;;  %v249_v2 = vadd.f32 %v248_v55, %v58_v39 }
  0xed   :  { %v322_v3 = vadd.f32 %v321_v56, %v58_v39  ;;  %461 = vst [vmem:[%s826_s4 + $0x8] sm:$0xff] %v429_v63  ;;  %463 = vst [vmem:[%s826_s4 + $0x18] sm:$0xff] %v431_v0  ;;  %vm359_vm6 = vcmp.gt.f32.partialorder %v247_v61, 0.0  ;;  %v400_v4 = vmul.f32 %v684_v42, %v247_v61  ;;  %vm361_vm7 = vcmp.gt.f32.partialorder %v320_v62, 0.0 }
  0xee   :  { %v402_v5 = vmul.f32 %v684_v42, %v320_v62  ;;  %vm360_vm8 = vcmp.gt.f32.partialorder %v249_v2, 0.0  ;;  %v401_v6 = vmul.f32 %v684_v42, %v249_v2  ;;  %v252_v8 = vpop.f32.mrb[4].mxu0  ;;  %v325_v9 = vpop.f32.mrb[4].mxu1 }
  0xef   :  { %vm362_vm9 = vcmp.gt.f32.partialorder %v322_v3, 0.0  ;;  %v403_v7 = vmul.f32 %v684_v42, %v322_v3  ;;  %v432_v10 = vsel %vm359_vm6, %v247_v61, %v400_v4  ;;  %v253_v12 = vadd.f32 %v252_v8, %v63_v1  ;;  %v254_v14 = vpop.f32.mrb[5].mxu0  ;;  %v327_v15 = vpop.f32.mrb[5].mxu1 }
  0xf0   :  { %v434_v11 = vsel %vm361_vm7, %v320_v62, %v402_v5  ;;  %v326_v13 = vadd.f32 %v325_v9, %v63_v1  ;;  %464 = vst [vmem:[%s826_s4 + $0x20] sm:$0xff] %v432_v10  ;;  %v433_v16 = vsel %vm360_vm8, %v249_v2, %v401_v6  ;;  %v255_v18 = vadd.f32 %v254_v14, %v63_v1  ;;  %v256_v20 = vpop.f32.mrb[6].mxu0  ;;  %v329_v21 = vpop.f32.mrb[6].mxu1 }
  0xf1   :  { %466 = vst [vmem:[%s826_s4 + $0x30] sm:$0xff] %v434_v11  ;;  %v435_v17 = vsel %vm362_vm9, %v322_v3, %v403_v7  ;;  %v328_v19 = vadd.f32 %v327_v15, %v63_v1  ;;  %465 = vst [vmem:[%s826_s4 + $0x28] sm:$0xff] %v433_v16  ;;  %vm363_vm10 = vcmp.gt.f32.partialorder %v253_v12, 0.0  ;;  %v404_v22 = vmul.f32 %v684_v42, %v253_v12  ;;  %v258_v24 = vpop.f32.mrb[7].mxu0  ;;  %v331_v25 = vpop.f32.mrb[7].mxu1 }
  0xf2   :  { %467 = vst [vmem:[%s826_s4 + $0x38] sm:$0xff] %v435_v17  ;;  %vm365_vm11 = vcmp.gt.f32.partialorder %v326_v13, 0.0  ;;  %v406_v23 = vmul.f32 %v684_v42, %v326_v13  ;;  %vm364_vm12 = vcmp.gt.f32.partialorder %v255_v18, 0.0  ;;  %v405_v27 = vmul.f32 %v684_v42, %v255_v18  ;;  %v78_v62 = vpop.permute.xlu1 %77 }
  0xf3   :  { %vm366_vm13 = vcmp.gt.f32.partialorder %v328_v19, 0.0  ;;  %v407_v28 = vmul.f32 %v684_v42, %v328_v19  ;;  %v436_v29 = vsel %vm363_vm10, %v253_v12, %v404_v22  ;;  %v257_v31 = vadd.f32 %v256_v20, %v68_v26 }
  0xf4   :  { %v438_v30 = vsel %vm365_vm11, %v326_v13, %v406_v23  ;;  %v330_v32 = vadd.f32 %v329_v21, %v68_v26  ;;  %468 = vst [vmem:[%s826_s4 + $0x40] sm:$0xff] %v436_v29  ;;  %v437_v33 = vsel %vm364_vm12, %v255_v18, %v405_v27  ;;  %v259_v35 = vadd.f32 %v258_v24, %v68_v26 }
  0xf5   :  { %470 = vst [vmem:[%s826_s4 + $0x50] sm:$0xff] %v438_v30  ;;  %v439_v34 = vsel %vm366_vm13, %v328_v19, %v407_v28  ;;  %v332_v36 = vadd.f32 %v331_v25, %v68_v26  ;;  %469 = vst [vmem:[%s826_s4 + $0x48] sm:$0xff] %v437_v33  ;;  %vm367_vm14 = vcmp.gt.f32.partialorder %v257_v31, 0.0  ;;  %v408_v37 = vmul.f32 %v684_v42, %v257_v31 }
  0xf6   :  { %471 = vst [vmem:[%s826_s4 + $0x58] sm:$0xff] %v439_v34  ;;  %vm369_vm15 = vcmp.gt.f32.partialorder %v330_v32, 0.0  ;;  %v410_v38 = vmul.f32 %v684_v42, %v330_v32  ;;  %vm368_vm0 = vcmp.gt.f32.partialorder %v259_v35, 0.0  ;;  %v409_v39 = vmul.f32 %v684_v42, %v259_v35  ;;  %v262_v44 = vpop.f32.mrb[8].mxu0  ;;  %v335_v45 = vpop.f32.mrb[8].mxu1 }
  0xf7   :  { %vm370_vm1 = vcmp.gt.f32.partialorder %v332_v36, 0.0  ;;  %v411_v43 = vmul.f32 %v684_v42, %v332_v36  ;;  %v440_v46 = vsel %vm367_vm14, %v257_v31, %v408_v37  ;;  %v263_v48 = vadd.f32 %v262_v44, %v680_v40  ;;  %v264_v50 = vpop.f32.mrb[9].mxu0  ;;  %v337_v51 = vpop.f32.mrb[9].mxu1 }
  0xf8   :  { %v442_v47 = vsel %vm369_vm15, %v330_v32, %v410_v38  ;;  %v336_v49 = vadd.f32 %v335_v45, %v680_v40  ;;  %472 = vst [vmem:[%s826_s4 + $0x60] sm:$0xff] %v440_v46  ;;  %v441_v52 = vsel %vm368_vm0, %v259_v35, %v409_v39  ;;  %v265_v54 = vadd.f32 %v264_v50, %v680_v40  ;;  %v266_v56 = vpop.f32.mrb[10].mxu0  ;;  %v339_v57 = vpop.f32.mrb[10].mxu1 }
  0xf9   :  { %474 = vst [vmem:[%s826_s4 + $0x70] sm:$0xff] %v442_v47  ;;  %v443_v53 = vsel %vm370_vm1, %v332_v36, %v411_v43  ;;  %v338_v55 = vadd.f32 %v337_v51, %v680_v40  ;;  %473 = vst [vmem:[%s826_s4 + $0x68] sm:$0xff] %v441_v52  ;;  %vm371_vm2 = vcmp.gt.f32.partialorder %v263_v48, 0.0  ;;  %v412_v58 = vmul.f32 %v684_v42, %v263_v48  ;;  %v268_v60 = vpop.f32.mrb[11].mxu0  ;;  %v341_v61 = vpop.f32.mrb[11].mxu1 }
  0xfa   :  { %475 = vst [vmem:[%s826_s4 + $0x78] sm:$0xff] %v443_v53  ;;  %vm373_vm3 = vcmp.gt.f32.partialorder %v336_v49, 0.0  ;;  %v414_v59 = vmul.f32 %v684_v42, %v336_v49  ;;  %vm372_vm4 = vcmp.gt.f32.partialorder %v265_v54, 0.0  ;;  %v413_v40 = vmul.f32 %v684_v42, %v265_v54  ;;  %v88_v30 = vpop.permute.xlu1 %87 }
  0xfb   :  { %vm374_vm5 = vcmp.gt.f32.partialorder %v338_v55, 0.0  ;;  %v415_v63 = vmul.f32 %v684_v42, %v338_v55  ;;  %v444_v0 = vsel %vm371_vm2, %v263_v48, %v412_v58  ;;  %v267_v2 = vadd.f32 %v266_v56, %v78_v62 }
  0xfc   :  { %v446_v1 = vsel %vm373_vm3, %v336_v49, %v414_v59  ;;  %v340_v3 = vadd.f32 %v339_v57, %v78_v62  ;;  %476 = vst [vmem:[%s826_s4 + $0x80] sm:$0xff] %v444_v0  ;;  %v445_v4 = vsel %vm372_vm4, %v265_v54, %v413_v40  ;;  %v269_v6 = vadd.f32 %v268_v60, %v78_v62 }
  0xfd   :  { %478 = vst [vmem:[%s826_s4 + $0x90] sm:$0xff] %v446_v1  ;;  %v447_v5 = vsel %vm374_vm5, %v338_v55, %v415_v63  ;;  %v342_v7 = vadd.f32 %v341_v61, %v78_v62  ;;  %477 = vst [vmem:[%s826_s4 + $0x88] sm:$0xff] %v445_v4  ;;  %vm375_vm6 = vcmp.gt.f32.partialorder %v267_v2, 0.0  ;;  %v416_v8 = vmul.f32 %v684_v42, %v267_v2 }
  0xfe   :  { %479 = vst [vmem:[%s826_s4 + $0x98] sm:$0xff] %v447_v5  ;;  %vm377_vm7 = vcmp.gt.f32.partialorder %v340_v3, 0.0  ;;  %v418_v9 = vmul.f32 %v684_v42, %v340_v3  ;;  %vm376_vm8 = vcmp.gt.f32.partialorder %v269_v6, 0.0  ;;  %v417_v10 = vmul.f32 %v684_v42, %v269_v6  ;;  %v272_v12 = vpop.f32.mrb[12].mxu0  ;;  %v345_v13 = vpop.f32.mrb[12].mxu1 }
  0xff   :  { %vm378_vm9 = vcmp.gt.f32.partialorder %v342_v7, 0.0  ;;  %v419_v11 = vmul.f32 %v684_v42, %v342_v7  ;;  %v448_v14 = vsel %vm375_vm6, %v267_v2, %v416_v8  ;;  %v273_v16 = vadd.f32 %v272_v12, %v682_v41  ;;  %v274_v18 = vpop.f32.mrb[13].mxu0  ;;  %v347_v19 = vpop.f32.mrb[13].mxu1 }
 0x100   :  { %v450_v15 = vsel %vm377_vm7, %v340_v3, %v418_v9  ;;  %v346_v17 = vadd.f32 %v345_v13, %v682_v41  ;;  %480 = vst [vmem:[%s826_s4 + $0xa0] sm:$0xff] %v448_v14  ;;  %v449_v20 = vsel %vm376_vm8, %v269_v6, %v417_v10  ;;  %v275_v22 = vadd.f32 %v274_v18, %v682_v41  ;;  %v276_v24 = vpop.f32.mrb[14].mxu0  ;;  %v349_v25 = vpop.f32.mrb[14].mxu1 }
 0x101   :  { %482 = vst [vmem:[%s826_s4 + $0xb0] sm:$0xff] %v450_v15  ;;  %v451_v21 = vsel %vm378_vm9, %v342_v7, %v419_v11  ;;  %v348_v23 = vadd.f32 %v347_v19, %v682_v41  ;;  %481 = vst [vmem:[%s826_s4 + $0xa8] sm:$0xff] %v449_v20  ;;  %vm379_vm10 = vcmp.gt.f32.partialorder %v273_v16, 0.0  ;;  %v420_v26 = vmul.f32 %v684_v42, %v273_v16  ;;  %v278_v28 = vpop.f32.mrb[15].mxu0  ;;  %v351_v29 = vpop.f32.mrb[15].mxu1 }
 0x102   :  { %483 = vst [vmem:[%s826_s4 + $0xb8] sm:$0xff] %v451_v21  ;;  %vm381_vm11 = vcmp.gt.f32.partialorder %v346_v17, 0.0  ;;  %v422_v27 = vmul.f32 %v684_v42, %v346_v17  ;;  %vm380_vm12 = vcmp.gt.f32.partialorder %v275_v22, 0.0  ;;  %v421_v41 = vmul.f32 %v684_v42, %v275_v22 }
 0x103   :  { %vm382_vm13 = vcmp.gt.f32.partialorder %v348_v23, 0.0  ;;  %v423_v31 = vmul.f32 %v684_v42, %v348_v23  ;;  %v452_v32 = vsel %vm379_vm10, %v273_v16, %v420_v26  ;;  %v277_v34 = vadd.f32 %v276_v24, %v88_v30 }
 0x104   :  { %v454_v33 = vsel %vm381_vm11, %v346_v17, %v422_v27  ;;  %v350_v35 = vadd.f32 %v349_v25, %v88_v30  ;;  %484 = vst [vmem:[%s826_s4 + $0xc0] sm:$0xff] %v452_v32  ;;  %v453_v36 = vsel %vm380_vm12, %v275_v22, %v421_v41  ;;  %v279_v38 = vadd.f32 %v278_v28, %v88_v30 }
 0x105   :  { %486 = vst [vmem:[%s826_s4 + $0xd0] sm:$0xff] %v454_v33  ;;  %v455_v37 = vsel %vm382_vm13, %v348_v23, %v423_v31  ;;  %v352_v39 = vadd.f32 %v351_v29, %v88_v30  ;;  %485 = vst [vmem:[%s826_s4 + $0xc8] sm:$0xff] %v453_v36  ;;  %vm383_vm14 = vcmp.gt.f32.partialorder %v277_v34, 0.0  ;;  %v424_v43 = vmul.f32 %v684_v42, %v277_v34 }
 0x106   :  { %487 = vst [vmem:[%s826_s4 + $0xd8] sm:$0xff] %v455_v37  ;;  %vm385_vm15 = vcmp.gt.f32.partialorder %v350_v35, 0.0  ;;  %v426_v44 = vmul.f32 %v684_v42, %v350_v35  ;;  %vm384_vm0 = vcmp.gt.f32.partialorder %v279_v38, 0.0  ;;  %v425_v45 = vmul.f32 %v684_v42, %v279_v38 }
 0x107   :  { %vm386_vm1 = vcmp.gt.f32.partialorder %v352_v39, 0.0  ;;  %v427_v46 = vmul.f32 %v684_v42, %v352_v39  ;;  %v456_v47 = vsel %vm383_vm14, %v277_v34, %v424_v43 }
 0x108   :  { %v458_v48 = vsel %vm385_vm15, %v350_v35, %v426_v44  ;;  %488 = vst [vmem:[%s826_s4 + $0xe0] sm:$0xff] %v456_v47  ;;  %v457_v49 = vsel %vm384_vm0, %v279_v38, %v425_v45 }
 0x109   :  { %490 = vst [vmem:[%s826_s4 + $0xf0] sm:$0xff] %v458_v48  ;;  %v459_v50 = vsel %vm386_vm1, %v352_v39, %v427_v46  ;;  %489 = vst [vmem:[%s826_s4 + $0xe8] sm:$0xff] %v457_v49 }
 0x10a   :  { %491 = vst [vmem:[%s826_s4 + $0xf8] sm:$0xff] %v459_v50 }

// kernel: csnet_forward.16
= control target key start
LH: loop header
LB: loop body
LE: loop exit
PB: predicated region body
PF: predicated region fallthrough
CT: control target
= control target key end

     0   :  { %v2579_v34 = vmov 0   ;;  %vm1062_vm0 = vcmask 523264   ;;  %s3981_s1 = inlined_call_operand.vmem [shape: bf16[576,512], index: 1, kind: input, shape index: {}]   ;;  %s3982_s0 = inlined_call_operand.vmem [shape: bf16[64,576], index: 0, kind: input, shape index: {}]   ;;  %s3983_s2 = inlined_call_operand.vmem [shape: f32[64,1], index: 2, kind: input, shape index: {}]   ;;  %s3984_s4 = inlined_call_operand.vmem [shape: f32[64,1], index: 4, kind: input, shape index: {}]   ;;  %s3985_s5 = inlined_call_operand.vmem [shape: f32[64,1], index: 5, kind: input, shape index: {}]   ;;  %s3986_s3 = inlined_call_operand.<no memory space> [shape: f32[1,1], index: 3, kind: input, shape index: {}]   ;;  %s3987_s6 = inlined_call_operand.vmem [shape: f32[64,512], index: 6, kind: output, shape index: {}]  }
   0x1   :  { %v2319_v0 = vld [vmem:[%s3981_s1 + $0x4] ss:$16 sps:$4 sm:$0xff]   ;;  %v2321_v1 = vld [vmem:[%s3981_s1 + $0xc] ss:$16 sps:$4 sm:$0xff]   ;;  %v2323_v2 = vld [vmem:[%s3981_s1] ss:$16 sps:$4 sm:$0xff]   ;;  %2317 = vset.pattern.permute.xlu0 %v2579_v34  ;;  %2318 = vset.pattern.permute.xlu1 %v2579_v34 }
   0x2   :  { %1075 = vmatprep.subr.bf16.mxu0 %v2319_v0  ;;  %v2324_v3 = vld [vmem:[%s3981_s1 + $0x8] ss:$16 sps:$4 sm:$0xff]   ;;  %1294 = vmatprep.subr.bf16.mxu1 %v2321_v1  ;;  %v2325_v4 = vld [vmem:[%s3981_s1 + $0x24] ss:$16 sps:$4 sm:$0xff]   ;;  %v2327_v5 = vld [vmem:[%s3981_s1 + $0x2c] ss:$16 sps:$4 sm:$0xff]  }
   0x3   :  { %1076 = vmatpush1.bf16.msra.mxu0 %v2323_v2  ;;  %1295 = vmatpush1.bf16.msra.mxu1 %v2324_v3  ;;  %v2329_v6 = vld [vmem:[%s3981_s1 + $0x20] ss:$16 sps:$4 sm:$0xff]   ;;  %v2330_v7 = vld [vmem:[%s3981_s1 + $0x28] ss:$16 sps:$4 sm:$0xff]   ;;  %v2331_v8 = vld [vmem:[%s3981_s1 + $0x44] ss:$16 sps:$4 sm:$0xff]  }
   0x4   :  { %1077 = vmatprep.subr.bf16.mxu0 %v2325_v4  ;;  %1296 = vmatprep.subr.bf16.mxu1 %v2327_v5  ;;  %v2333_v9 = vld [vmem:[%s3981_s1 + $0x4c] ss:$16 sps:$4 sm:$0xff]   ;;  %v2335_v10 = vld [vmem:[%s3981_s1 + $0x40] ss:$16 sps:$4 sm:$0xff]   ;;  %v2336_v11 = vld [vmem:[%s3981_s1 + $0x48] ss:$16 sps:$4 sm:$0xff]  }
   0x5   :  { %v2337_v12 = vld [vmem:[%s3981_s1 + $0x64] ss:$16 sps:$4 sm:$0xff]   ;;  %v2339_v13 = vld [vmem:[%s3981_s1 + $0x6c] ss:$16 sps:$4 sm:$0xff]   ;;  %v2341_v14 = vld [vmem:[%s3981_s1 + $0x60] ss:$16 sps:$4 sm:$0xff]  }
   0x6   :  { %v2342_v15 = vld [vmem:[%s3981_s1 + $0x68] ss:$16 sps:$4 sm:$0xff]   ;;  %v2343_v16 = vld [vmem:[%s3981_s1 + $0x84] ss:$16 sps:$4 sm:$0xff]   ;;  %v2345_v17 = vld [vmem:[%s3981_s1 + $0x8c] ss:$16 sps:$4 sm:$0xff]  }
   0x7   :  { %1078 = vmatpush1.bf16.msra.mxu0 %v2329_v6  ;;  %1297 = vmatpush1.bf16.msra.mxu1 %v2330_v7  ;;  %v2347_v18 = vld [vmem:[%s3981_s1 + $0x80] ss:$16 sps:$4 sm:$0xff]   ;;  %v2348_v19 = vld [vmem:[%s3981_s1 + $0x88] ss:$16 sps:$4 sm:$0xff]   ;;  %v2349_v20 = vld [vmem:[%s3981_s1 + $0xa4] ss:$16 sps:$4 sm:$0xff]  }
   0x8   :  { %1079 = vmatprep.subr.bf16.mxu0 %v2331_v8  ;;  %1298 = vmatprep.subr.bf16.mxu1 %v2333_v9  ;;  %v2351_v21 = vld [vmem:[%s3981_s1 + $0xac] ss:$16 sps:$4 sm:$0xff]   ;;  %v2353_v22 = vld [vmem:[%s3981_s1 + $0xa0] ss:$16 sps:$4 sm:$0xff]   ;;  %v2354_v23 = vld [vmem:[%s3981_s1 + $0xa8] ss:$16 sps:$4 sm:$0xff]  }
   0x9   :  { %v2355_v24 = vld [vmem:[%s3981_s1 + $0xc4] ss:$16 sps:$4 sm:$0xff]   ;;  %v2357_v25 = vld [vmem:[%s3981_s1 + $0xcc] ss:$16 sps:$4 sm:$0xff]   ;;  %v2359_v26 = vld [vmem:[%s3981_s1 + $0xc0] ss:$16 sps:$4 sm:$0xff]  }
   0xa   :  { %v2360_v27 = vld [vmem:[%s3981_s1 + $0xc8] ss:$16 sps:$4 sm:$0xff]   ;;  %v2361_v28 = vld [vmem:[%s3981_s1 + $0xe4] ss:$16 sps:$4 sm:$0xff]   ;;  %v2363_v29 = vld [vmem:[%s3981_s1 + $0xec] ss:$16 sps:$4 sm:$0xff]  }
   0xb   :  { %1080 = vmatpush1.bf16.msra.mxu0 %v2335_v10  ;;  %1299 = vmatpush1.bf16.msra.mxu1 %v2336_v11  ;;  %v2365_v30 = vld [vmem:[%s3981_s1 + $0xe0] ss:$16 sps:$4 sm:$0xff]   ;;  %v2366_v31 = vld [vmem:[%s3981_s1 + $0xe8] ss:$16 sps:$4 sm:$0xff]   ;;  %v2367_v32 = vld [vmem:[%s3981_s1 + $0x104] ss:$16 sps:$4 sm:$0xff]  }
   0xc   :  { %1081 = vmatprep.subr.bf16.mxu0 %v2337_v12  ;;  %1300 = vmatprep.subr.bf16.mxu1 %v2339_v13  ;;  %v2369_v33 = vld [vmem:[%s3981_s1 + $0x10c] ss:$16 sps:$4 sm:$0xff]   ;;  %v2371_v35 = vld [vmem:[%s3981_s1 + $0x100] ss:$16 sps:$4 sm:$0xff]   ;;  %v2372_v36 = vld [vmem:[%s3981_s1 + $0x108] ss:$16 sps:$4 sm:$0xff]  }
   0xd   :  { %v2373_v37 = vld [vmem:[%s3981_s1 + $0x124] ss:$16 sps:$4 sm:$0xff]   ;;  %v2375_v38 = vld [vmem:[%s3981_s1 + $0x12c] ss:$16 sps:$4 sm:$0xff]   ;;  %v2377_v39 = vld [vmem:[%s3981_s1 + $0x120] ss:$16 sps:$4 sm:$0xff]  }
   0xe   :  { %v2378_v40 = vld [vmem:[%s3981_s1 + $0x128] ss:$16 sps:$4 sm:$0xff]   ;;  %v2379_v41 = vld [vmem:[%s3981_s1 + $0x144] ss:$16 sps:$4 sm:$0xff]   ;;  %v2381_v42 = vld [vmem:[%s3981_s1 + $0x14c] ss:$16 sps:$4 sm:$0xff]  }
   0xf   :  { %1082 = vmatpush1.bf16.msra.mxu0 %v2341_v14  ;;  %1301 = vmatpush1.bf16.msra.mxu1 %v2342_v15  ;;  %v2383_v43 = vld [vmem:[%s3981_s1 + $0x140] ss:$16 sps:$4 sm:$0xff]   ;;  %v2384_v44 = vld [vmem:[%s3981_s1 + $0x148] ss:$16 sps:$4 sm:$0xff]   ;;  %v2385_v45 = vld [vmem:[%s3981_s1 + $0x164] ss:$16 sps:$4 sm:$0xff]  }
  0x10   :  { %1083 = vmatprep.subr.bf16.mxu0 %v2343_v16  ;;  %1302 = vmatprep.subr.bf16.mxu1 %v2345_v17  ;;  %v2387_v46 = vld [vmem:[%s3981_s1 + $0x16c] ss:$16 sps:$4 sm:$0xff]   ;;  %v2389_v47 = vld [vmem:[%s3981_s1 + $0x160] ss:$16 sps:$4 sm:$0xff]   ;;  %v2390_v48 = vld [vmem:[%s3981_s1 + $0x168] ss:$16 sps:$4 sm:$0xff]  }
  0x11   :  { %v2417_v49 = vld [vmem:[%s3982_s0 + $0x4] ss:$20 sps:$4 sm:$0xff]   ;;  %v2393_v51 = vld [vmem:[%s3981_s1 + $0x18c] ss:$16 sps:$4 sm:$0xff]   ;;  %v2395_v52 = vld [vmem:[%s3981_s1 + $0x180] ss:$16 sps:$4 sm:$0xff]  }
  0x12   :  { %v2391_v50 = vld [vmem:[%s3981_s1 + $0x184] ss:$16 sps:$4 sm:$0xff]   ;;  %1107 = vmatprep.mubr.bf16.mxu0 %v2417_v49  ;;  %1326 = vmatprep.mubr.bf16.mxu1 %v2417_v49  ;;  %v2396_v53 = vld [vmem:[%s3981_s1 + $0x188] ss:$16 sps:$4 sm:$0xff]   ;;  %v2399_v55 = vld [vmem:[%s3981_s1 + $0x1ac] ss:$16 sps:$4 sm:$0xff]  }
  0x13   :  { %1084 = vmatpush1.bf16.msra.mxu0 %v2347_v18  ;;  %1303 = vmatpush1.bf16.msra.mxu1 %v2348_v19  ;;  %v2397_v54 = vld [vmem:[%s3981_s1 + $0x1a4] ss:$16 sps:$4 sm:$0xff]   ;;  %v2401_v56 = vld [vmem:[%s3981_s1 + $0x1a0] ss:$16 sps:$4 sm:$0xff]   ;;  %v2402_v57 = vld [vmem:[%s3981_s1 + $0x1a8] ss:$16 sps:$4 sm:$0xff]  }
  0x14   :  { %1085 = vmatprep.subr.bf16.mxu0 %v2349_v20  ;;  %1304 = vmatprep.subr.bf16.mxu1 %v2351_v21  ;;  %v2403_v58 = vld [vmem:[%s3981_s1 + $0x1c4] ss:$16 sps:$4 sm:$0xff]   ;;  %v2405_v59 = vld [vmem:[%s3981_s1 + $0x1cc] ss:$16 sps:$4 sm:$0xff]   ;;  %v2407_v60 = vld [vmem:[%s3981_s1 + $0x1c0] ss:$16 sps:$4 sm:$0xff]  }
  0x15   :  { %v2408_v61 = vld [vmem:[%s3981_s1 + $0x1c8] ss:$16 sps:$4 sm:$0xff]   ;;  %v2409_v62 = vld [vmem:[%s3981_s1 + $0x1e4] ss:$16 sps:$4 sm:$0xff]   ;;  %v2411_v63 = vld [vmem:[%s3981_s1 + $0x1ec] ss:$16 sps:$4 sm:$0xff]  }
  0x16   :  { %v2413_v0 = vld [vmem:[%s3981_s1 + $0x1e0] ss:$16 sps:$4 sm:$0xff]   ;;  %v2414_v1 = vld [vmem:[%s3981_s1 + $0x1e8] ss:$16 sps:$4 sm:$0xff]   ;;  %v2420_v2 = vld [vmem:[%s3981_s1 + $0x204] ss:$16 sps:$4 sm:$0xff]  }
  0x17   :  { %1086 = vmatpush1.bf16.msra.mxu0 %v2353_v22  ;;  %1305 = vmatpush1.bf16.msra.mxu1 %v2354_v23  ;;  %v2423_v3 = vld [vmem:[%s3981_s1 + $0x20c] ss:$16 sps:$4 sm:$0xff]   ;;  %v2415_v4 = vld [vmem:[%s3982_s0] ss:$20 sps:$4 sm:$0xff]   ;;  %v2421_v6 = vld [vmem:[%s3981_s1 + $0x208] ss:$16 sps:$4 sm:$0xff]  }
  0x18   :  { %1087 = vmatprep.subr.bf16.mxu0 %v2355_v24  ;;  %1306 = vmatprep.subr.bf16.mxu1 %v2357_v25  ;;  %v2418_v5 = vld [vmem:[%s3981_s1 + $0x200] ss:$16 sps:$4 sm:$0xff]   ;;  %v2426_v7 = vld [vmem:[%s3981_s1 + $0x224] ss:$16 sps:$4 sm:$0xff]   ;;  %v2429_v8 = vld [vmem:[%s3981_s1 + $0x22c] ss:$16 sps:$4 sm:$0xff]  }
  0x19   :  { %v2424_v9 = vld [vmem:[%s3981_s1 + $0x220] ss:$16 sps:$4 sm:$0xff]   ;;  %v2427_v10 = vld [vmem:[%s3981_s1 + $0x228] ss:$16 sps:$4 sm:$0xff]   ;;  %v2432_v11 = vld [vmem:[%s3981_s1 + $0x244] ss:$16 sps:$4 sm:$0xff]  }
  0x1a   :  { %v2435_v12 = vld [vmem:[%s3981_s1 + $0x24c] ss:$16 sps:$4 sm:$0xff]   ;;  %v2430_v13 = vld [vmem:[%s3981_s1 + $0x240] ss:$16 sps:$4 sm:$0xff]   ;;  %v2433_v14 = vld [vmem:[%s3981_s1 + $0x248] ss:$16 sps:$4 sm:$0xff]  }
  0x1b   :  { %1088 = vmatpush1.bf16.msra.mxu0 %v2359_v26  ;;  %1307 = vmatpush1.bf16.msra.mxu1 %v2360_v27  ;;  %v2478_v15 = vld [vmem:[%s3982_s0 + $0x2c] ss:$20 sps:$4 sm:$0xff]   ;;  %v2480_v16 = vld [vmem:[%s3982_s0 + $0x28] ss:$20 sps:$4 sm:$0xff]   ;;  %v2438_v17 = vld [vmem:[%s3981_s1 + $0x264] ss:$16 sps:$4 sm:$0xff]  }
  0x1c   :  { %1089 = vmatprep.subr.bf16.mxu0 %v2361_v28  ;;  %1308 = vmatprep.subr.bf16.mxu1 %v2363_v29  ;;  %v2441_v18 = vld [vmem:[%s3981_s1 + $0x26c] ss:$16 sps:$4 sm:$0xff]   ;;  %v2436_v19 = vld [vmem:[%s3981_s1 + $0x260] ss:$16 sps:$4 sm:$0xff]   ;;  %v2439_v20 = vld [vmem:[%s3981_s1 + $0x268] ss:$16 sps:$4 sm:$0xff]  }
  0x1d   :  { %v2444_v21 = vld [vmem:[%s3981_s1 + $0x284] ss:$16 sps:$4 sm:$0xff]   ;;  %v2447_v22 = vld [vmem:[%s3981_s1 + $0x28c] ss:$16 sps:$4 sm:$0xff]   ;;  %v2442_v23 = vld [vmem:[%s3981_s1 + $0x280] ss:$16 sps:$4 sm:$0xff]  }
  0x1e   :  { %v2493_v24 = vld [vmem:[%s3982_s0 + $0x54] ss:$20 sps:$4 sm:$0xff]   ;;  %v2495_v26 = vld [vmem:[%s3982_s0 + $0x50] ss:$20 sps:$4 sm:$0xff]   ;;  %v2453_v28 = vld [vmem:[%s3981_s1 + $0x2ac] ss:$16 sps:$4 sm:$0xff]  }
  0x1f   :  { %1090 = vmatpush1.bf16.msra.mxu0 %v2365_v30  ;;  %1309 = vmatpush1.bf16.msra.mxu1 %v2366_v31  ;;  %v2445_v25 = vld [vmem:[%s3981_s1 + $0x288] ss:$16 sps:$4 sm:$0xff]   ;;  %v2450_v27 = vld [vmem:[%s3981_s1 + $0x2a4] ss:$16 sps:$4 sm:$0xff]   ;;  %v2448_v29 = vld [vmem:[%s3981_s1 + $0x2a0] ss:$16 sps:$4 sm:$0xff]  }
  0x20   :  { %1091 = vmatprep.subr.bf16.mxu0 %v2367_v32  ;;  %1310 = vmatprep.subr.bf16.mxu1 %v2369_v33  ;;  %v2451_v30 = vld [vmem:[%s3981_s1 + $0x2a8] ss:$16 sps:$4 sm:$0xff]   ;;  %v2456_v31 = vld [vmem:[%s3981_s1 + $0x2c4] ss:$16 sps:$4 sm:$0xff]   ;;  %v2508_v32 = vld [vmem:[%s3982_s0 + $0x7c] ss:$20 sps:$4 sm:$0xff]  }
  0x21   :  { %v2459_v33 = vld [vmem:[%s3981_s1 + $0x2cc] ss:$16 sps:$4 sm:$0xff]   ;;  %v2472_v49 = vld [vmem:[%s3981_s1 + $0x320] ss:$16 sps:$4 sm:$0xff]  }
  0x23   :  { %1092 = vmatpush1.bf16.msra.mxu0 %v2371_v35  ;;  %1311 = vmatpush1.bf16.msra.mxu1 %v2372_v36  ;;  %v2454_v35 = vld [vmem:[%s3981_s1 + $0x2c0] ss:$16 sps:$4 sm:$0xff]   ;;  %v2457_v36 = vld [vmem:[%s3981_s1 + $0x2c8] ss:$16 sps:$4 sm:$0xff]  }
  0x24   :  { %1093 = vmatprep.subr.bf16.mxu0 %v2373_v37  ;;  %1312 = vmatprep.subr.bf16.mxu1 %v2375_v38  ;;  %v2510_v37 = vld [vmem:[%s3982_s0 + $0x78] ss:$20 sps:$4 sm:$0xff]   ;;  %v2462_v38 = vld [vmem:[%s3981_s1 + $0x2e4] ss:$16 sps:$4 sm:$0xff]  }
  0x27   :  { %1094 = vmatpush1.bf16.msra.mxu0 %v2377_v39  ;;  %1313 = vmatpush1.bf16.msra.mxu1 %v2378_v40  ;;  %v2465_v39 = vld [vmem:[%s3981_s1 + $0x2ec] ss:$16 sps:$4 sm:$0xff]   ;;  %v2460_v40 = vld [vmem:[%s3981_s1 + $0x2e0] ss:$16 sps:$4 sm:$0xff]  }
  0x28   :  { %1095 = vmatprep.subr.bf16.mxu0 %v2379_v41  ;;  %1314 = vmatprep.subr.bf16.mxu1 %v2381_v42  ;;  %v2463_v41 = vld [vmem:[%s3981_s1 + $0x2e8] ss:$16 sps:$4 sm:$0xff]   ;;  %v2525_v42 = vld [vmem:[%s3982_s0 + $0xc] ss:$20 sps:$4 sm:$0xff]  }
  0x2b   :  { %1096 = vmatpush1.bf16.msra.mxu0 %v2383_v43  ;;  %1315 = vmatpush1.bf16.msra.mxu1 %v2384_v44  ;;  %v2468_v43 = vld [vmem:[%s3981_s1 + $0x304] ss:$16 sps:$4 sm:$0xff]   ;;  %v2471_v44 = vld [vmem:[%s3981_s1 + $0x30c] ss:$16 sps:$4 sm:$0xff]  }
  0x2c   :  { %1097 = vmatprep.subr.bf16.mxu0 %v2385_v45  ;;  %1316 = vmatprep.subr.bf16.mxu1 %v2387_v46  ;;  %v2466_v45 = vld [vmem:[%s3981_s1 + $0x300] ss:$16 sps:$4 sm:$0xff]   ;;  %v2469_v46 = vld [vmem:[%s3981_s1 + $0x308] ss:$16 sps:$4 sm:$0xff]  }
  0x2f   :  { %1098 = vmatpush1.bf16.msra.mxu0 %v2389_v47  ;;  %1317 = vmatpush1.bf16.msra.mxu1 %v2390_v48  ;;  %v2474_v47 = vld [vmem:[%s3981_s1 + $0x324] ss:$16 sps:$4 sm:$0xff]   ;;  %v2477_v48 = vld [vmem:[%s3981_s1 + $0x32c] ss:$16 sps:$4 sm:$0xff]  }
  0x30   :  { %1099 = vmatprep.subr.bf16.mxu0 %v2391_v50  ;;  %1318 = vmatprep.subr.bf16.mxu1 %v2393_v51  ;;  %v2475_v50 = vld [vmem:[%s3981_s1 + $0x328] ss:$16 sps:$4 sm:$0xff]   ;;  %v2483_v51 = vld [vmem:[%s3981_s1 + $0x344] ss:$16 sps:$4 sm:$0xff]  }
  0x33   :  { %1100 = vmatpush1.bf16.msra.mxu0 %v2395_v52  ;;  %1319 = vmatpush1.bf16.msra.mxu1 %v2396_v53  ;;  %v2486_v52 = vld [vmem:[%s3981_s1 + $0x34c] ss:$16 sps:$4 sm:$0xff]   ;;  %v2481_v53 = vld [vmem:[%s3981_s1 + $0x340] ss:$16 sps:$4 sm:$0xff]  }
  0x34   :  { %1101 = vmatprep.subr.bf16.mxu0 %v2397_v54  ;;  %1320 = vmatprep.subr.bf16.mxu1 %v2399_v55  ;;  %v2484_v54 = vld [vmem:[%s3981_s1 + $0x348] ss:$16 sps:$4 sm:$0xff]   ;;  %v2489_v55 = vld [vmem:[%s3981_s1 + $0x364] ss:$16 sps:$4 sm:$0xff]  }
  0x37   :  { %1102 = vmatpush1.bf16.msra.mxu0 %v2401_v56  ;;  %1321 = vmatpush1.bf16.msra.mxu1 %v2402_v57  ;;  %v2492_v56 = vld [vmem:[%s3981_s1 + $0x36c] ss:$16 sps:$4 sm:$0xff]   ;;  %v2487_v57 = vld [vmem:[%s3981_s1 + $0x360] ss:$16 sps:$4 sm:$0xff]  }
  0x38   :  { %1103 = vmatprep.subr.bf16.mxu0 %v2403_v58  ;;  %1322 = vmatprep.subr.bf16.mxu1 %v2405_v59  ;;  %v2490_v58 = vld [vmem:[%s3981_s1 + $0x368] ss:$16 sps:$4 sm:$0xff]   ;;  %v2498_v59 = vld [vmem:[%s3981_s1 + $0x384] ss:$16 sps:$4 sm:$0xff]  }
  0x3b   :  { %1104 = vmatpush1.bf16.msra.mxu0 %v2407_v60  ;;  %1323 = vmatpush1.bf16.msra.mxu1 %v2408_v61  ;;  %v2501_v60 = vld [vmem:[%s3981_s1 + $0x38c] ss:$16 sps:$4 sm:$0xff]   ;;  %v194_v61 = vld [vmem:[%s3983_s2] sm:$0xff] }
  0x3c   :  { %1105 = vmatprep.subr.bf16.mxu0 %v2409_v62  ;;  %1324 = vmatprep.subr.bf16.mxu1 %v2411_v63  ;;  %v196_v62 = vld [vmem:[%s3983_s2 + $0x10] sm:$0xff] }
  0x3d   :  { %204 = vperm.xlu0 %2317, %v194_v61   ;;  %v2496_v63 = vld [vmem:[%s3981_s1 + $0x380] ss:$16 sps:$4 sm:$0xff]   ;;  %214 = vperm.xlu1 %2318, %v196_v62   ;;  %v11_v61 = vstv %s3986_s3 }
  0x3e   :  { %12 = vst [vmem:[#allocation2] sm:$0x1] %v11_v61 }
  0x3f   :  { %1106 = vmatpush1.bf16.msra.mxu0 %v2413_v0  ;;  %1325 = vmatpush1.bf16.msra.mxu1 %v2414_v1  ;;  %v2499_v0 = vld [vmem:[%s3981_s1 + $0x388] ss:$16 sps:$4 sm:$0xff]  }
  0x40   :  { %1148 = vmatprep.subr.bf16.mxu0 %v2420_v2  ;;  %1367 = vmatprep.subr.bf16.mxu1 %v2423_v3  ;;  %v195_v1 = vld [vmem:[%s3983_s2 + $0x8] sm:$0xff]  ;;  %v2504_v2 = vld [vmem:[%s3981_s1 + $0x3a4] ss:$16 sps:$4 sm:$0xff]  }
  0x41   :  { %v2507_v3 = vld [vmem:[%s3981_s1 + $0x3ac] ss:$16 sps:$4 sm:$0xff]   ;;  %209 = vperm.xlu0 %2317, %v195_v1  }
  0x42   :  { %1108 = vmatmul.mubr.bf16.vlgmr.msra.gmra.mrb[0].mxu0 %v2415_v4  ;;  %1327 = vmatmul.mubr.bf16.vlgmr.msra.gmra.mrb[0].mxu1 %v2415_v4  ;;  %v197_v4 = vld [vmem:[%s3983_s2 + $0x18] sm:$0xff] }
  0x43   :  { %1149 = vmatpush1.bf16.msra.mxu0 %v2418_v5  ;;  %1368 = vmatpush1.bf16.msra.mxu1 %v2421_v6  ;;  %v2502_v5 = vld [vmem:[%s3981_s1 + $0x3a0] ss:$16 sps:$4 sm:$0xff]   ;;  %v2505_v6 = vld [vmem:[%s3981_s1 + $0x3a8] ss:$16 sps:$4 sm:$0xff]  }
  0x44   :  { %1150 = vmatprep.subr.bf16.mxu0 %v2426_v7  ;;  %1369 = vmatprep.subr.bf16.mxu1 %v2429_v8  ;;  %v198_v7 = vld [vmem:[%s3983_s2 + $0x20] sm:$0xff] }
  0x45   :  { %1117 = vmatprep.mubr.bf16.mxu0 %v2478_v15  ;;  %1336 = vmatprep.mubr.bf16.mxu1 %v2478_v15  ;;  %v2513_v8 = vld [vmem:[%s3981_s1 + $0x3c4] ss:$16 sps:$4 sm:$0xff]   ;;  %v2522_v15 = vld [vmem:[%s3981_s1 + $0x3ec] ss:$16 sps:$4 sm:$0xff]  }
  0x46   :  { %219 = vperm.xlu1 %2318, %v197_v4   ;;  %224 = vperm.xlu0 %2317, %v198_v7  }
  0x47   :  { %1151 = vmatpush1.bf16.msra.mxu0 %v2424_v9  ;;  %1370 = vmatpush1.bf16.msra.mxu1 %v2427_v10  ;;  %v2516_v9 = vld [vmem:[%s3981_s1 + $0x3cc] ss:$16 sps:$4 sm:$0xff]  }
  0x48   :  { %1152 = vmatprep.subr.bf16.mxu0 %v2432_v11  ;;  %1371 = vmatprep.subr.bf16.mxu1 %v2435_v12  ;;  %v199_v10 = vld [vmem:[%s3983_s2 + $0x28] sm:$0xff]  ;;  %v2511_v11 = vld [vmem:[%s3981_s1 + $0x3c0] ss:$16 sps:$4 sm:$0xff]  }
  0x49   :  { %v2514_v12 = vld [vmem:[%s3981_s1 + $0x3c8] ss:$16 sps:$4 sm:$0xff]  }
  0x4a   :  { %1118 = vmatmul.mubr.bf16.gmra.mrb[4].mxu0 %v2480_v16  ;;  %1337 = vmatmul.mubr.bf16.gmra.mrb[4].mxu1 %v2480_v16  ;;  %v201_v16 = vld [vmem:[%s3983_s2 + $0x38] sm:$0xff] }
  0x4b   :  { %1153 = vmatpush1.bf16.msra.mxu0 %v2430_v13  ;;  %1372 = vmatpush1.bf16.msra.mxu1 %v2433_v14  ;;  %v200_v13 = vld [vmem:[%s3983_s2 + $0x30] sm:$0xff] }
  0x4c   :  { %1154 = vmatprep.subr.bf16.mxu0 %v2438_v17  ;;  %1373 = vmatprep.subr.bf16.mxu1 %v2441_v18  ;;  %v2519_v14 = vld [vmem:[%s3981_s1 + $0x3e4] ss:$16 sps:$4 sm:$0xff]   ;;  %v2517_v17 = vld [vmem:[%s3981_s1 + $0x3e0] ss:$16 sps:$4 sm:$0xff]   ;;  %v2520_v18 = vld [vmem:[%s3981_s1 + $0x3e8] ss:$16 sps:$4 sm:$0xff]  }
  0x4d   :  { %1127 = vmatprep.mubr.bf16.mxu0 %v2493_v24  ;;  %1346 = vmatprep.mubr.bf16.mxu1 %v2493_v24  ;;  %v2526_v24 = vld [vmem:[%s3981_s1 + $0x400] ss:$16 sps:$4 sm:$0xff]  }
  0x4e   :  { %229 = vperm.xlu1 %2318, %v199_v10   ;;  %234 = vperm.xlu0 %2317, %v200_v13  }
  0x4f   :  { %1155 = vmatpush1.bf16.msra.mxu0 %v2436_v19  ;;  %1374 = vmatpush1.bf16.msra.mxu1 %v2439_v20  ;;  %v1746_v19 = vld [vmem:[%s3984_s4 + $0x8] sm:$0xff]  ;;  %v2528_v20 = vld [vmem:[%s3981_s1 + $0x404] ss:$16 sps:$4 sm:$0xff]  }
  0x50   :  { %1156 = vmatprep.subr.bf16.mxu0 %v2444_v21  ;;  %1375 = vmatprep.subr.bf16.mxu1 %v2447_v22  ;;  %v2531_v21 = vld [vmem:[%s3981_s1 + $0x40c] ss:$16 sps:$4 sm:$0xff]  }
  0x51   :  { %v2523_v22 = vld [vmem:[%s3982_s0 + $0x8] ss:$20 sps:$4 sm:$0xff]  }
  0x52   :  { %1128 = vmatmul.mubr.bf16.gmra.mrb[8].mxu0 %v2495_v26  ;;  %1347 = vmatmul.mubr.bf16.gmra.mrb[8].mxu1 %v2495_v26  ;;  %v2532_v26 = vld [vmem:[%s3982_s0 + $0x34] ss:$20 sps:$4 sm:$0xff]  }
  0x53   :  { %1157 = vmatpush1.bf16.msra.mxu0 %v2442_v23  ;;  %1376 = vmatpush1.bf16.msra.mxu1 %v2445_v25  ;;  %v1745_v23 = vld [vmem:[%s3984_s4] sm:$0xff]  ;;  %v2529_v25 = vld [vmem:[%s3981_s1 + $0x408] ss:$16 sps:$4 sm:$0xff]  }
  0x54   :  { %1158 = vmatprep.subr.bf16.mxu0 %v2450_v27  ;;  %1377 = vmatprep.subr.bf16.mxu1 %v2453_v28  ;;  %v2537_v27 = vld [vmem:[%s3981_s1 + $0x424] ss:$16 sps:$4 sm:$0xff]   ;;  %v2540_v28 = vld [vmem:[%s3981_s1 + $0x42c] ss:$16 sps:$4 sm:$0xff]  }
  0x55   :  { %1137 = vmatprep.mubr.bf16.mxu0 %v2508_v32  ;;  %1356 = vmatprep.mubr.bf16.mxu1 %v2508_v32  ;;  %v1747_v32 = vld [vmem:[%s3984_s4 + $0x10] sm:$0xff] }
  0x56   :  { %239 = vperm.xlu1 %2318, %v201_v16   ;;  %1760 = vperm.xlu0 %2317, %v1746_v19  }
  0x57   :  { %1159 = vmatpush1.bf16.msra.mxu0 %v2448_v29  ;;  %1378 = vmatpush1.bf16.msra.mxu1 %v2451_v30  ;;  %v2535_v29 = vld [vmem:[%s3981_s1 + $0x420] ss:$16 sps:$4 sm:$0xff]   ;;  %v2538_v30 = vld [vmem:[%s3981_s1 + $0x428] ss:$16 sps:$4 sm:$0xff]  }
  0x58   :  { %1160 = vmatprep.subr.bf16.mxu0 %v2456_v31  ;;  %1379 = vmatprep.subr.bf16.mxu1 %v2459_v33  ;;  %v1749_v31 = vld [vmem:[%s3984_s4 + $0x20] sm:$0xff] }
  0x59   :  { %v2546_v33 = vld [vmem:[%s3981_s1 + $0x444] ss:$16 sps:$4 sm:$0xff]  }
  0x5a   :  { %1138 = vmatmul.mubr.bf16.gmra.mrb[12].mxu0 %v2510_v37  ;;  %1357 = vmatmul.mubr.bf16.gmra.mrb[12].mxu1 %v2510_v37  ;;  %v2541_v37 = vld [vmem:[%s3982_s0 + $0x5c] ss:$20 sps:$4 sm:$0xff]  }
  0x5b   :  { %1161 = vmatpush1.bf16.msra.mxu0 %v2454_v35  ;;  %1380 = vmatpush1.bf16.msra.mxu1 %v2457_v36  ;;  %v2549_v35 = vld [vmem:[%s3981_s1 + $0x44c] ss:$16 sps:$4 sm:$0xff]   ;;  %v2534_v36 = vld [vmem:[%s3982_s0 + $0x30] ss:$20 sps:$4 sm:$0xff]  }
  0x5c   :  { %1162 = vmatprep.subr.bf16.mxu0 %v2462_v38  ;;  %1381 = vmatprep.subr.bf16.mxu1 %v2465_v39  ;;  %v2544_v38 = vld [vmem:[%s3981_s1 + $0x440] ss:$16 sps:$4 sm:$0xff]   ;;  %v2547_v39 = vld [vmem:[%s3981_s1 + $0x448] ss:$16 sps:$4 sm:$0xff]  }
  0x5d   :  { %1180 = vmatprep.mubr.bf16.mxu0 %v2525_v42  ;;  %1399 = vmatprep.mubr.bf16.mxu1 %v2525_v42  ;;  %v1751_v42 = vld [vmem:[%s3984_s4 + $0x30] sm:$0xff] }
  0x5e   :  { %1755 = vperm.xlu1 %2318, %v1745_v23   ;;  %1775 = vperm.xlu0 %2317, %v1749_v31  }
  0x5f   :  { %1163 = vmatpush1.bf16.msra.mxu0 %v2460_v40  ;;  %1382 = vmatpush1.bf16.msra.mxu1 %v2463_v41  ;;  %v2555_v40 = vld [vmem:[%s3981_s1 + $0x464] ss:$16 sps:$4 sm:$0xff]   ;;  %v2558_v41 = vld [vmem:[%s3981_s1 + $0x46c] ss:$16 sps:$4 sm:$0xff]  }
  0x60   :  { %1164 = vmatprep.subr.bf16.mxu0 %v2468_v43  ;;  %1383 = vmatprep.subr.bf16.mxu1 %v2471_v44  ;;  %v1748_v43 = vld [vmem:[%s3984_s4 + $0x18] sm:$0xff]  ;;  %v2553_v44 = vld [vmem:[%s3981_s1 + $0x460] ss:$16 sps:$4 sm:$0xff]  }
  0x62   :  { %1765 = vperm.xlu1 %2318, %v1747_v32   ;;  %1785 = vperm.xlu0 %2317, %v1751_v42  }
  0x63   :  { %1165 = vmatpush1.bf16.msra.mxu0 %v2466_v45  ;;  %1384 = vmatpush1.bf16.msra.mxu1 %v2469_v46  ;;  %v2556_v45 = vld [vmem:[%s3981_s1 + $0x468] ss:$16 sps:$4 sm:$0xff]  }
  0x64   :  { %1166 = vmatprep.subr.bf16.mxu0 %v2474_v47  ;;  %1385 = vmatprep.subr.bf16.mxu1 %v2477_v48  ;;  %v2543_v46 = vld [vmem:[%s3982_s0 + $0x58] ss:$20 sps:$4 sm:$0xff]   ;;  %v1825_v48 = vld [vmem:[%s3985_s5] sm:$0xff] }
  0x65   :  { %v2550_v47 = vld [vmem:[%s3982_s0 + $0x84] ss:$20 sps:$4 sm:$0xff]  }
  0x66   :  { %1770 = vperm.xlu1 %2318, %v1748_v43   ;;  %1835 = vperm.xlu0 %2317, %v1825_v48  }
  0x67   :  { %1167 = vmatpush1.bf16.msra.mxu0 %v2472_v49  ;;  %1386 = vmatpush1.bf16.msra.mxu1 %v2475_v50  ;;  %v1750_v49 = vld [vmem:[%s3984_s4 + $0x28] sm:$0xff]  ;;  %v1827_v50 = vld [vmem:[%s3985_s5 + $0x10] sm:$0xff] }
  0x68   :  { %1168 = vmatprep.subr.bf16.mxu0 %v2483_v51  ;;  %1387 = vmatprep.subr.bf16.mxu1 %v2486_v52  ;;  %v1752_v51 = vld [vmem:[%s3984_s4 + $0x38] sm:$0xff]  ;;  %v2552_v52 = vld [vmem:[%s3982_s0 + $0x80] ss:$20 sps:$4 sm:$0xff]  }
  0x6a   :  { %1780 = vperm.xlu1 %2318, %v1750_v49   ;;  %1845 = vperm.xlu0 %2317, %v1827_v50  }
  0x6b   :  { %1169 = vmatpush1.bf16.msra.mxu0 %v2481_v53  ;;  %1388 = vmatpush1.bf16.msra.mxu1 %v2484_v54  ;;  %v1829_v53 = vld [vmem:[%s3985_s5 + $0x20] sm:$0xff]  ;;  %v1826_v54 = vld [vmem:[%s3985_s5 + $0x8] sm:$0xff] }
  0x6c   :  { %1170 = vmatprep.subr.bf16.mxu0 %v2489_v55  ;;  %1389 = vmatprep.subr.bf16.mxu1 %v2492_v56  ;;  %v1828_v55 = vld [vmem:[%s3985_s5 + $0x18] sm:$0xff]  ;;  %v2559_v56 = vld [vmem:[%s3982_s0 + $0x10] ss:$20 sps:$4 sm:$0xff]  }
  0x6e   :  { %1790 = vperm.xlu1 %2318, %v1752_v51   ;;  %1855 = vperm.xlu0 %2317, %v1829_v53  }
  0x6f   :  { %1171 = vmatpush1.bf16.msra.mxu0 %v2487_v57  ;;  %1390 = vmatpush1.bf16.msra.mxu1 %v2490_v58  ;;  %v1830_v57 = vld [vmem:[%s3985_s5 + $0x28] sm:$0xff] }
  0x70   :  { %1172 = vmatprep.subr.bf16.mxu0 %v2498_v59  ;;  %1391 = vmatprep.subr.bf16.mxu1 %v2501_v60  ;;  %v2560_v58 = vld [vmem:[%s3982_s0 + $0x38] ss:$20 sps:$4 sm:$0xff]   ;;  %v2561_v59 = vld [vmem:[%s3982_s0 + $0x60] ss:$20 sps:$4 sm:$0xff]   ;;  %v2562_v60 = vld [vmem:[%s3982_s0 + $0x88] ss:$20 sps:$4 sm:$0xff]  }
  0x72   :  { %1840 = vperm.xlu1 %2318, %v1826_v54  }
  0x73   :  { %1173 = vmatpush1.bf16.msra.mxu0 %v2496_v63  ;;  %1392 = vmatpush1.bf16.msra.mxu1 %v2499_v0 }
  0x74   :  { %1174 = vmatprep.subr.bf16.mxu0 %v2504_v2  ;;  %1393 = vmatprep.subr.bf16.mxu1 %v2507_v3 }
  0x76   :  { %1850 = vperm.xlu1 %2318, %v1828_v55  }
  0x77   :  { %1175 = vmatpush1.bf16.msra.mxu0 %v2502_v5  ;;  %1394 = vmatpush1.bf16.msra.mxu1 %v2505_v6 }
  0x78   :  { %1176 = vmatprep.subr.bf16.mxu0 %v2513_v8  ;;  %1395 = vmatprep.subr.bf16.mxu1 %v2516_v9 }
  0x7a   :  { %1860 = vperm.xlu1 %2318, %v1830_v57  }
  0x7b   :  { %1177 = vmatpush1.bf16.msra.mxu0 %v2511_v11  ;;  %1396 = vmatpush1.bf16.msra.mxu1 %v2514_v12 }
  0x7c   :  { %1178 = vmatprep.subr.bf16.mxu0 %v2519_v14  ;;  %1397 = vmatprep.subr.bf16.mxu1 %v2522_v15 }
  0x7f   :  { %1179 = vmatpush1.bf16.msra.mxu0 %v2517_v17  ;;  %1398 = vmatpush1.bf16.msra.mxu1 %v2520_v18 }
  0x80   :  { %1221 = vmatprep.subr.bf16.mxu0 %v2528_v20  ;;  %1440 = vmatprep.subr.bf16.mxu1 %v2531_v21 }
  0x82   :  { %1181 = vmatmul.mubr.bf16.vlgmr.msra.gmra.mrb[0].mxu0 %v2523_v22  ;;  %1400 = vmatmul.mubr.bf16.vlgmr.msra.gmra.mrb[0].mxu1 %v2523_v22 }
  0x83   :  { %1222 = vmatpush1.bf16.msra.mxu0 %v2526_v24  ;;  %1441 = vmatpush1.bf16.msra.mxu1 %v2529_v25 }
  0x84   :  { %1190 = vmatprep.mubr.bf16.mxu0 %v2532_v26  ;;  %1409 = vmatprep.mubr.bf16.mxu1 %v2532_v26 }
  0x85   :  { %1223 = vmatprep.subr.bf16.mxu0 %v2537_v27  ;;  %1442 = vmatprep.subr.bf16.mxu1 %v2540_v28 }
  0x87   :  { %1224 = vmatpush1.bf16.msra.mxu0 %v2535_v29  ;;  %1443 = vmatpush1.bf16.msra.mxu1 %v2538_v30 }
  0x88   :  { %1225 = vmatprep.subr.bf16.mxu0 %v2546_v33  ;;  %1444 = vmatprep.subr.bf16.mxu1 %v2549_v35 }
  0x8a   :  { %1191 = vmatmul.mubr.bf16.gmra.mrb[4].mxu0 %v2534_v36  ;;  %1410 = vmatmul.mubr.bf16.gmra.mrb[4].mxu1 %v2534_v36 }
  0x8b   :  { %1200 = vmatprep.mubr.bf16.mxu0 %v2541_v37  ;;  %1419 = vmatprep.mubr.bf16.mxu1 %v2541_v37 }
  0x8c   :  { %1226 = vmatpush1.bf16.msra.mxu0 %v2544_v38  ;;  %1445 = vmatpush1.bf16.msra.mxu1 %v2547_v39 }
  0x8d   :  { %1227 = vmatprep.subr.bf16.mxu0 %v2555_v40  ;;  %1446 = vmatprep.subr.bf16.mxu1 %v2558_v41 }
  0x90   :  { %1228 = vmatpush1.bf16.msra.mxu0 %v2553_v44  ;;  %1447 = vmatpush1.bf16.msra.mxu1 %v2556_v45 }
  0x92   :  { %1201 = vmatmul.mubr.bf16.gmra.mrb[8].mxu0 %v2543_v46  ;;  %1420 = vmatmul.mubr.bf16.gmra.mrb[8].mxu1 %v2543_v46 }
  0x93   :  { %1210 = vmatprep.mubr.bf16.mxu0 %v2550_v47  ;;  %1429 = vmatprep.mubr.bf16.mxu1 %v2550_v47 }
  0x9a   :  { %1211 = vmatmul.mubr.bf16.gmra.mrb[12].mxu0 %v2552_v52  ;;  %1430 = vmatmul.mubr.bf16.gmra.mrb[12].mxu1 %v2552_v52 }
  0x9b   :  { %1253 = vmatprep.mubr.bf16.mxu0 %v2579_v34  ;;  %1472 = vmatprep.mubr.bf16.mxu1 %v2579_v34 }
  0xa2   :  { %2211 = vmatmul.mubr.msk.bf16.vlgmr.msra.gmra.mrb[0].mxu0 %vm1062_vm0, %v2559_v56  ;;  %2215 = vmatmul.mubr.msk.bf16.vlgmr.msra.gmra.mrb[0].mxu1 %vm1062_vm0, %v2559_v56 }
  0xa3   :  { %1263 = vmatprep.mubr.bf16.mxu0 %v2579_v34  ;;  %1482 = vmatprep.mubr.bf16.mxu1 %v2579_v34 }
  0xaa   :  { %2212 = vmatmul.mubr.msk.bf16.gmra.mrb[4].mxu0 %vm1062_vm0, %v2560_v58  ;;  %2216 = vmatmul.mubr.msk.bf16.gmra.mrb[4].mxu1 %vm1062_vm0, %v2560_v58 }
  0xab   :  { %1273 = vmatprep.mubr.bf16.mxu0 %v2579_v34  ;;  %1492 = vmatprep.mubr.bf16.mxu1 %v2579_v34 }
  0xb2   :  { %2213 = vmatmul.mubr.msk.bf16.gmra.mrb[8].mxu0 %vm1062_vm0, %v2561_v59  ;;  %2217 = vmatmul.mubr.msk.bf16.gmra.mrb[8].mxu1 %vm1062_vm0, %v2561_v59 }
  0xb3   :  { %1283 = vmatprep.mubr.bf16.mxu0 %v2579_v34  ;;  %1502 = vmatprep.mubr.bf16.mxu1 %v2579_v34 }
  0xba   :  { %2214 = vmatmul.mubr.msk.bf16.gmra.mrb[12].mxu0 %vm1062_vm0, %v2562_v60  ;;  %2218 = vmatmul.mubr.msk.bf16.gmra.mrb[12].mxu1 %vm1062_vm0, %v2562_v60 }
  0xbc   :  { %v205_v62 = vpop.permute.xlu0 %204  ;;  %v215_v63 = vpop.permute.xlu1 %214 }
  0xc0   :  { %v210_v0 = vpop.permute.xlu0 %209 }
  0xc5   :  { %v220_v22 = vpop.permute.xlu1 %219  ;;  %v225_v60 = vpop.permute.xlu0 %224 }
  0xcd   :  { %v230_v61 = vpop.permute.xlu1 %229 }
 0x175   :  { %v1255_v1 = vpop.f32.mrb[0].mxu0  ;;  %v1474_v2 = vpop.f32.mrb[0].mxu1 }
 0x176   :  { %v3194_v3 = vadd.f32 %v1255_v1, %v205_v62  ;;  %v1257_v34 = vpop.f32.mrb[1].mxu0  ;;  %v1476_v4 = vpop.f32.mrb[1].mxu1  ;;  %v3200_v9 = vadd.f32 %v1474_v2, %v205_v62 }
 0x177   :  { %v3196_v5 = vadd.f32 %v1257_v34, %v205_v62  ;;  %v1259_v6 = vpop.f32.mrb[2].mxu0  ;;  %v1478_v7 = vpop.f32.mrb[2].mxu1  ;;  %v3214_v18 = vadd.f32 %v1476_v4, %v205_v62 }
 0x178   :  { %v1561_v8 = vmul.f32 %v3194_v3, %v3194_v3  ;;  %v3202_v10 = vadd.f32 %v1259_v6, %v210_v0  ;;  %v1261_v11 = vpop.f32.mrb[3].mxu0  ;;  %v1480_v12 = vpop.f32.mrb[3].mxu1  ;;  %v3208_v15 = vadd.f32 %v1478_v7, %v210_v0  ;;  %v1563_v23 = vmul.f32 %v3200_v9, %v3200_v9 }
 0x179   :  { %v1513_v13 = vadd.f32 %v3196_v5, %v3194_v3  ;;  %v1562_v14 = vmul.f32 %v3196_v5, %v3196_v5  ;;  %v3210_v16 = vadd.f32 %v1261_v11, %v210_v0  ;;  %v3223_v24 = vadd.f32 %v1480_v12, %v210_v0 }
 0x17a   :  { %v1565_v17 = vmul.f32 %v3202_v10, %v3202_v10  ;;  %v1567_v26 = vmul.f32 %v3208_v15, %v3208_v15  ;;  %v1564_v51 = vmul.f32 %v3214_v18, %v3214_v18 }
 0x17b   :  { %v1518_v19 = vadd.f32 %v3210_v16, %v3202_v10  ;;  %v1566_v20 = vmul.f32 %v3210_v16, %v3210_v16  ;;  %v1514_v21 = vadd.f32 %v3200_v9, %v1513_v13  ;;  %v1593_v25 = vadd.f32 %v1562_v14, %v1561_v8 }
 0x17c   :  { %v1568_v47 = vmul.f32 %v3223_v24, %v3223_v24 }
 0x17d   :  { %v1265_v27 = vpop.f32.mrb[4].mxu0  ;;  %v1484_v28 = vpop.f32.mrb[4].mxu1  ;;  %v1515_v29 = vadd.f32 %v3214_v18, %v1514_v21  ;;  %v1519_v30 = vadd.f32 %v3208_v15, %v1518_v19  ;;  %v1598_v31 = vadd.f32 %v1566_v20, %v1565_v17  ;;  %v1594_v41 = vadd.f32 %v1593_v25, %v1563_v23 }
 0x17e   :  { %v3229_v32 = vadd.f32 %v1265_v27, %v215_v63  ;;  %v1267_v33 = vpop.f32.mrb[5].mxu0  ;;  %v1486_v35 = vpop.f32.mrb[5].mxu1  ;;  %v3236_v43 = vadd.f32 %v1484_v28, %v215_v63 }
 0x17f   :  { %v3231_v36 = vadd.f32 %v1267_v33, %v215_v63  ;;  %v1269_v37 = vpop.f32.mrb[6].mxu0  ;;  %v1488_v38 = vpop.f32.mrb[6].mxu1  ;;  %1516 = vadd.xlane.f32.xlu0 %v1515_v29  ;;  %v1520_v39 = vadd.f32 %v3223_v24, %v1519_v30  ;;  %v1599_v40 = vadd.f32 %v1598_v31, %v1567_v26  ;;  %v3250_v52 = vadd.f32 %v1486_v35, %v215_v63 }
 0x180   :  { %v1569_v42 = vmul.f32 %v3229_v32, %v3229_v32  ;;  %v3238_v44 = vadd.f32 %v1269_v37, %v220_v22  ;;  %v1271_v45 = vpop.f32.mrb[7].mxu0  ;;  %v1490_v46 = vpop.f32.mrb[7].mxu1  ;;  %v3254_v54 = vadd.f32 %v1488_v38, %v220_v22  ;;  %v1595_v58 = vadd.f32 %v1594_v41, %v1564_v51 }
 0x181   :  { %v1523_v48 = vadd.f32 %v3231_v36, %v3229_v32  ;;  %v1570_v49 = vmul.f32 %v3231_v36, %v3231_v36  ;;  %v3246_v50 = vadd.f32 %v1271_v45, %v220_v22  ;;  %1521 = vadd.xlane.f32.xlu1 %v1520_v39  ;;  %v1600_v55 = vadd.f32 %v1599_v40, %v1568_v47  ;;  %v240_v45 = vpop.permute.xlu1 %239 }
 0x182   :  { %v1573_v53 = vmul.f32 %v3238_v44, %v3238_v44  ;;  %v1571_v62 = vmul.f32 %v3236_v43, %v3236_v43  ;;  %v1575_v12 = vmul.f32 %v3254_v54, %v3254_v54  ;;  %v3269_v13 = vadd.f32 %v1490_v46, %v220_v22 }
 0x183   :  { %v1528_v56 = vadd.f32 %v3246_v50, %v3238_v44  ;;  %v1574_v57 = vmul.f32 %v3246_v50, %v3246_v50  ;;  %v1524_v59 = vadd.f32 %v3236_v43, %v1523_v48  ;;  %1601 = vadd.xlane.f32.xlu0 %v1600_v55  ;;  %v1603_v63 = vadd.f32 %v1570_v49, %v1569_v42  ;;  %v235_v42 = vpop.permute.xlu0 %234 }
 0x184   :  { %v1572_v27 = vmul.f32 %v3250_v52, %v3250_v52 }
 0x185   :  { %v1275_v0 = vpop.f32.mrb[8].mxu0  ;;  %v1494_v1 = vpop.f32.mrb[8].mxu1  ;;  %1596 = vadd.xlane.f32.xlu1 %v1595_v58  ;;  %v1525_v2 = vadd.f32 %v3250_v52, %v1524_v59  ;;  %v1604_v7 = vadd.f32 %v1603_v63, %v1571_v62  ;;  %v1529_v8 = vadd.f32 %v3254_v54, %v1528_v56  ;;  %v1608_v11 = vadd.f32 %v1574_v57, %v1573_v53 }
 0x186   :  { %v3264_v34 = vadd.f32 %v1275_v0, %v225_v60  ;;  %v1277_v4 = vpop.f32.mrb[9].mxu0  ;;  %v1496_v6 = vpop.f32.mrb[9].mxu1  ;;  %v3275_v21 = vadd.f32 %v1494_v1, %v225_v60  ;;  %v1576_v53 = vmul.f32 %v3269_v13, %v3269_v13 }
 0x187   :  { %v3271_v14 = vadd.f32 %v1277_v4, %v225_v60  ;;  %v1279_v17 = vpop.f32.mrb[10].mxu0  ;;  %v1498_v19 = vpop.f32.mrb[10].mxu1  ;;  %1526 = vadd.xlane.f32.xlu0 %v1525_v2  ;;  %v3285_v29 = vadd.f32 %v1496_v6, %v225_v60  ;;  %v1605_v33 = vadd.f32 %v1604_v7, %v1572_v27  ;;  %v1530_v35 = vadd.f32 %v3269_v13, %v1529_v8 }
 0x188   :  { %v1577_v20 = vmul.f32 %v3264_v34, %v3264_v34  ;;  %v3277_v23 = vadd.f32 %v1279_v17, %v230_v61  ;;  %v1281_v25 = vpop.f32.mrb[11].mxu0  ;;  %v1500_v26 = vpop.f32.mrb[11].mxu1  ;;  %v1609_v37 = vadd.f32 %v1608_v11, %v1575_v12  ;;  %v3292_v38 = vadd.f32 %v1498_v19, %v230_v61 }
 0x189   :  { %v1533_v22 = vadd.f32 %v3271_v14, %v3264_v34  ;;  %v1578_v28 = vmul.f32 %v3271_v14, %v3271_v14  ;;  %v3287_v30 = vadd.f32 %v1281_v25, %v230_v61  ;;  %v1579_v46 = vmul.f32 %v3275_v21, %v3275_v21  ;;  %1606 = vadd.xlane.f32.xlu1 %v1605_v33 }
 0x18a   :  { %v1581_v31 = vmul.f32 %v3277_v23, %v3277_v23  ;;  %v1583_v62 = vmul.f32 %v3292_v38, %v3292_v38  ;;  %v3309_v63 = vadd.f32 %v1500_v26, %v230_v61  ;;  %v1610_v4 = vadd.f32 %v1609_v37, %v1576_v53 }
 0x18b   :  { %v1538_v39 = vadd.f32 %v3287_v30, %v3277_v23  ;;  %v1582_v40 = vmul.f32 %v3287_v30, %v3287_v30  ;;  %v1534_v41 = vadd.f32 %v3275_v21, %v1533_v22  ;;  %1531 = vadd.xlane.f32.xlu0 %v1530_v35  ;;  %v1613_v47 = vadd.f32 %v1578_v28, %v1577_v20 }
 0x18c   :  { %v1580_v17 = vmul.f32 %v3285_v29, %v3285_v29 }
 0x18d   :  { %v1285_v48 = vpop.f32.mrb[12].mxu0  ;;  %v1504_v49 = vpop.f32.mrb[12].mxu1  ;;  %v1535_v51 = vadd.f32 %v3285_v29, %v1534_v41  ;;  %v1614_v58 = vadd.f32 %v1613_v47, %v1579_v46  ;;  %v1539_v59 = vadd.f32 %v3292_v38, %v1538_v39  ;;  %v1618_v60 = vadd.f32 %v1582_v40, %v1581_v31 }
 0x18e   :  { %v3304_v55 = vadd.f32 %v1285_v48, %v235_v42  ;;  %v1287_v56 = vpop.f32.mrb[13].mxu0  ;;  %v1506_v57 = vpop.f32.mrb[13].mxu1  ;;  %v3315_v7 = vadd.f32 %v1504_v49, %v235_v42 }
 0x18f   :  { %v3311_v0 = vadd.f32 %v1287_v56, %v235_v42  ;;  %v1289_v1 = vpop.f32.mrb[14].mxu0  ;;  %v1508_v2 = vpop.f32.mrb[14].mxu1  ;;  %1536 = vadd.xlane.f32.xlu1 %v1535_v51  ;;  %1611 = vadd.xlane.f32.xlu0 %v1610_v4  ;;  %v3327_v25 = vadd.f32 %v1506_v57, %v235_v42  ;;  %v1615_v26 = vadd.f32 %v1614_v58, %v1580_v17 }
 0x190   :  { %v1585_v6 = vmul.f32 %v3304_v55, %v3304_v55  ;;  %v3317_v8 = vadd.f32 %v1289_v1, %v240_v45  ;;  %v1291_v11 = vpop.f32.mrb[15].mxu0  ;;  %v1510_v12 = vpop.f32.mrb[15].mxu1  ;;  %v1540_v27 = vadd.f32 %v3309_v63, %v1539_v59  ;;  %v1619_v22 = vadd.f32 %v1618_v60, %v1583_v62  ;;  %v1832_v1 = vld [vmem:[%s3985_s5 + $0x38] sm:$0xff] }
 0x191   :  { %v1543_v61 = vadd.f32 %v3311_v0, %v3304_v55  ;;  %v1586_v19 = vmul.f32 %v3311_v0, %v3311_v0  ;;  %v3325_v20 = vadd.f32 %v1291_v11, %v240_v45  ;;  %v1587_v37 = vmul.f32 %v3315_v7, %v3315_v7  ;;  %v3360_v4 = vpop.permute.xlu1 %1755  ;;  %v3364_v11 = vpop.permute.xlu0 %1760 }
 0x192   :  { %v1589_v28 = vmul.f32 %v3317_v8, %v3317_v8  ;;  %v3339_v40 = vadd.f32 %v1508_v2, %v240_v45  ;;  %v1584_v42 = vmul.f32 %v3309_v63, %v3309_v63  ;;  %v1588_v51 = vmul.f32 %v3327_v25, %v3327_v25  ;;  %v2219_v2 = vld [vmem:[#allocation2] ss:$0 sm:$0xff] }
 0x193   :  { %v1548_v31 = vadd.f32 %v3325_v20, %v3317_v8  ;;  %v1590_v33 = vmul.f32 %v3325_v20, %v3325_v20  ;;  %v1544_v35 = vadd.f32 %v3315_v7, %v1543_v61  ;;  %1616 = vadd.xlane.f32.xlu1 %v1615_v26  ;;  %v1623_v39 = vadd.f32 %v1586_v19, %v1585_v6 }
 0x194   :  { %1541 = vadd.xlane.f32.xlu0 %v1540_v27  ;;  %v1620_v47 = vadd.f32 %v1619_v22, %v1584_v42  ;;  %v1591_v53 = vmul.f32 %v3339_v40, %v3339_v40  ;;  %v3349_v56 = vadd.f32 %v1510_v12, %v240_v45  ;;  %v1831_v45 = vld [vmem:[%s3985_s5 + $0x30] sm:$0xff] }
 0x195   :  { %v1545_v41 = vadd.f32 %v3327_v25, %v1544_v35  ;;  %v1624_v46 = vadd.f32 %v1623_v39, %v1587_v37  ;;  %v1549_v48 = vadd.f32 %v3339_v40, %v1548_v31  ;;  %v1628_v49 = vadd.f32 %v1590_v33, %v1589_v28  ;;  %v3362_v6 = vpop.permute.xlu1 %1765  ;;  %v3368_v17 = vpop.permute.xlu0 %1775 }
 0x196   :  { %v1592_v60 = vmul.f32 %v3349_v56, %v3349_v56 }
 0x197   :  { %1546 = vadd.xlane.f32.xlu1 %v1545_v41  ;;  %v1625_v57 = vadd.f32 %v1624_v46, %v1588_v51  ;;  %v1550_v58 = vadd.f32 %v3349_v56, %v1549_v48  ;;  %v1629_v59 = vadd.f32 %v1628_v49, %v1591_v53 }
 0x198   :  { %1621 = vadd.xlane.f32.xlu0 %v1620_v47 }
 0x199   :  { %v1630_v62 = vadd.f32 %v1629_v59, %v1592_v60  ;;  %v3366_v12 = vpop.permute.xlu1 %1770  ;;  %v3372_v19 = vpop.permute.xlu0 %1785 }
 0x19a   :  { %4002 = vst [vmem:[#allocation4_spill] sm:$0xff] %v3372_v19 }
 0x19b   :  { %1626 = vadd.xlane.f32.xlu1 %v1625_v57 }
 0x19c   :  { %1551 = vadd.xlane.f32.xlu0 %v1550_v58 }
 0x19d   :  { %v3370_v61 = vpop.permute.xlu1 %1780  ;;  %v3376_v27 = vpop.permute.xlu0 %1835 }
 0x19e   :  { %4001 = vst [vmem:[#allocation3_spill] sm:$0xff] %v3370_v61 }
 0x1a0   :  { %1631 = vadd.xlane.f32.xlu0 %v1630_v62 }
 0x1a1   :  { %v3374_v26 = vpop.permute.xlu1 %1790  ;;  %v3380_v28 = vpop.permute.xlu0 %1845 }
 0x1a2   :  { %4003 = vst [vmem:[#allocation5_spill] sm:$0xff] %v3374_v26 }
 0x1a5   :  { %v3378_v22 = vpop.permute.xlu1 %1840  ;;  %v3384_v33 = vpop.permute.xlu0 %1855 }
 0x1a6   :  { %4004 = vst [vmem:[#allocation6_spill] sm:$0xff] %v3384_v33 }
 0x1a9   :  { %v3382_v31 = vpop.permute.xlu1 %1850 }
 0x1ac   :  { %1870 = vperm.xlu1 %2318, %v1832_v1  }
 0x1ad   :  { %v3386_v35 = vpop.permute.xlu1 %1860 }
 0x1ae   :  { %4005 = vst [vmem:[#allocation7_spill] sm:$0xff] %v3386_v35 }
 0x1b6   :  { %1865 = vperm.xlu0 %2317, %v1831_v45  }
 0x1ba   :  { %1944 = vperm.xlu0 %2317, %v2219_v2  }
 0x20c   :  { %v1517_v37 = vpop.xlane.xlu0 %1516 }
 0x20d   :  { %v3388_v41 = vmul.f32 0.001953125, %v1517_v37 }
 0x20e   :  { %v1522_v39 = vpop.xlane.xlu1 %1521 }
 0x20f   :  { %v3390_v42 = vmul.f32 0.001953125, %v1522_v39  ;;  %v1641_v53 = vmul.f32 %v3388_v41, %v3388_v41 }
 0x210   :  { %v1602_v46 = vpop.xlane.xlu0 %1601 }
 0x211   :  { %v1642_v48 = vmul.f32 %v3390_v42, %v3390_v42  ;;  %v1634_v49 = vmul.f32 0.001953125, %v1602_v46 }
 0x212   :  { %v1597_v47 = vpop.xlane.xlu1 %1596 }
 0x213   :  { %v1633_v51 = vmul.f32 0.001953125, %v1597_v47  ;;  %v1650_v57 = vsub.f32 %v1634_v49, %v1642_v48 }
 0x214   :  { %v1527_v59 = vpop.xlane.xlu0 %1526 }
 0x215   :  { %v1649_v58 = vsub.f32 %v1633_v51, %v1641_v53  ;;  %v3396_v60 = vmul.f32 0.001953125, %v1527_v59  ;;  %v1658_v62 = vmax.f32 %v1650_v57, 0.0 }
 0x216   :  { %v1607_v45 = vpop.xlane.xlu1 %1606 }
 0x217   :  { %v1657_v1 = vmax.f32 %v1649_v58, 0.0  ;;  %v1643_v2 = vmul.f32 %v3396_v60, %v3396_v60  ;;  %v1635_v39 = vmul.f32 0.001953125, %v1607_v45  ;;  %v1698_v26 = vadd.f32 1e-05, %v1658_v62 }
 0x218   :  { %v1532_v37 = vpop.xlane.xlu0 %1531  ;;  %v1665_v62 = vsub.f32 %v3194_v3, %v3388_v41  ;;  %v1671_v3 = vsub.f32 %v3208_v15, %v3390_v42  ;;  %v1676_v15 = vsub.f32 %v3250_v52, %v3396_v60 }
 0x219   :  { %v1651_v35 = vsub.f32 %v1635_v39, %v1643_v2  ;;  %v1697_v46 = vadd.f32 1e-05, %v1657_v1  ;;  %v3400_v47 = vmul.f32 0.001953125, %v1532_v37  ;;  %2563 = vrsqrt.f32 %v1698_v26 }
 0x21a   :  { %v1666_v1 = vsub.f32 %v3196_v5, %v3388_v41  ;;  %v1667_v26 = vsub.f32 %v3200_v9, %v3388_v41  ;;  %v1670_v37 = vsub.f32 %v3210_v16, %v3390_v42  ;;  %v1672_v5 = vsub.f32 %v3223_v24, %v3390_v42 }
 0x21b   :  { %v1659_v48 = vmax.f32 %v1651_v35, 0.0  ;;  %2565 = vrsqrt.f32 %v1697_v46  ;;  %v1644_v51 = vmul.f32 %v3400_v47, %v3400_v47  ;;  %v1675_v16 = vsub.f32 %v3236_v43, %v3396_v60 }
 0x21c   :  { %v1537_v33 = vpop.xlane.xlu1 %1536  ;;  %v1612_v19 = vpop.xlane.xlu0 %1611 }
 0x21d   :  { %v1636_v49 = vmul.f32 0.001953125, %v1612_v19  ;;  %v1699_v57 = vadd.f32 1e-05, %v1659_v48  ;;  %v3404_v61 = vmul.f32 0.001953125, %v1537_v33  ;;  %v1668_v19 = vsub.f32 %v3214_v18, %v3388_v41 }
 0x21e   :  { %v1669_v33 = vsub.f32 %v3202_v10, %v3390_v42  ;;  %v1673_v18 = vsub.f32 %v3229_v32, %v3396_v60  ;;  %v1674_v41 = vsub.f32 %v3231_v36, %v3396_v60 }
 0x21f   :  { %v1652_v58 = vsub.f32 %v1636_v49, %v1644_v51  ;;  %2567 = vrsqrt.f32 %v1699_v57  ;;  %v1645_v39 = vmul.f32 %v3404_v61, %v3404_v61 }
 0x220   :  { %v1617_v59 = vpop.xlane.xlu1 %1616 }
 0x221   :  { %v1542_v53 = vpop.xlane.xlu0 %1541  ;;  %v1660_v35 = vmax.f32 %v1652_v58, 0.0  ;;  %v1637_v45 = vmul.f32 0.001953125, %v1617_v59 }
 0x222   :  { %v3428_v10 = vmul.f32 0.001953125, %v1542_v53 }
 0x223   :  { %v2564_v9 = vpop.eup %2563  ;;  %v1700_v49 = vadd.f32 1e-05, %v1660_v35  ;;  %v1653_v51 = vsub.f32 %v1637_v45, %v1645_v39 }
 0x224   :  { %v1547_v42 = vpop.xlane.xlu1 %1546  ;;  %v1717_v43 = vmul.f32 %v2564_v9, %v1669_v33  ;;  %v1718_v53 = vmul.f32 %v2564_v9, %v1670_v37  ;;  %v1719_v57 = vmul.f32 %v2564_v9, %v1671_v3  ;;  %v1720_v45 = vmul.f32 %v2564_v9, %v1672_v5 }
 0x225   :  { %v1622_v2 = vpop.xlane.xlu0 %1621  ;;  %v2566_v46 = vpop.eup %2565  ;;  %2569 = vrsqrt.f32 %v1700_v49  ;;  %v1661_v52 = vmax.f32 %v1653_v51, 0.0  ;;  %v3454_v3 = vmul.f32 0.001953125, %v1547_v42 }
 0x226   :  { %v1713_v33 = vmul.f32 %v2566_v46, %v1665_v62  ;;  %v1714_v37 = vmul.f32 %v2566_v46, %v1666_v1  ;;  %v1715_v39 = vmul.f32 %v2566_v46, %v1667_v26  ;;  %v1797_v58 = vmul.f32 %v3364_v11, %v1717_v43 }
 0x227   :  { %v1798_v36 = vmul.f32 %v3364_v11, %v1718_v53  ;;  %v1716_v59 = vmul.f32 %v2566_v46, %v1668_v19  ;;  %v1799_v62 = vmul.f32 %v3364_v11, %v1719_v57  ;;  %v1701_v1 = vadd.f32 1e-05, %v1661_v52 }
 0x228   :  { %v1627_v32 = vpop.xlane.xlu1 %1626  ;;  %v1646_v26 = vmul.f32 %v3428_v10, %v3428_v10  ;;  %v1638_v9 = vmul.f32 0.001953125, %v1622_v2  ;;  %v1800_v42 = vmul.f32 %v3364_v11, %v1720_v45  ;;  %v1793_v49 = vmul.f32 %v3360_v4, %v1713_v33 }
 0x229   :  { %v1552_v35 = vpop.xlane.xlu0 %1551  ;;  %v2568_v5 = vpop.eup %2567  ;;  %v1794_v51 = vmul.f32 %v3360_v4, %v1714_v37  ;;  %v1795_v19 = vmul.f32 %v3360_v4, %v1715_v39  ;;  %v1647_v43 = vmul.f32 %v3454_v3, %v3454_v3  ;;  %v1639_v53 = vmul.f32 0.001953125, %v1627_v32 }
 0x22a   :  { %v1654_v46 = vsub.f32 %v1638_v9, %v1646_v26  ;;  %v3469_v48 = vmul.f32 0.001953125, %v1552_v35  ;;  %v1721_v57 = vmul.f32 %v2568_v5, %v1673_v18  ;;  %v1722_v60 = vmul.f32 %v2568_v5, %v1674_v41 }
 0x22b   :  { %v1723_v24 = vmul.f32 %v2568_v5, %v1675_v16  ;;  %2571 = vrsqrt.f32 %v1701_v1  ;;  %v1796_v11 = vmul.f32 %v3360_v4, %v1716_v59  ;;  %v1724_v2 = vmul.f32 %v2568_v5, %v1676_v15 }
 0x22c   :  { %v1662_v45 = vmax.f32 %v1654_v46, 0.0  ;;  %v1655_v33 = vsub.f32 %v1639_v53, %v1647_v43  ;;  %v3473_v37 = vadd.f32 %v3378_v22, %v1797_v58  ;;  %v3476_v39 = vadd.f32 %v3378_v22, %v1798_v36 }
 0x22d   :  { %v1632_v52 = vpop.xlane.xlu0 %1631  ;;  %v1648_v32 = vmul.f32 %v3469_v48, %v3469_v48  ;;  %v3481_v18 = vadd.f32 %v3378_v22, %v1799_v62  ;;  %v3484_v41 = vadd.f32 %v3378_v22, %v1800_v42  ;;  %v1801_v58 = vmul.f32 %v3362_v6, %v1721_v57 }
 0x22e   :  { %v1640_v35 = vmul.f32 0.001953125, %v1632_v52  ;;  %v1702_v4 = vadd.f32 1e-05, %v1662_v45  ;;  %v1663_v16 = vmax.f32 %v1655_v33, 0.0  ;;  %v1802_v59 = vmul.f32 %v3362_v6, %v1722_v60 }
 0x22f   :  { %v1803_v36 = vmul.f32 %v3362_v6, %v1723_v24  ;;  %v2570_v1 = vpop.eup %2569  ;;  %v3492_v26 = vadd.f32 %v3376_v27, %v1793_v49  ;;  %v1804_v62 = vmul.f32 %v3362_v6, %v1724_v2  ;;  %v3496_v9 = vadd.f32 %v3376_v27, %v1794_v51 }
 0x230   :  { %v1656_v5 = vsub.f32 %v1640_v35, %v1648_v32  ;;  %2573 = vrsqrt.f32 %v1702_v4  ;;  %v1703_v22 = vadd.f32 1e-05, %v1663_v16  ;;  %v3499_v42 = vadd.f32 %v3376_v27, %v1795_v19 }
 0x231   :  { %v3502_v46 = vadd.f32 %v3376_v27, %v1796_v11  ;;  %v4006_v24 = vsub.f32 %v3238_v44, %v3400_v47  ;;  %v4007_v49 = vsub.f32 %v3246_v50, %v3400_v47  ;;  %v4008_v6 = vsub.f32 %v3254_v54, %v3400_v47 }
 0x232   :  { %2575 = vrsqrt.f32 %v1703_v22  ;;  %v1664_v51 = vmax.f32 %v1656_v5, 0.0  ;;  %v3514_v19 = vadd.f32 %v3380_v28, %v1801_v58  ;;  %v3517_v27 = vadd.f32 %v3380_v28, %v1802_v59 }
 0x233   :  { %v1725_v60 = vmul.f32 %v2570_v1, %v4006_v24  ;;  %v1726_v43 = vmul.f32 %v2570_v1, %v4007_v49  ;;  %v1727_v53 = vmul.f32 %v2570_v1, %v4008_v6  ;;  %v3520_v52 = vadd.f32 %v3380_v28, %v1803_v36 }
 0x234   :  { %v1688_v44 = vsub.f32 %v3309_v63, %v3428_v10  ;;  %v3525_v50 = vadd.f32 %v3380_v28, %v1804_v62  ;;  %v1693_v54 = vsub.f32 %v3317_v8, %v3469_v48  ;;  %v1694_v57 = vsub.f32 %v3325_v20, %v3469_v48 }
 0x235   :  { %v3486_v15 = vpop.permute.xlu0 %1865  ;;  %v1695_v11 = vsub.f32 %v3339_v40, %v3469_v48  ;;  %v2572_v45 = vpop.eup %2571  ;;  %v4009_v33 = vsub.f32 %v3269_v13, %v3400_v47  ;;  %v1696_v63 = vsub.f32 %v3349_v56, %v3469_v48  ;;  %v1704_v28 = vadd.f32 1e-05, %v1664_v51  ;;  %v4024_v48 = vld [vmem:[#allocation5_spill] sm:$0xff] }
 0x236   :  { %v1689_v35 = vsub.f32 %v3304_v55, %v3454_v3  ;;  %v1805_v4 = vmul.f32 %v3366_v12, %v1725_v60  ;;  %v1806_v16 = vmul.f32 %v3366_v12, %v1726_v43  ;;  %v1807_v58 = vmul.f32 %v3366_v12, %v1727_v53 }
 0x237   :  { %v1728_v32 = vmul.f32 %v2570_v1, %v4009_v33  ;;  %v1690_v59 = vsub.f32 %v3311_v0, %v3454_v3  ;;  %v1691_v13 = vsub.f32 %v3315_v7, %v3454_v3  ;;  %v1692_v47 = vsub.f32 %v3327_v25, %v3454_v3 }
 0x238   :  { %v4010_v5 = vsub.f32 %v3264_v34, %v3404_v61  ;;  %v4011_v0 = vsub.f32 %v3271_v14, %v3404_v61  ;;  %v4012_v7 = vsub.f32 %v3275_v21, %v3404_v61  ;;  %v4013_v3 = vsub.f32 %v3285_v29, %v3404_v61 }
 0x239   :  { %v3533_v2 = vpop.permute.xlu0 %1944  ;;  %v1808_v24 = vmul.f32 %v3366_v12, %v1728_v32  ;;  %2577 = vrsqrt.f32 %v1704_v28  ;;  %v3581_v49 = vadd.f32 %v3382_v31, %v1805_v4  ;;  %v3584_v21 = vadd.f32 %v3382_v31, %v1806_v16 }
 0x23a   :  { %v3553_v36 = vmul.f32 %v3533_v2, %v3492_v26  ;;  %v3557_v55 = vmul.f32 %v3533_v2, %v3496_v9  ;;  %v1729_v1 = vmul.f32 %v2572_v45, %v4010_v5  ;;  %v1730_v62 = vmul.f32 %v2572_v45, %v4011_v0  ;;  %v2574_v14 = vpop.eup %2573 }
 0x23b   :  { %v1731_v25 = vmul.f32 %v2572_v45, %v4012_v7  ;;  %v1732_v22 = vmul.f32 %v2572_v45, %v4013_v3  ;;  %v3574_v60 = vmul.f32 %v3533_v2, %v3499_v42  ;;  %v3578_v34 = vmul.f32 %v3533_v2, %v3502_v46 }
 0x23c   :  { %v3587_v29 = vadd.f32 %v3382_v31, %v1807_v58  ;;  %v3591_v12 = vmul.f32 %v3533_v2, %v3473_v37  ;;  %v4014_v61 = vsub.f32 %v3277_v23, %v3428_v10  ;;  %v4015_v6 = vsub.f32 %v3287_v30, %v3428_v10  ;;  %v2576_v32 = vpop.eup %2575  ;;  %v4017_v23 = vld [vmem:[#allocation3_spill] sm:$0xff] }
 0x23d   :  { %v4016_v51 = vsub.f32 %v3292_v38, %v3428_v10  ;;  %v1736_v33 = vmul.f32 %v2574_v14, %v1688_v44  ;;  %v1809_v28 = vmul.f32 %v3368_v17, %v1729_v1  ;;  %v1810_v4 = vmul.f32 %v3368_v17, %v1730_v62 }
 0x23e   :  { %v1733_v43 = vmul.f32 %v2574_v14, %v4014_v61  ;;  %v1734_v53 = vmul.f32 %v2574_v14, %v4015_v6  ;;  %v1811_v16 = vmul.f32 %v3368_v17, %v1731_v25  ;;  %v1812_v58 = vmul.f32 %v3368_v17, %v1732_v22  ;;  %v4018_v22 = vld [vmem:[#allocation4_spill] sm:$0xff]  ;;  %v4020_v6 = vld [vmem:[#allocation7_spill] sm:$0xff] }
 0x23f   :  { %v1735_v45 = vmul.f32 %v2574_v14, %v4016_v51  ;;  %v1816_v7 = vmul.f32 %v4017_v23, %v1736_v33  ;;  %v1737_v38 = vmul.f32 %v2576_v32, %v1689_v35  ;;  %v1738_v10 = vmul.f32 %v2576_v32, %v1690_v59 }
 0x240   :  { %v1813_v5 = vmul.f32 %v4017_v23, %v1733_v43  ;;  %v1814_v0 = vmul.f32 %v4017_v23, %v1734_v53  ;;  %v1739_v44 = vmul.f32 %v2576_v32, %v1691_v13  ;;  %v1740_v3 = vmul.f32 %v2576_v32, %v1692_v47  ;;  %v4019_v47 = vld [vmem:[#allocation6_spill] sm:$0xff] }
 0x241   :  { %v1815_v30 = vmul.f32 %v4017_v23, %v1735_v45  ;;  %v3611_v1 = vadd.f32 %v3382_v31, %v1808_v24  ;;  %v3615_v62 = vmul.f32 %v3533_v2, %v3476_v39  ;;  %v3619_v17 = vmul.f32 %v3533_v2, %v3481_v18 }
 0x242   :  { %v3623_v25 = vmul.f32 %v3533_v2, %v3484_v41  ;;  %v1817_v35 = vmul.f32 %v4018_v22, %v1737_v38  ;;  %v1818_v59 = vmul.f32 %v4018_v22, %v1738_v10  ;;  %v1819_v13 = vmul.f32 %v4018_v22, %v1739_v44 }
 0x243   :  { %v1820_v31 = vmul.f32 %v4018_v22, %v1740_v3  ;;  %v3630_v24 = vadd.f32 %v4019_v47, %v1809_v28  ;;  %v3633_v14 = vadd.f32 %v4019_v47, %v1810_v4  ;;  %v3636_v61 = vadd.f32 %v4019_v47, %v1811_v16  ;;  %v2578_v32 = vpop.eup %2577 }
 0x244   :  { %v3639_v43 = vadd.f32 %v4019_v47, %v1812_v58  ;;  %v3642_v53 = vadd.f32 %v4020_v6, %v1813_v5  ;;  %v3645_v51 = vadd.f32 %v4020_v6, %v1814_v0  ;;  %v3648_v45 = vadd.f32 %v4020_v6, %v1815_v30 }
 0x245   :  { %v3651_v33 = vadd.f32 %v4020_v6, %v1816_v7  ;;  %v3654_v28 = vadd.f32 %v3486_v15, %v1817_v35  ;;  %v3657_v4 = vadd.f32 %v3486_v15, %v1818_v59  ;;  %v3660_v16 = vadd.f32 %v3486_v15, %v1819_v13 }
 0x246   :  { %v3663_v58 = vadd.f32 %v3486_v15, %v1820_v31  ;;  %v1741_v23 = vmul.f32 %v2578_v32, %v1693_v54  ;;  %v1742_v5 = vmul.f32 %v2578_v32, %v1694_v57  ;;  %v1743_v0 = vmul.f32 %v2578_v32, %v1695_v11 }
 0x247   :  { %4021 = vst [vmem:[#allocation3_spill] sm:$0xff] %v3654_v28  ;;  %4022 = vst [vmem:[#allocation4_spill] sm:$0xff] %v3660_v16  ;;  %v1744_v30 = vmul.f32 %v2578_v32, %v1696_v63  ;;  %vm1906_vm1 = vcmp.gt.f32.partialorder %v3492_v26, 0.0  ;;  %vm1907_vm2 = vcmp.gt.f32.partialorder %v3496_v9, 0.0  ;;  %vm1908_vm3 = vcmp.gt.f32.partialorder %v3499_v42, 0.0  ;;  %v1871_v63 = vpop.permute.xlu1 %1870 }
 0x248   :  { %4023 = vst [vmem:[#allocation6_spill] sm:$0xff] %v3663_v58  ;;  %vm1909_vm4 = vcmp.gt.f32.partialorder %v3502_v46, 0.0  ;;  %v3683_v8 = vmul.f32 %v3533_v2, %v3514_v19  ;;  %v3687_v20 = vmul.f32 %v3533_v2, %v3517_v27  ;;  %v3691_v40 = vmul.f32 %v3533_v2, %v3520_v52 }
 0x249   :  { %v3695_v56 = vmul.f32 %v3533_v2, %v3525_v50  ;;  %vm1910_vm5 = vcmp.gt.f32.partialorder %v3473_v37, 0.0  ;;  %vm1911_vm6 = vcmp.gt.f32.partialorder %v3476_v39, 0.0  ;;  %vm1912_vm7 = vcmp.gt.f32.partialorder %v3481_v18, 0.0 }
 0x24a   :  { %vm1913_vm8 = vcmp.gt.f32.partialorder %v3484_v41, 0.0  ;;  %v1821_v15 = vmul.f32 %v4024_v48, %v1741_v23  ;;  %v1822_v54 = vmul.f32 %v4024_v48, %v1742_v5  ;;  %v1823_v57 = vmul.f32 %v4024_v48, %v1743_v0 }
 0x24b   :  { %v1824_v11 = vmul.f32 %v4024_v48, %v1744_v30  ;;  %v1959_v7 = vmul.f32 %v3533_v2, %v3581_v49  ;;  %v1960_v38 = vmul.f32 %v3533_v2, %v3584_v21  ;;  %v1961_v10 = vmul.f32 %v3533_v2, %v3587_v29 }
 0x24c   :  { %v1962_v44 = vmul.f32 %v3533_v2, %v3611_v1  ;;  %vm1918_vm13 = vcmp.gt.f32.partialorder %v3581_v49, 0.0  ;;  %vm1919_vm14 = vcmp.gt.f32.partialorder %v3584_v21, 0.0  ;;  %vm1928_vm10 = vcmp.gt.f32.partialorder %v3648_v45, 0.0 }
 0x24d   :  { %vm1929_vm9 = vcmp.gt.f32.partialorder %v3651_v33, 0.0  ;;  %v3729_v3 = vadd.f32 %v1871_v63, %v1821_v15  ;;  %v3731_v22 = vadd.f32 %v1871_v63, %v1822_v54  ;;  %v3733_v35 = vadd.f32 %v1871_v63, %v1823_v57 }
 0x24e   :  { %v3735_v59 = vadd.f32 %v1871_v63, %v1824_v11  ;;  %v1963_v13 = vmul.f32 %v3533_v2, %v3630_v24  ;;  %v1964_v31 = vmul.f32 %v3533_v2, %v3633_v14  ;;  %v1965_v47 = vmul.f32 %v3533_v2, %v3636_v61 }
 0x24f   :  { %4025 = vst [vmem:[#allocation7_spill] sm:$0xff] %v3731_v22  ;;  %v1966_v6 = vmul.f32 %v3533_v2, %v3639_v43  ;;  %vm1934_vm15 = vcmp.gt.f32.partialorder %v3729_v3, 0.0  ;;  %vm1935_vm0 = vcmp.gt.f32.partialorder %v3731_v22, 0.0  ;;  %vm1936_vm12 = vcmp.gt.f32.partialorder %v3733_v35, 0.0 }
 0x250   :  { %vm1937_vm11 = vcmp.gt.f32.partialorder %v3735_v59, 0.0  ;;  %v1967_v32 = vmul.f32 %v3533_v2, %v3642_v53  ;;  %v1968_v23 = vmul.f32 %v3533_v2, %v3645_v51  ;;  %v1969_v5 = vmul.f32 %v3533_v2, %v3648_v45 }
 0x251   :  { %v1970_v0 = vmul.f32 %v3533_v2, %v3651_v33  ;;  %v1971_v30 = vmul.f32 %v3533_v2, %v3654_v28  ;;  %v1972_v48 = vmul.f32 %v3533_v2, %v3657_v4  ;;  %v1973_v15 = vmul.f32 %v3533_v2, %v3660_v16 }
 0x252   :  { %v1974_v54 = vmul.f32 %v3533_v2, %v3663_v58  ;;  %v1975_v57 = vmul.f32 %v3533_v2, %v3729_v3  ;;  %v1976_v11 = vmul.f32 %v3533_v2, %v3731_v22  ;;  %v1977_v63 = vmul.f32 %v3533_v2, %v3733_v35 }
 0x253   :  { %v1978_v28 = vmul.f32 %v3533_v2, %v3735_v59  ;;  %v1979_v16 = vsel %vm1906_vm1, %v3492_v26, %v3553_v36  ;;  %v1980_v58 = vsel %vm1907_vm2, %v3496_v9, %v3557_v55  ;;  %v1981_v22 = vsel %vm1908_vm3, %v3499_v42, %v3574_v60 }
 0x254   :  { %v1982_v2 = vsel %vm1909_vm4, %v3502_v46, %v3578_v34  ;;  %v1983_v26 = vsel %vm1910_vm5, %v3473_v37, %v3591_v12  ;;  %v1984_v9 = vsel %vm1911_vm6, %v3476_v39, %v3615_v62  ;;  %v1985_v42 = vsel %vm1912_vm7, %v3481_v18, %v3619_v17  ;;  %2011 = vst [vmem:[%s3987_s6] sm:$0xff] %v1979_v16 }
 0x255   :  { %v1986_v46 = vsel %vm1913_vm8, %v3484_v41, %v3623_v25  ;;  %2012 = vst [vmem:[%s3987_s6 + $0x8] sm:$0xff] %v1980_v58  ;;  %2013 = vst [vmem:[%s3987_s6 + $0x10] sm:$0xff] %v1981_v22  ;;  %vm4026_vm1 = vcmp.gt.f32.partialorder %v3514_v19, 0.0  ;;  %vm4027_vm2 = vcmp.gt.f32.partialorder %v3517_v27, 0.0  ;;  %vm4028_vm3 = vcmp.gt.f32.partialorder %v3520_v52, 0.0  ;;  %v4041_v25 = vld [vmem:[#allocation4_spill] sm:$0xff] }
 0x256   :  { %2014 = vst [vmem:[%s3987_s6 + $0x18] sm:$0xff] %v1982_v2  ;;  %v1987_v37 = vsel %vm4026_vm1, %v3514_v19, %v3683_v8  ;;  %v1988_v39 = vsel %vm4027_vm2, %v3517_v27, %v3687_v20  ;;  %v1989_v18 = vsel %vm4028_vm3, %v3520_v52, %v3691_v40  ;;  %vm4029_vm4 = vcmp.gt.f32.partialorder %v3525_v50, 0.0  ;;  %2015 = vst [vmem:[%s3987_s6 + $0x20] sm:$0xff] %v1983_v26 }
 0x257   :  { %v1990_v41 = vsel %vm4029_vm4, %v3525_v50, %v3695_v56  ;;  %2016 = vst [vmem:[%s3987_s6 + $0x28] sm:$0xff] %v1984_v9  ;;  %2017 = vst [vmem:[%s3987_s6 + $0x30] sm:$0xff] %v1985_v42  ;;  %v1991_v19 = vsel %vm1918_vm13, %v3581_v49, %v1959_v7  ;;  %v1992_v27 = vsel %vm1919_vm14, %v3584_v21, %v1960_v38  ;;  %vm4030_vm5 = vcmp.gt.f32.partialorder %v3587_v29, 0.0 }
 0x258   :  { %2018 = vst [vmem:[%s3987_s6 + $0x38] sm:$0xff] %v1986_v46  ;;  %v1993_v52 = vsel %vm4030_vm5, %v3587_v29, %v1961_v10  ;;  %vm4031_vm6 = vcmp.gt.f32.partialorder %v3611_v1, 0.0  ;;  %2019 = vst [vmem:[%s3987_s6 + $0x40] sm:$0xff] %v1987_v37  ;;  %vm4032_vm7 = vcmp.gt.f32.partialorder %v3630_v24, 0.0  ;;  %vm4033_vm8 = vcmp.gt.f32.partialorder %v3633_v14, 0.0 }
 0x259   :  { %v1994_v50 = vsel %vm4031_vm6, %v3611_v1, %v1962_v44  ;;  %2020 = vst [vmem:[%s3987_s6 + $0x48] sm:$0xff] %v1988_v39  ;;  %2021 = vst [vmem:[%s3987_s6 + $0x50] sm:$0xff] %v1989_v18  ;;  %v1995_v36 = vsel %vm4032_vm7, %v3630_v24, %v1963_v13  ;;  %v1996_v55 = vsel %vm4033_vm8, %v3633_v14, %v1964_v31  ;;  %vm4034_vm13 = vcmp.gt.f32.partialorder %v3636_v61, 0.0  ;;  %v4038_v1 = vld [vmem:[#allocation3_spill] sm:$0xff]  ;;  %v4043_v14 = vld [vmem:[#allocation6_spill] sm:$0xff] }
 0x25a   :  { %2022 = vst [vmem:[%s3987_s6 + $0x58] sm:$0xff] %v1990_v41  ;;  %v1997_v60 = vsel %vm4034_vm13, %v3636_v61, %v1965_v47  ;;  %vm4035_vm14 = vcmp.gt.f32.partialorder %v3639_v43, 0.0  ;;  %2023 = vst [vmem:[%s3987_s6 + $0x60] sm:$0xff] %v1991_v19  ;;  %vm4036_vm1 = vcmp.gt.f32.partialorder %v3642_v53, 0.0  ;;  %vm4037_vm2 = vcmp.gt.f32.partialorder %v3645_v51, 0.0 }
 0x25b   :  { %v1998_v34 = vsel %vm4035_vm14, %v3639_v43, %v1966_v6  ;;  %2024 = vst [vmem:[%s3987_s6 + $0x68] sm:$0xff] %v1992_v27  ;;  %2025 = vst [vmem:[%s3987_s6 + $0x70] sm:$0xff] %v1993_v52  ;;  %v1999_v49 = vsel %vm4036_vm1, %v3642_v53, %v1967_v32  ;;  %v2000_v21 = vsel %vm4037_vm2, %v3645_v51, %v1968_v23  ;;  %vm4042_vm3 = vcmp.gt.f32.partialorder %v4041_v25, 0.0  ;;  %v4045_v53 = vld [vmem:[#allocation7_spill] sm:$0xff] }
 0x25c   :  { %2026 = vst [vmem:[%s3987_s6 + $0x78] sm:$0xff] %v1994_v50  ;;  %v2001_v29 = vsel %vm1928_vm10, %v3648_v45, %v1969_v5  ;;  %v2002_v12 = vsel %vm1929_vm9, %v3651_v33, %v1970_v0  ;;  %2027 = vst [vmem:[%s3987_s6 + $0x80] sm:$0xff] %v1995_v36  ;;  %vm4039_vm10 = vcmp.gt.f32.partialorder %v4038_v1, 0.0  ;;  %vm4040_vm9 = vcmp.gt.f32.partialorder %v3657_v4, 0.0 }
 0x25d   :  { %2028 = vst [vmem:[%s3987_s6 + $0x88] sm:$0xff] %v1996_v55  ;;  %2029 = vst [vmem:[%s3987_s6 + $0x90] sm:$0xff] %v1997_v60  ;;  %v2003_v62 = vsel %vm4039_vm10, %v4038_v1, %v1971_v30  ;;  %v2004_v17 = vsel %vm4040_vm9, %v3657_v4, %v1972_v48  ;;  %v2005_v24 = vsel %vm4042_vm3, %v4041_v25, %v1973_v15  ;;  %vm4044_vm4 = vcmp.gt.f32.partialorder %v4043_v14, 0.0 }
 0x25e   :  { %2030 = vst [vmem:[%s3987_s6 + $0x98] sm:$0xff] %v1998_v34  ;;  %v2006_v61 = vsel %vm4044_vm4, %v4043_v14, %v1974_v54  ;;  %2031 = vst [vmem:[%s3987_s6 + $0xa0] sm:$0xff] %v1999_v49  ;;  %v2007_v43 = vsel %vm1934_vm15, %v3729_v3, %v1975_v57  ;;  %v2008_v51 = vsel %vm1935_vm0, %v4045_v53, %v1976_v11 }
 0x25f   :  { %2032 = vst [vmem:[%s3987_s6 + $0xa8] sm:$0xff] %v2000_v21  ;;  %2033 = vst [vmem:[%s3987_s6 + $0xb0] sm:$0xff] %v2001_v29  ;;  %v2009_v45 = vsel %vm1936_vm12, %v3733_v35, %v1977_v63  ;;  %v2010_v33 = vsel %vm1937_vm11, %v3735_v59, %v1978_v28 }
 0x260   :  { %2034 = vst [vmem:[%s3987_s6 + $0xb8] sm:$0xff] %v2002_v12  ;;  %2035 = vst [vmem:[%s3987_s6 + $0xc0] sm:$0xff] %v2003_v62 }
 0x261   :  { %2036 = vst [vmem:[%s3987_s6 + $0xc8] sm:$0xff] %v2004_v17  ;;  %2037 = vst [vmem:[%s3987_s6 + $0xd0] sm:$0xff] %v2005_v24 }
 0x262   :  { %2038 = vst [vmem:[%s3987_s6 + $0xd8] sm:$0xff] %v2006_v61  ;;  %2039 = vst [vmem:[%s3987_s6 + $0xe0] sm:$0xff] %v2007_v43 }
 0x263   :  { %2040 = vst [vmem:[%s3987_s6 + $0xe8] sm:$0xff] %v2008_v51  ;;  %2041 = vst [vmem:[%s3987_s6 + $0xf0] sm:$0xff] %v2009_v45 }
 0x264   :  { %2042 = vst [vmem:[%s3987_s6 + $0xf8] sm:$0xff] %v2010_v33 }

// kernel: csnet_forward.17
= control target key start
LH: loop header
LB: loop body
LE: loop exit
PB: predicated region body
PF: predicated region fallthrough
CT: control target
= control target key end

     0   :  { %v2539_v34 = vmov 0   ;;  %vm1065_vm0 = vcmask 523264   ;;  %s3707_s1 = inlined_call_operand.vmem [shape: bf16[576,512], index: 1, kind: input, shape index: {}]   ;;  %s3708_s3 = inlined_call_operand.<no memory space> [shape: f32[1,1], index: 3, kind: input, shape index: {}]   ;;  %s3709_s0 = inlined_call_operand.vmem [shape: bf16[64,576], index: 0, kind: input, shape index: {}]   ;;  %s3710_s2 = inlined_call_operand.vmem [shape: f32[64,1], index: 2, kind: input, shape index: {}]   ;;  %s3711_s4 = inlined_call_operand.vmem [shape: f32[64,1], index: 4, kind: input, shape index: {}]   ;;  %s3712_s5 = inlined_call_operand.vmem [shape: f32[64,1], index: 5, kind: input, shape index: {}]   ;;  %s3713_s6 = inlined_call_operand.vmem [shape: f32[64,512], index: 6, kind: input, shape index: {}]   ;;  %s3714_s7 = inlined_call_operand.vmem [shape: f32[64,512], index: 7, kind: output, shape index: {}]  }
   0x1   :  { %v2279_v0 = vld [vmem:[%s3707_s1 + $0x4] ss:$16 sps:$4 sm:$0xff]   ;;  %v2281_v1 = vld [vmem:[%s3707_s1 + $0xc] ss:$16 sps:$4 sm:$0xff]   ;;  %v2283_v2 = vld [vmem:[%s3707_s1] ss:$16 sps:$4 sm:$0xff]   ;;  %2277 = vset.pattern.permute.xlu0 %v2539_v34  ;;  %2278 = vset.pattern.permute.xlu1 %v2539_v34 }
   0x2   :  { %1078 = vmatprep.subr.bf16.mxu0 %v2279_v0  ;;  %v2284_v3 = vld [vmem:[%s3707_s1 + $0x8] ss:$16 sps:$4 sm:$0xff]   ;;  %1297 = vmatprep.subr.bf16.mxu1 %v2281_v1  ;;  %v2285_v4 = vld [vmem:[%s3707_s1 + $0x24] ss:$16 sps:$4 sm:$0xff]   ;;  %v2287_v5 = vld [vmem:[%s3707_s1 + $0x2c] ss:$16 sps:$4 sm:$0xff]  }
   0x3   :  { %1079 = vmatpush1.bf16.msra.mxu0 %v2283_v2  ;;  %1298 = vmatpush1.bf16.msra.mxu1 %v2284_v3  ;;  %v2289_v6 = vld [vmem:[%s3707_s1 + $0x20] ss:$16 sps:$4 sm:$0xff]   ;;  %v2290_v7 = vld [vmem:[%s3707_s1 + $0x28] ss:$16 sps:$4 sm:$0xff]   ;;  %v2291_v8 = vld [vmem:[%s3707_s1 + $0x44] ss:$16 sps:$4 sm:$0xff]  }
   0x4   :  { %1080 = vmatprep.subr.bf16.mxu0 %v2285_v4  ;;  %1299 = vmatprep.subr.bf16.mxu1 %v2287_v5  ;;  %v2293_v9 = vld [vmem:[%s3707_s1 + $0x4c] ss:$16 sps:$4 sm:$0xff]   ;;  %v2295_v10 = vld [vmem:[%s3707_s1 + $0x40] ss:$16 sps:$4 sm:$0xff]   ;;  %v2296_v11 = vld [vmem:[%s3707_s1 + $0x48] ss:$16 sps:$4 sm:$0xff]  }
   0x5   :  { %v2297_v12 = vld [vmem:[%s3707_s1 + $0x64] ss:$16 sps:$4 sm:$0xff]   ;;  %v2299_v13 = vld [vmem:[%s3707_s1 + $0x6c] ss:$16 sps:$4 sm:$0xff]   ;;  %v2301_v14 = vld [vmem:[%s3707_s1 + $0x60] ss:$16 sps:$4 sm:$0xff]  }
   0x6   :  { %v2302_v15 = vld [vmem:[%s3707_s1 + $0x68] ss:$16 sps:$4 sm:$0xff]   ;;  %v2303_v16 = vld [vmem:[%s3707_s1 + $0x84] ss:$16 sps:$4 sm:$0xff]   ;;  %v2305_v17 = vld [vmem:[%s3707_s1 + $0x8c] ss:$16 sps:$4 sm:$0xff]  }
   0x7   :  { %1081 = vmatpush1.bf16.msra.mxu0 %v2289_v6  ;;  %1300 = vmatpush1.bf16.msra.mxu1 %v2290_v7  ;;  %v2307_v18 = vld [vmem:[%s3707_s1 + $0x80] ss:$16 sps:$4 sm:$0xff]   ;;  %v2308_v19 = vld [vmem:[%s3707_s1 + $0x88] ss:$16 sps:$4 sm:$0xff]   ;;  %v2309_v20 = vld [vmem:[%s3707_s1 + $0xa4] ss:$16 sps:$4 sm:$0xff]  }
   0x8   :  { %1082 = vmatprep.subr.bf16.mxu0 %v2291_v8  ;;  %1301 = vmatprep.subr.bf16.mxu1 %v2293_v9  ;;  %v2311_v21 = vld [vmem:[%s3707_s1 + $0xac] ss:$16 sps:$4 sm:$0xff]   ;;  %v2313_v22 = vld [vmem:[%s3707_s1 + $0xa0] ss:$16 sps:$4 sm:$0xff]   ;;  %v2314_v23 = vld [vmem:[%s3707_s1 + $0xa8] ss:$16 sps:$4 sm:$0xff]  }
   0x9   :  { %v2315_v24 = vld [vmem:[%s3707_s1 + $0xc4] ss:$16 sps:$4 sm:$0xff]   ;;  %v2317_v25 = vld [vmem:[%s3707_s1 + $0xcc] ss:$16 sps:$4 sm:$0xff]   ;;  %v2319_v26 = vld [vmem:[%s3707_s1 + $0xc0] ss:$16 sps:$4 sm:$0xff]  }
   0xa   :  { %v2320_v27 = vld [vmem:[%s3707_s1 + $0xc8] ss:$16 sps:$4 sm:$0xff]   ;;  %v2321_v28 = vld [vmem:[%s3707_s1 + $0xe4] ss:$16 sps:$4 sm:$0xff]   ;;  %v2323_v29 = vld [vmem:[%s3707_s1 + $0xec] ss:$16 sps:$4 sm:$0xff]  }
   0xb   :  { %1083 = vmatpush1.bf16.msra.mxu0 %v2295_v10  ;;  %1302 = vmatpush1.bf16.msra.mxu1 %v2296_v11  ;;  %v2325_v30 = vld [vmem:[%s3707_s1 + $0xe0] ss:$16 sps:$4 sm:$0xff]   ;;  %v2326_v31 = vld [vmem:[%s3707_s1 + $0xe8] ss:$16 sps:$4 sm:$0xff]   ;;  %v2327_v32 = vld [vmem:[%s3707_s1 + $0x104] ss:$16 sps:$4 sm:$0xff]  }
   0xc   :  { %1084 = vmatprep.subr.bf16.mxu0 %v2297_v12  ;;  %1303 = vmatprep.subr.bf16.mxu1 %v2299_v13  ;;  %v2329_v33 = vld [vmem:[%s3707_s1 + $0x10c] ss:$16 sps:$4 sm:$0xff]   ;;  %v2331_v35 = vld [vmem:[%s3707_s1 + $0x100] ss:$16 sps:$4 sm:$0xff]   ;;  %v2332_v36 = vld [vmem:[%s3707_s1 + $0x108] ss:$16 sps:$4 sm:$0xff]  }
   0xd   :  { %v2333_v37 = vld [vmem:[%s3707_s1 + $0x124] ss:$16 sps:$4 sm:$0xff]   ;;  %v2335_v38 = vld [vmem:[%s3707_s1 + $0x12c] ss:$16 sps:$4 sm:$0xff]   ;;  %v2337_v39 = vld [vmem:[%s3707_s1 + $0x120] ss:$16 sps:$4 sm:$0xff]  }
   0xe   :  { %v2338_v40 = vld [vmem:[%s3707_s1 + $0x128] ss:$16 sps:$4 sm:$0xff]   ;;  %v2339_v41 = vld [vmem:[%s3707_s1 + $0x144] ss:$16 sps:$4 sm:$0xff]   ;;  %v2341_v42 = vld [vmem:[%s3707_s1 + $0x14c] ss:$16 sps:$4 sm:$0xff]  }
   0xf   :  { %1085 = vmatpush1.bf16.msra.mxu0 %v2301_v14  ;;  %1304 = vmatpush1.bf16.msra.mxu1 %v2302_v15  ;;  %v2343_v43 = vld [vmem:[%s3707_s1 + $0x140] ss:$16 sps:$4 sm:$0xff]   ;;  %v2344_v44 = vld [vmem:[%s3707_s1 + $0x148] ss:$16 sps:$4 sm:$0xff]   ;;  %v2345_v45 = vld [vmem:[%s3707_s1 + $0x164] ss:$16 sps:$4 sm:$0xff]  }
  0x10   :  { %1086 = vmatprep.subr.bf16.mxu0 %v2303_v16  ;;  %1305 = vmatprep.subr.bf16.mxu1 %v2305_v17  ;;  %v2347_v46 = vld [vmem:[%s3707_s1 + $0x16c] ss:$16 sps:$4 sm:$0xff]   ;;  %v2349_v47 = vld [vmem:[%s3707_s1 + $0x160] ss:$16 sps:$4 sm:$0xff]   ;;  %v2350_v48 = vld [vmem:[%s3707_s1 + $0x168] ss:$16 sps:$4 sm:$0xff]  }
  0x11   :  { %v2377_v49 = vld [vmem:[%s3709_s0 + $0x4] ss:$20 sps:$4 sm:$0xff]   ;;  %v2353_v51 = vld [vmem:[%s3707_s1 + $0x18c] ss:$16 sps:$4 sm:$0xff]   ;;  %v2355_v52 = vld [vmem:[%s3707_s1 + $0x180] ss:$16 sps:$4 sm:$0xff]  }
  0x12   :  { %v2351_v50 = vld [vmem:[%s3707_s1 + $0x184] ss:$16 sps:$4 sm:$0xff]   ;;  %1110 = vmatprep.mubr.bf16.mxu0 %v2377_v49  ;;  %1329 = vmatprep.mubr.bf16.mxu1 %v2377_v49  ;;  %v2356_v53 = vld [vmem:[%s3707_s1 + $0x188] ss:$16 sps:$4 sm:$0xff]   ;;  %v2359_v55 = vld [vmem:[%s3707_s1 + $0x1ac] ss:$16 sps:$4 sm:$0xff]  }
  0x13   :  { %1087 = vmatpush1.bf16.msra.mxu0 %v2307_v18  ;;  %1306 = vmatpush1.bf16.msra.mxu1 %v2308_v19  ;;  %v2357_v54 = vld [vmem:[%s3707_s1 + $0x1a4] ss:$16 sps:$4 sm:$0xff]   ;;  %v2361_v56 = vld [vmem:[%s3707_s1 + $0x1a0] ss:$16 sps:$4 sm:$0xff]   ;;  %v2362_v57 = vld [vmem:[%s3707_s1 + $0x1a8] ss:$16 sps:$4 sm:$0xff]  }
  0x14   :  { %1088 = vmatprep.subr.bf16.mxu0 %v2309_v20  ;;  %1307 = vmatprep.subr.bf16.mxu1 %v2311_v21  ;;  %v2363_v58 = vld [vmem:[%s3707_s1 + $0x1c4] ss:$16 sps:$4 sm:$0xff]   ;;  %v2365_v59 = vld [vmem:[%s3707_s1 + $0x1cc] ss:$16 sps:$4 sm:$0xff]   ;;  %v2367_v60 = vld [vmem:[%s3707_s1 + $0x1c0] ss:$16 sps:$4 sm:$0xff]  }
  0x15   :  { %v2368_v61 = vld [vmem:[%s3707_s1 + $0x1c8] ss:$16 sps:$4 sm:$0xff]   ;;  %v2369_v62 = vld [vmem:[%s3707_s1 + $0x1e4] ss:$16 sps:$4 sm:$0xff]   ;;  %v2371_v63 = vld [vmem:[%s3707_s1 + $0x1ec] ss:$16 sps:$4 sm:$0xff]  }
  0x16   :  { %v2373_v0 = vld [vmem:[%s3707_s1 + $0x1e0] ss:$16 sps:$4 sm:$0xff]   ;;  %v2374_v1 = vld [vmem:[%s3707_s1 + $0x1e8] ss:$16 sps:$4 sm:$0xff]   ;;  %v2380_v2 = vld [vmem:[%s3707_s1 + $0x204] ss:$16 sps:$4 sm:$0xff]  }
  0x17   :  { %1089 = vmatpush1.bf16.msra.mxu0 %v2313_v22  ;;  %1308 = vmatpush1.bf16.msra.mxu1 %v2314_v23  ;;  %v2383_v3 = vld [vmem:[%s3707_s1 + $0x20c] ss:$16 sps:$4 sm:$0xff]   ;;  %v2375_v4 = vld [vmem:[%s3709_s0] ss:$20 sps:$4 sm:$0xff]   ;;  %v2381_v6 = vld [vmem:[%s3707_s1 + $0x208] ss:$16 sps:$4 sm:$0xff]  }
  0x18   :  { %1090 = vmatprep.subr.bf16.mxu0 %v2315_v24  ;;  %1309 = vmatprep.subr.bf16.mxu1 %v2317_v25  ;;  %v2378_v5 = vld [vmem:[%s3707_s1 + $0x200] ss:$16 sps:$4 sm:$0xff]   ;;  %v2386_v7 = vld [vmem:[%s3707_s1 + $0x224] ss:$16 sps:$4 sm:$0xff]   ;;  %v2389_v8 = vld [vmem:[%s3707_s1 + $0x22c] ss:$16 sps:$4 sm:$0xff]  }
  0x19   :  { %v2384_v9 = vld [vmem:[%s3707_s1 + $0x220] ss:$16 sps:$4 sm:$0xff]   ;;  %v2387_v10 = vld [vmem:[%s3707_s1 + $0x228] ss:$16 sps:$4 sm:$0xff]   ;;  %v2392_v11 = vld [vmem:[%s3707_s1 + $0x244] ss:$16 sps:$4 sm:$0xff]  }
  0x1a   :  { %v2395_v12 = vld [vmem:[%s3707_s1 + $0x24c] ss:$16 sps:$4 sm:$0xff]   ;;  %v2390_v13 = vld [vmem:[%s3707_s1 + $0x240] ss:$16 sps:$4 sm:$0xff]   ;;  %v2393_v14 = vld [vmem:[%s3707_s1 + $0x248] ss:$16 sps:$4 sm:$0xff]  }
  0x1b   :  { %1091 = vmatpush1.bf16.msra.mxu0 %v2319_v26  ;;  %1310 = vmatpush1.bf16.msra.mxu1 %v2320_v27  ;;  %v2438_v15 = vld [vmem:[%s3709_s0 + $0x2c] ss:$20 sps:$4 sm:$0xff]   ;;  %v2440_v16 = vld [vmem:[%s3709_s0 + $0x28] ss:$20 sps:$4 sm:$0xff]   ;;  %v2398_v17 = vld [vmem:[%s3707_s1 + $0x264] ss:$16 sps:$4 sm:$0xff]  }
  0x1c   :  { %1092 = vmatprep.subr.bf16.mxu0 %v2321_v28  ;;  %1311 = vmatprep.subr.bf16.mxu1 %v2323_v29  ;;  %v2401_v18 = vld [vmem:[%s3707_s1 + $0x26c] ss:$16 sps:$4 sm:$0xff]   ;;  %v2396_v19 = vld [vmem:[%s3707_s1 + $0x260] ss:$16 sps:$4 sm:$0xff]   ;;  %v2399_v20 = vld [vmem:[%s3707_s1 + $0x268] ss:$16 sps:$4 sm:$0xff]  }
  0x1d   :  { %v2404_v21 = vld [vmem:[%s3707_s1 + $0x284] ss:$16 sps:$4 sm:$0xff]   ;;  %v2407_v22 = vld [vmem:[%s3707_s1 + $0x28c] ss:$16 sps:$4 sm:$0xff]   ;;  %v2402_v23 = vld [vmem:[%s3707_s1 + $0x280] ss:$16 sps:$4 sm:$0xff]  }
  0x1e   :  { %v2453_v24 = vld [vmem:[%s3709_s0 + $0x54] ss:$20 sps:$4 sm:$0xff]   ;;  %v2455_v26 = vld [vmem:[%s3709_s0 + $0x50] ss:$20 sps:$4 sm:$0xff]   ;;  %v2413_v28 = vld [vmem:[%s3707_s1 + $0x2ac] ss:$16 sps:$4 sm:$0xff]  }
  0x1f   :  { %1093 = vmatpush1.bf16.msra.mxu0 %v2325_v30  ;;  %1312 = vmatpush1.bf16.msra.mxu1 %v2326_v31  ;;  %v2405_v25 = vld [vmem:[%s3707_s1 + $0x288] ss:$16 sps:$4 sm:$0xff]   ;;  %v2410_v27 = vld [vmem:[%s3707_s1 + $0x2a4] ss:$16 sps:$4 sm:$0xff]   ;;  %v2408_v29 = vld [vmem:[%s3707_s1 + $0x2a0] ss:$16 sps:$4 sm:$0xff]  }
  0x20   :  { %1094 = vmatprep.subr.bf16.mxu0 %v2327_v32  ;;  %1313 = vmatprep.subr.bf16.mxu1 %v2329_v33  ;;  %v2411_v30 = vld [vmem:[%s3707_s1 + $0x2a8] ss:$16 sps:$4 sm:$0xff]   ;;  %v2416_v31 = vld [vmem:[%s3707_s1 + $0x2c4] ss:$16 sps:$4 sm:$0xff]   ;;  %v2468_v32 = vld [vmem:[%s3709_s0 + $0x7c] ss:$20 sps:$4 sm:$0xff]  }
  0x21   :  { %v2419_v33 = vld [vmem:[%s3707_s1 + $0x2cc] ss:$16 sps:$4 sm:$0xff]   ;;  %v2432_v49 = vld [vmem:[%s3707_s1 + $0x320] ss:$16 sps:$4 sm:$0xff]  }
  0x23   :  { %1095 = vmatpush1.bf16.msra.mxu0 %v2331_v35  ;;  %1314 = vmatpush1.bf16.msra.mxu1 %v2332_v36  ;;  %v2414_v35 = vld [vmem:[%s3707_s1 + $0x2c0] ss:$16 sps:$4 sm:$0xff]   ;;  %v2417_v36 = vld [vmem:[%s3707_s1 + $0x2c8] ss:$16 sps:$4 sm:$0xff]  }
  0x24   :  { %1096 = vmatprep.subr.bf16.mxu0 %v2333_v37  ;;  %1315 = vmatprep.subr.bf16.mxu1 %v2335_v38  ;;  %v2470_v37 = vld [vmem:[%s3709_s0 + $0x78] ss:$20 sps:$4 sm:$0xff]   ;;  %v2422_v38 = vld [vmem:[%s3707_s1 + $0x2e4] ss:$16 sps:$4 sm:$0xff]  }
  0x27   :  { %1097 = vmatpush1.bf16.msra.mxu0 %v2337_v39  ;;  %1316 = vmatpush1.bf16.msra.mxu1 %v2338_v40  ;;  %v2425_v39 = vld [vmem:[%s3707_s1 + $0x2ec] ss:$16 sps:$4 sm:$0xff]   ;;  %v2420_v40 = vld [vmem:[%s3707_s1 + $0x2e0] ss:$16 sps:$4 sm:$0xff]  }
  0x28   :  { %1098 = vmatprep.subr.bf16.mxu0 %v2339_v41  ;;  %1317 = vmatprep.subr.bf16.mxu1 %v2341_v42  ;;  %v2423_v41 = vld [vmem:[%s3707_s1 + $0x2e8] ss:$16 sps:$4 sm:$0xff]   ;;  %v2485_v42 = vld [vmem:[%s3709_s0 + $0xc] ss:$20 sps:$4 sm:$0xff]  }
  0x2b   :  { %1099 = vmatpush1.bf16.msra.mxu0 %v2343_v43  ;;  %1318 = vmatpush1.bf16.msra.mxu1 %v2344_v44  ;;  %v2428_v43 = vld [vmem:[%s3707_s1 + $0x304] ss:$16 sps:$4 sm:$0xff]   ;;  %v2431_v44 = vld [vmem:[%s3707_s1 + $0x30c] ss:$16 sps:$4 sm:$0xff]  }
  0x2c   :  { %1100 = vmatprep.subr.bf16.mxu0 %v2345_v45  ;;  %1319 = vmatprep.subr.bf16.mxu1 %v2347_v46  ;;  %v2426_v45 = vld [vmem:[%s3707_s1 + $0x300] ss:$16 sps:$4 sm:$0xff]   ;;  %v2429_v46 = vld [vmem:[%s3707_s1 + $0x308] ss:$16 sps:$4 sm:$0xff]  }
  0x2f   :  { %1101 = vmatpush1.bf16.msra.mxu0 %v2349_v47  ;;  %1320 = vmatpush1.bf16.msra.mxu1 %v2350_v48  ;;  %v2434_v47 = vld [vmem:[%s3707_s1 + $0x324] ss:$16 sps:$4 sm:$0xff]   ;;  %v2437_v48 = vld [vmem:[%s3707_s1 + $0x32c] ss:$16 sps:$4 sm:$0xff]  }
  0x30   :  { %1102 = vmatprep.subr.bf16.mxu0 %v2351_v50  ;;  %1321 = vmatprep.subr.bf16.mxu1 %v2353_v51  ;;  %v2435_v50 = vld [vmem:[%s3707_s1 + $0x328] ss:$16 sps:$4 sm:$0xff]   ;;  %v2443_v51 = vld [vmem:[%s3707_s1 + $0x344] ss:$16 sps:$4 sm:$0xff]  }
  0x33   :  { %1103 = vmatpush1.bf16.msra.mxu0 %v2355_v52  ;;  %1322 = vmatpush1.bf16.msra.mxu1 %v2356_v53  ;;  %v2446_v52 = vld [vmem:[%s3707_s1 + $0x34c] ss:$16 sps:$4 sm:$0xff]   ;;  %v2441_v53 = vld [vmem:[%s3707_s1 + $0x340] ss:$16 sps:$4 sm:$0xff]  }
  0x34   :  { %1104 = vmatprep.subr.bf16.mxu0 %v2357_v54  ;;  %1323 = vmatprep.subr.bf16.mxu1 %v2359_v55  ;;  %v2444_v54 = vld [vmem:[%s3707_s1 + $0x348] ss:$16 sps:$4 sm:$0xff]   ;;  %v2449_v55 = vld [vmem:[%s3707_s1 + $0x364] ss:$16 sps:$4 sm:$0xff]  }
  0x37   :  { %1105 = vmatpush1.bf16.msra.mxu0 %v2361_v56  ;;  %1324 = vmatpush1.bf16.msra.mxu1 %v2362_v57  ;;  %v2452_v56 = vld [vmem:[%s3707_s1 + $0x36c] ss:$16 sps:$4 sm:$0xff]   ;;  %v2447_v57 = vld [vmem:[%s3707_s1 + $0x360] ss:$16 sps:$4 sm:$0xff]  }
  0x38   :  { %1106 = vmatprep.subr.bf16.mxu0 %v2363_v58  ;;  %1325 = vmatprep.subr.bf16.mxu1 %v2365_v59  ;;  %v2450_v58 = vld [vmem:[%s3707_s1 + $0x368] ss:$16 sps:$4 sm:$0xff]   ;;  %v2458_v59 = vld [vmem:[%s3707_s1 + $0x384] ss:$16 sps:$4 sm:$0xff]  }
  0x3b   :  { %1107 = vmatpush1.bf16.msra.mxu0 %v2367_v60  ;;  %1326 = vmatpush1.bf16.msra.mxu1 %v2368_v61  ;;  %v2461_v60 = vld [vmem:[%s3707_s1 + $0x38c] ss:$16 sps:$4 sm:$0xff]   ;;  %v197_v61 = vld [vmem:[%s3710_s2] sm:$0xff] }
  0x3c   :  { %1108 = vmatprep.subr.bf16.mxu0 %v2369_v62  ;;  %1327 = vmatprep.subr.bf16.mxu1 %v2371_v63  ;;  %v199_v62 = vld [vmem:[%s3710_s2 + $0x10] sm:$0xff] }
  0x3d   :  { %207 = vperm.xlu0 %2277, %v197_v61   ;;  %v2456_v63 = vld [vmem:[%s3707_s1 + $0x380] ss:$16 sps:$4 sm:$0xff]   ;;  %217 = vperm.xlu1 %2278, %v199_v62  }
  0x3f   :  { %1109 = vmatpush1.bf16.msra.mxu0 %v2373_v0  ;;  %1328 = vmatpush1.bf16.msra.mxu1 %v2374_v1  ;;  %v2459_v0 = vld [vmem:[%s3707_s1 + $0x388] ss:$16 sps:$4 sm:$0xff]  }
  0x40   :  { %1151 = vmatprep.subr.bf16.mxu0 %v2380_v2  ;;  %1370 = vmatprep.subr.bf16.mxu1 %v2383_v3  ;;  %v198_v1 = vld [vmem:[%s3710_s2 + $0x8] sm:$0xff]  ;;  %v2464_v2 = vld [vmem:[%s3707_s1 + $0x3a4] ss:$16 sps:$4 sm:$0xff]  }
  0x41   :  { %v2467_v3 = vld [vmem:[%s3707_s1 + $0x3ac] ss:$16 sps:$4 sm:$0xff]   ;;  %212 = vperm.xlu0 %2277, %v198_v1  }
  0x42   :  { %1111 = vmatmul.mubr.bf16.vlgmr.msra.gmra.mrb[0].mxu0 %v2375_v4  ;;  %1330 = vmatmul.mubr.bf16.vlgmr.msra.gmra.mrb[0].mxu1 %v2375_v4  ;;  %v200_v4 = vld [vmem:[%s3710_s2 + $0x18] sm:$0xff] }
  0x43   :  { %1152 = vmatpush1.bf16.msra.mxu0 %v2378_v5  ;;  %1371 = vmatpush1.bf16.msra.mxu1 %v2381_v6  ;;  %v2462_v5 = vld [vmem:[%s3707_s1 + $0x3a0] ss:$16 sps:$4 sm:$0xff]   ;;  %v2465_v6 = vld [vmem:[%s3707_s1 + $0x3a8] ss:$16 sps:$4 sm:$0xff]  }
  0x44   :  { %1153 = vmatprep.subr.bf16.mxu0 %v2386_v7  ;;  %1372 = vmatprep.subr.bf16.mxu1 %v2389_v8  ;;  %v201_v7 = vld [vmem:[%s3710_s2 + $0x20] sm:$0xff] }
  0x45   :  { %1120 = vmatprep.mubr.bf16.mxu0 %v2438_v15  ;;  %1339 = vmatprep.mubr.bf16.mxu1 %v2438_v15  ;;  %v2473_v8 = vld [vmem:[%s3707_s1 + $0x3c4] ss:$16 sps:$4 sm:$0xff]   ;;  %v2482_v15 = vld [vmem:[%s3707_s1 + $0x3ec] ss:$16 sps:$4 sm:$0xff]  }
  0x46   :  { %222 = vperm.xlu1 %2278, %v200_v4   ;;  %227 = vperm.xlu0 %2277, %v201_v7  }
  0x47   :  { %1154 = vmatpush1.bf16.msra.mxu0 %v2384_v9  ;;  %1373 = vmatpush1.bf16.msra.mxu1 %v2387_v10  ;;  %v2476_v9 = vld [vmem:[%s3707_s1 + $0x3cc] ss:$16 sps:$4 sm:$0xff]  }
  0x48   :  { %1155 = vmatprep.subr.bf16.mxu0 %v2392_v11  ;;  %1374 = vmatprep.subr.bf16.mxu1 %v2395_v12  ;;  %v202_v10 = vld [vmem:[%s3710_s2 + $0x28] sm:$0xff]  ;;  %v2471_v11 = vld [vmem:[%s3707_s1 + $0x3c0] ss:$16 sps:$4 sm:$0xff]  }
  0x49   :  { %v2474_v12 = vld [vmem:[%s3707_s1 + $0x3c8] ss:$16 sps:$4 sm:$0xff]  }
  0x4a   :  { %1121 = vmatmul.mubr.bf16.gmra.mrb[4].mxu0 %v2440_v16  ;;  %1340 = vmatmul.mubr.bf16.gmra.mrb[4].mxu1 %v2440_v16  ;;  %v204_v16 = vld [vmem:[%s3710_s2 + $0x38] sm:$0xff] }
  0x4b   :  { %1156 = vmatpush1.bf16.msra.mxu0 %v2390_v13  ;;  %1375 = vmatpush1.bf16.msra.mxu1 %v2393_v14  ;;  %v203_v13 = vld [vmem:[%s3710_s2 + $0x30] sm:$0xff] }
  0x4c   :  { %1157 = vmatprep.subr.bf16.mxu0 %v2398_v17  ;;  %1376 = vmatprep.subr.bf16.mxu1 %v2401_v18  ;;  %v2479_v14 = vld [vmem:[%s3707_s1 + $0x3e4] ss:$16 sps:$4 sm:$0xff]   ;;  %v2477_v17 = vld [vmem:[%s3707_s1 + $0x3e0] ss:$16 sps:$4 sm:$0xff]   ;;  %v2480_v18 = vld [vmem:[%s3707_s1 + $0x3e8] ss:$16 sps:$4 sm:$0xff]  }
  0x4d   :  { %1130 = vmatprep.mubr.bf16.mxu0 %v2453_v24  ;;  %1349 = vmatprep.mubr.bf16.mxu1 %v2453_v24  ;;  %v2486_v24 = vld [vmem:[%s3707_s1 + $0x400] ss:$16 sps:$4 sm:$0xff]  }
  0x4e   :  { %232 = vperm.xlu1 %2278, %v202_v10   ;;  %237 = vperm.xlu0 %2277, %v203_v13  }
  0x4f   :  { %1158 = vmatpush1.bf16.msra.mxu0 %v2396_v19  ;;  %1377 = vmatpush1.bf16.msra.mxu1 %v2399_v20  ;;  %v1749_v19 = vld [vmem:[%s3711_s4 + $0x8] sm:$0xff]  ;;  %v2488_v20 = vld [vmem:[%s3707_s1 + $0x404] ss:$16 sps:$4 sm:$0xff]  }
  0x50   :  { %1159 = vmatprep.subr.bf16.mxu0 %v2404_v21  ;;  %1378 = vmatprep.subr.bf16.mxu1 %v2407_v22  ;;  %v2491_v21 = vld [vmem:[%s3707_s1 + $0x40c] ss:$16 sps:$4 sm:$0xff]  }
  0x51   :  { %v2483_v22 = vld [vmem:[%s3709_s0 + $0x8] ss:$20 sps:$4 sm:$0xff]  }
  0x52   :  { %1131 = vmatmul.mubr.bf16.gmra.mrb[8].mxu0 %v2455_v26  ;;  %1350 = vmatmul.mubr.bf16.gmra.mrb[8].mxu1 %v2455_v26  ;;  %v2492_v26 = vld [vmem:[%s3709_s0 + $0x34] ss:$20 sps:$4 sm:$0xff]  }
  0x53   :  { %1160 = vmatpush1.bf16.msra.mxu0 %v2402_v23  ;;  %1379 = vmatpush1.bf16.msra.mxu1 %v2405_v25  ;;  %v1748_v23 = vld [vmem:[%s3711_s4] sm:$0xff]  ;;  %v2489_v25 = vld [vmem:[%s3707_s1 + $0x408] ss:$16 sps:$4 sm:$0xff]  }
  0x54   :  { %1161 = vmatprep.subr.bf16.mxu0 %v2410_v27  ;;  %1380 = vmatprep.subr.bf16.mxu1 %v2413_v28  ;;  %v2497_v27 = vld [vmem:[%s3707_s1 + $0x424] ss:$16 sps:$4 sm:$0xff]   ;;  %v2500_v28 = vld [vmem:[%s3707_s1 + $0x42c] ss:$16 sps:$4 sm:$0xff]  }
  0x55   :  { %1140 = vmatprep.mubr.bf16.mxu0 %v2468_v32  ;;  %1359 = vmatprep.mubr.bf16.mxu1 %v2468_v32  ;;  %v1750_v32 = vld [vmem:[%s3711_s4 + $0x10] sm:$0xff] }
  0x56   :  { %242 = vperm.xlu1 %2278, %v204_v16   ;;  %1763 = vperm.xlu0 %2277, %v1749_v19  }
  0x57   :  { %1162 = vmatpush1.bf16.msra.mxu0 %v2408_v29  ;;  %1381 = vmatpush1.bf16.msra.mxu1 %v2411_v30  ;;  %v2495_v29 = vld [vmem:[%s3707_s1 + $0x420] ss:$16 sps:$4 sm:$0xff]   ;;  %v2498_v30 = vld [vmem:[%s3707_s1 + $0x428] ss:$16 sps:$4 sm:$0xff]  }
  0x58   :  { %1163 = vmatprep.subr.bf16.mxu0 %v2416_v31  ;;  %1382 = vmatprep.subr.bf16.mxu1 %v2419_v33  ;;  %v1752_v31 = vld [vmem:[%s3711_s4 + $0x20] sm:$0xff] }
  0x59   :  { %v2506_v33 = vld [vmem:[%s3707_s1 + $0x444] ss:$16 sps:$4 sm:$0xff]  }
  0x5a   :  { %1141 = vmatmul.mubr.bf16.gmra.mrb[12].mxu0 %v2470_v37  ;;  %1360 = vmatmul.mubr.bf16.gmra.mrb[12].mxu1 %v2470_v37  ;;  %v2501_v37 = vld [vmem:[%s3709_s0 + $0x5c] ss:$20 sps:$4 sm:$0xff]  }
  0x5b   :  { %1164 = vmatpush1.bf16.msra.mxu0 %v2414_v35  ;;  %1383 = vmatpush1.bf16.msra.mxu1 %v2417_v36  ;;  %v2509_v35 = vld [vmem:[%s3707_s1 + $0x44c] ss:$16 sps:$4 sm:$0xff]   ;;  %v2494_v36 = vld [vmem:[%s3709_s0 + $0x30] ss:$20 sps:$4 sm:$0xff]  }
  0x5c   :  { %1165 = vmatprep.subr.bf16.mxu0 %v2422_v38  ;;  %1384 = vmatprep.subr.bf16.mxu1 %v2425_v39  ;;  %v2504_v38 = vld [vmem:[%s3707_s1 + $0x440] ss:$16 sps:$4 sm:$0xff]   ;;  %v2507_v39 = vld [vmem:[%s3707_s1 + $0x448] ss:$16 sps:$4 sm:$0xff]  }
  0x5d   :  { %1183 = vmatprep.mubr.bf16.mxu0 %v2485_v42  ;;  %1402 = vmatprep.mubr.bf16.mxu1 %v2485_v42  ;;  %v1754_v42 = vld [vmem:[%s3711_s4 + $0x30] sm:$0xff] }
  0x5e   :  { %1758 = vperm.xlu1 %2278, %v1748_v23   ;;  %1778 = vperm.xlu0 %2277, %v1752_v31  }
  0x5f   :  { %1166 = vmatpush1.bf16.msra.mxu0 %v2420_v40  ;;  %1385 = vmatpush1.bf16.msra.mxu1 %v2423_v41  ;;  %v2515_v40 = vld [vmem:[%s3707_s1 + $0x464] ss:$16 sps:$4 sm:$0xff]   ;;  %v2518_v41 = vld [vmem:[%s3707_s1 + $0x46c] ss:$16 sps:$4 sm:$0xff]  }
  0x60   :  { %1167 = vmatprep.subr.bf16.mxu0 %v2428_v43  ;;  %1386 = vmatprep.subr.bf16.mxu1 %v2431_v44  ;;  %v1751_v43 = vld [vmem:[%s3711_s4 + $0x18] sm:$0xff]  ;;  %v2513_v44 = vld [vmem:[%s3707_s1 + $0x460] ss:$16 sps:$4 sm:$0xff]  }
  0x62   :  { %1768 = vperm.xlu1 %2278, %v1750_v32   ;;  %1788 = vperm.xlu0 %2277, %v1754_v42  }
  0x63   :  { %1168 = vmatpush1.bf16.msra.mxu0 %v2426_v45  ;;  %1387 = vmatpush1.bf16.msra.mxu1 %v2429_v46  ;;  %v2516_v45 = vld [vmem:[%s3707_s1 + $0x468] ss:$16 sps:$4 sm:$0xff]  }
  0x64   :  { %1169 = vmatprep.subr.bf16.mxu0 %v2434_v47  ;;  %1388 = vmatprep.subr.bf16.mxu1 %v2437_v48  ;;  %v2503_v46 = vld [vmem:[%s3709_s0 + $0x58] ss:$20 sps:$4 sm:$0xff]   ;;  %v1828_v48 = vld [vmem:[%s3712_s5] sm:$0xff] }
  0x65   :  { %v2510_v47 = vld [vmem:[%s3709_s0 + $0x84] ss:$20 sps:$4 sm:$0xff]  }
  0x66   :  { %1773 = vperm.xlu1 %2278, %v1751_v43   ;;  %1838 = vperm.xlu0 %2277, %v1828_v48  }
  0x67   :  { %1170 = vmatpush1.bf16.msra.mxu0 %v2432_v49  ;;  %1389 = vmatpush1.bf16.msra.mxu1 %v2435_v50  ;;  %v1753_v49 = vld [vmem:[%s3711_s4 + $0x28] sm:$0xff]  ;;  %v1830_v50 = vld [vmem:[%s3712_s5 + $0x10] sm:$0xff] }
  0x68   :  { %1171 = vmatprep.subr.bf16.mxu0 %v2443_v51  ;;  %1390 = vmatprep.subr.bf16.mxu1 %v2446_v52  ;;  %v1755_v51 = vld [vmem:[%s3711_s4 + $0x38] sm:$0xff]  ;;  %v2512_v52 = vld [vmem:[%s3709_s0 + $0x80] ss:$20 sps:$4 sm:$0xff]  }
  0x6a   :  { %1783 = vperm.xlu1 %2278, %v1753_v49   ;;  %1848 = vperm.xlu0 %2277, %v1830_v50  }
  0x6b   :  { %1172 = vmatpush1.bf16.msra.mxu0 %v2441_v53  ;;  %1391 = vmatpush1.bf16.msra.mxu1 %v2444_v54  ;;  %v1832_v53 = vld [vmem:[%s3712_s5 + $0x20] sm:$0xff]  ;;  %v1829_v54 = vld [vmem:[%s3712_s5 + $0x8] sm:$0xff] }
  0x6c   :  { %1173 = vmatprep.subr.bf16.mxu0 %v2449_v55  ;;  %1392 = vmatprep.subr.bf16.mxu1 %v2452_v56  ;;  %v1831_v55 = vld [vmem:[%s3712_s5 + $0x18] sm:$0xff]  ;;  %v2519_v56 = vld [vmem:[%s3709_s0 + $0x10] ss:$20 sps:$4 sm:$0xff]  }
  0x6e   :  { %1793 = vperm.xlu1 %2278, %v1755_v51   ;;  %1858 = vperm.xlu0 %2277, %v1832_v53  }
  0x6f   :  { %1174 = vmatpush1.bf16.msra.mxu0 %v2447_v57  ;;  %1393 = vmatpush1.bf16.msra.mxu1 %v2450_v58  ;;  %v1833_v57 = vld [vmem:[%s3712_s5 + $0x28] sm:$0xff] }
  0x70   :  { %1175 = vmatprep.subr.bf16.mxu0 %v2458_v59  ;;  %1394 = vmatprep.subr.bf16.mxu1 %v2461_v60  ;;  %v2520_v58 = vld [vmem:[%s3709_s0 + $0x38] ss:$20 sps:$4 sm:$0xff]   ;;  %v2521_v59 = vld [vmem:[%s3709_s0 + $0x60] ss:$20 sps:$4 sm:$0xff]   ;;  %v2522_v60 = vld [vmem:[%s3709_s0 + $0x88] ss:$20 sps:$4 sm:$0xff]  }
  0x72   :  { %1843 = vperm.xlu1 %2278, %v1829_v54  }
  0x73   :  { %1176 = vmatpush1.bf16.msra.mxu0 %v2456_v63  ;;  %1395 = vmatpush1.bf16.msra.mxu1 %v2459_v0 }
  0x74   :  { %1177 = vmatprep.subr.bf16.mxu0 %v2464_v2  ;;  %1396 = vmatprep.subr.bf16.mxu1 %v2467_v3 }
  0x76   :  { %1853 = vperm.xlu1 %2278, %v1831_v55  }
  0x77   :  { %1178 = vmatpush1.bf16.msra.mxu0 %v2462_v5  ;;  %1397 = vmatpush1.bf16.msra.mxu1 %v2465_v6 }
  0x78   :  { %1179 = vmatprep.subr.bf16.mxu0 %v2473_v8  ;;  %1398 = vmatprep.subr.bf16.mxu1 %v2476_v9 }
  0x7a   :  { %1863 = vperm.xlu1 %2278, %v1833_v57  }
  0x7b   :  { %1180 = vmatpush1.bf16.msra.mxu0 %v2471_v11  ;;  %1399 = vmatpush1.bf16.msra.mxu1 %v2474_v12 }
  0x7c   :  { %1181 = vmatprep.subr.bf16.mxu0 %v2479_v14  ;;  %1400 = vmatprep.subr.bf16.mxu1 %v2482_v15 }
  0x7f   :  { %1182 = vmatpush1.bf16.msra.mxu0 %v2477_v17  ;;  %1401 = vmatpush1.bf16.msra.mxu1 %v2480_v18 }
  0x80   :  { %1224 = vmatprep.subr.bf16.mxu0 %v2488_v20  ;;  %1443 = vmatprep.subr.bf16.mxu1 %v2491_v21 }
  0x82   :  { %1184 = vmatmul.mubr.bf16.vlgmr.msra.gmra.mrb[0].mxu0 %v2483_v22  ;;  %1403 = vmatmul.mubr.bf16.vlgmr.msra.gmra.mrb[0].mxu1 %v2483_v22 }
  0x83   :  { %1225 = vmatpush1.bf16.msra.mxu0 %v2486_v24  ;;  %1444 = vmatpush1.bf16.msra.mxu1 %v2489_v25 }
  0x84   :  { %1193 = vmatprep.mubr.bf16.mxu0 %v2492_v26  ;;  %1412 = vmatprep.mubr.bf16.mxu1 %v2492_v26 }
  0x85   :  { %1226 = vmatprep.subr.bf16.mxu0 %v2497_v27  ;;  %1445 = vmatprep.subr.bf16.mxu1 %v2500_v28 }
  0x87   :  { %1227 = vmatpush1.bf16.msra.mxu0 %v2495_v29  ;;  %1446 = vmatpush1.bf16.msra.mxu1 %v2498_v30 }
  0x88   :  { %1228 = vmatprep.subr.bf16.mxu0 %v2506_v33  ;;  %1447 = vmatprep.subr.bf16.mxu1 %v2509_v35 }
  0x8a   :  { %1194 = vmatmul.mubr.bf16.gmra.mrb[4].mxu0 %v2494_v36  ;;  %1413 = vmatmul.mubr.bf16.gmra.mrb[4].mxu1 %v2494_v36 }
  0x8b   :  { %1203 = vmatprep.mubr.bf16.mxu0 %v2501_v37  ;;  %1422 = vmatprep.mubr.bf16.mxu1 %v2501_v37 }
  0x8c   :  { %1229 = vmatpush1.bf16.msra.mxu0 %v2504_v38  ;;  %1448 = vmatpush1.bf16.msra.mxu1 %v2507_v39 }
  0x8d   :  { %1230 = vmatprep.subr.bf16.mxu0 %v2515_v40  ;;  %1449 = vmatprep.subr.bf16.mxu1 %v2518_v41 }
  0x90   :  { %1231 = vmatpush1.bf16.msra.mxu0 %v2513_v44  ;;  %1450 = vmatpush1.bf16.msra.mxu1 %v2516_v45 }
  0x92   :  { %1204 = vmatmul.mubr.bf16.gmra.mrb[8].mxu0 %v2503_v46  ;;  %1423 = vmatmul.mubr.bf16.gmra.mrb[8].mxu1 %v2503_v46 }
  0x93   :  { %1213 = vmatprep.mubr.bf16.mxu0 %v2510_v47  ;;  %1432 = vmatprep.mubr.bf16.mxu1 %v2510_v47 }
  0x9a   :  { %1214 = vmatmul.mubr.bf16.gmra.mrb[12].mxu0 %v2512_v52  ;;  %1433 = vmatmul.mubr.bf16.gmra.mrb[12].mxu1 %v2512_v52 }
  0x9b   :  { %1256 = vmatprep.mubr.bf16.mxu0 %v2539_v34  ;;  %1475 = vmatprep.mubr.bf16.mxu1 %v2539_v34 }
  0xa2   :  { %2172 = vmatmul.mubr.msk.bf16.vlgmr.msra.gmra.mrb[0].mxu0 %vm1065_vm0, %v2519_v56  ;;  %2176 = vmatmul.mubr.msk.bf16.vlgmr.msra.gmra.mrb[0].mxu1 %vm1065_vm0, %v2519_v56 }
  0xa3   :  { %1266 = vmatprep.mubr.bf16.mxu0 %v2539_v34  ;;  %1485 = vmatprep.mubr.bf16.mxu1 %v2539_v34 }
  0xaa   :  { %2173 = vmatmul.mubr.msk.bf16.gmra.mrb[4].mxu0 %vm1065_vm0, %v2520_v58  ;;  %2177 = vmatmul.mubr.msk.bf16.gmra.mrb[4].mxu1 %vm1065_vm0, %v2520_v58 }
  0xab   :  { %1276 = vmatprep.mubr.bf16.mxu0 %v2539_v34  ;;  %1495 = vmatprep.mubr.bf16.mxu1 %v2539_v34 }
  0xb2   :  { %2174 = vmatmul.mubr.msk.bf16.gmra.mrb[8].mxu0 %vm1065_vm0, %v2521_v59  ;;  %2178 = vmatmul.mubr.msk.bf16.gmra.mrb[8].mxu1 %vm1065_vm0, %v2521_v59 }
  0xb3   :  { %1286 = vmatprep.mubr.bf16.mxu0 %v2539_v34  ;;  %1505 = vmatprep.mubr.bf16.mxu1 %v2539_v34 }
  0xba   :  { %2175 = vmatmul.mubr.msk.bf16.gmra.mrb[12].mxu0 %vm1065_vm0, %v2522_v60  ;;  %2179 = vmatmul.mubr.msk.bf16.gmra.mrb[12].mxu1 %vm1065_vm0, %v2522_v60 }
  0xbc   :  { %v208_v61 = vpop.permute.xlu0 %207  ;;  %v218_v62 = vpop.permute.xlu1 %217 }
  0xc0   :  { %v213_v63 = vpop.permute.xlu0 %212 }
  0xc5   :  { %v223_v21 = vpop.permute.xlu1 %222  ;;  %v228_v59 = vpop.permute.xlu0 %227 }
  0xcd   :  { %v233_v60 = vpop.permute.xlu1 %232 }
 0x175   :  { %v1258_v0 = vpop.f32.mrb[0].mxu0  ;;  %v1477_v1 = vpop.f32.mrb[0].mxu1 }
 0x176   :  { %v3156_v2 = vadd.f32 %v1258_v0, %v208_v61  ;;  %v1260_v3 = vpop.f32.mrb[1].mxu0  ;;  %v1479_v4 = vpop.f32.mrb[1].mxu1  ;;  %v3162_v8 = vadd.f32 %v1477_v1, %v208_v61 }
 0x177   :  { %v3158_v5 = vadd.f32 %v1260_v3, %v208_v61  ;;  %v1262_v34 = vpop.f32.mrb[2].mxu0  ;;  %v1481_v6 = vpop.f32.mrb[2].mxu1  ;;  %v3176_v17 = vadd.f32 %v1479_v4, %v208_v61 }
 0x178   :  { %v1564_v7 = vmul.f32 %v3156_v2, %v3156_v2  ;;  %v3164_v9 = vadd.f32 %v1262_v34, %v213_v63  ;;  %v1264_v10 = vpop.f32.mrb[3].mxu0  ;;  %v1483_v11 = vpop.f32.mrb[3].mxu1  ;;  %v3170_v14 = vadd.f32 %v1481_v6, %v213_v63  ;;  %v1566_v22 = vmul.f32 %v3162_v8, %v3162_v8 }
 0x179   :  { %v1516_v12 = vadd.f32 %v3158_v5, %v3156_v2  ;;  %v1565_v13 = vmul.f32 %v3158_v5, %v3158_v5  ;;  %v3172_v15 = vadd.f32 %v1264_v10, %v213_v63  ;;  %v3185_v23 = vadd.f32 %v1483_v11, %v213_v63 }
 0x17a   :  { %v1568_v16 = vmul.f32 %v3164_v9, %v3164_v9  ;;  %v1570_v25 = vmul.f32 %v3170_v14, %v3170_v14  ;;  %v1567_v50 = vmul.f32 %v3176_v17, %v3176_v17 }
 0x17b   :  { %v1521_v18 = vadd.f32 %v3172_v15, %v3164_v9  ;;  %v1569_v19 = vmul.f32 %v3172_v15, %v3172_v15  ;;  %v1517_v20 = vadd.f32 %v3162_v8, %v1516_v12  ;;  %v1596_v24 = vadd.f32 %v1565_v13, %v1564_v7 }
 0x17c   :  { %v1571_v46 = vmul.f32 %v3185_v23, %v3185_v23 }
 0x17d   :  { %v1268_v26 = vpop.f32.mrb[4].mxu0  ;;  %v1487_v27 = vpop.f32.mrb[4].mxu1  ;;  %v1518_v28 = vadd.f32 %v3176_v17, %v1517_v20  ;;  %v1522_v29 = vadd.f32 %v3170_v14, %v1521_v18  ;;  %v1601_v30 = vadd.f32 %v1569_v19, %v1568_v16  ;;  %v1597_v40 = vadd.f32 %v1596_v24, %v1566_v22 }
 0x17e   :  { %v3191_v31 = vadd.f32 %v1268_v26, %v218_v62  ;;  %v1270_v32 = vpop.f32.mrb[5].mxu0  ;;  %v1489_v33 = vpop.f32.mrb[5].mxu1  ;;  %v3198_v42 = vadd.f32 %v1487_v27, %v218_v62 }
 0x17f   :  { %v3193_v35 = vadd.f32 %v1270_v32, %v218_v62  ;;  %v1272_v36 = vpop.f32.mrb[6].mxu0  ;;  %v1491_v37 = vpop.f32.mrb[6].mxu1  ;;  %1519 = vadd.xlane.f32.xlu0 %v1518_v28  ;;  %v1523_v38 = vadd.f32 %v3185_v23, %v1522_v29  ;;  %v1602_v39 = vadd.f32 %v1601_v30, %v1570_v25  ;;  %v3212_v51 = vadd.f32 %v1489_v33, %v218_v62 }
 0x180   :  { %v1572_v41 = vmul.f32 %v3191_v31, %v3191_v31  ;;  %v3200_v43 = vadd.f32 %v1272_v36, %v223_v21  ;;  %v1274_v44 = vpop.f32.mrb[7].mxu0  ;;  %v1493_v45 = vpop.f32.mrb[7].mxu1  ;;  %v3216_v53 = vadd.f32 %v1491_v37, %v223_v21  ;;  %v1598_v57 = vadd.f32 %v1597_v40, %v1567_v50 }
 0x181   :  { %v1526_v47 = vadd.f32 %v3193_v35, %v3191_v31  ;;  %v1573_v48 = vmul.f32 %v3193_v35, %v3193_v35  ;;  %v3208_v49 = vadd.f32 %v1274_v44, %v223_v21  ;;  %1524 = vadd.xlane.f32.xlu1 %v1523_v38  ;;  %v1603_v54 = vadd.f32 %v1602_v39, %v1571_v46  ;;  %v243_v44 = vpop.permute.xlu1 %242 }
 0x182   :  { %v1576_v52 = vmul.f32 %v3200_v43, %v3200_v43  ;;  %v1574_v61 = vmul.f32 %v3198_v42, %v3198_v42  ;;  %v1578_v11 = vmul.f32 %v3216_v53, %v3216_v53  ;;  %v3231_v12 = vadd.f32 %v1493_v45, %v223_v21 }
 0x183   :  { %v1531_v55 = vadd.f32 %v3208_v49, %v3200_v43  ;;  %v1577_v56 = vmul.f32 %v3208_v49, %v3208_v49  ;;  %v1527_v58 = vadd.f32 %v3198_v42, %v1526_v47  ;;  %1604 = vadd.xlane.f32.xlu0 %v1603_v54  ;;  %v1606_v62 = vadd.f32 %v1573_v48, %v1572_v41  ;;  %v238_v41 = vpop.permute.xlu0 %237 }
 0x184   :  { %v1575_v26 = vmul.f32 %v3212_v51, %v3212_v51 }
 0x185   :  { %v1278_v63 = vpop.f32.mrb[8].mxu0  ;;  %v1497_v0 = vpop.f32.mrb[8].mxu1  ;;  %1599 = vadd.xlane.f32.xlu1 %v1598_v57  ;;  %v1528_v1 = vadd.f32 %v3212_v51, %v1527_v58  ;;  %v1607_v6 = vadd.f32 %v1606_v62, %v1574_v61  ;;  %v1532_v7 = vadd.f32 %v3216_v53, %v1531_v55  ;;  %v1611_v10 = vadd.f32 %v1577_v56, %v1576_v52 }
 0x186   :  { %v3226_v3 = vadd.f32 %v1278_v63, %v228_v59  ;;  %v1280_v4 = vpop.f32.mrb[9].mxu0  ;;  %v1499_v34 = vpop.f32.mrb[9].mxu1  ;;  %v3237_v20 = vadd.f32 %v1497_v0, %v228_v59  ;;  %v1579_v52 = vmul.f32 %v3231_v12, %v3231_v12 }
 0x187   :  { %v3233_v13 = vadd.f32 %v1280_v4, %v228_v59  ;;  %v1282_v16 = vpop.f32.mrb[10].mxu0  ;;  %v1501_v18 = vpop.f32.mrb[10].mxu1  ;;  %1529 = vadd.xlane.f32.xlu0 %v1528_v1  ;;  %v3247_v28 = vadd.f32 %v1499_v34, %v228_v59  ;;  %v1608_v32 = vadd.f32 %v1607_v6, %v1575_v26  ;;  %v1533_v33 = vadd.f32 %v3231_v12, %v1532_v7 }
 0x188   :  { %v1580_v19 = vmul.f32 %v3226_v3, %v3226_v3  ;;  %v3239_v22 = vadd.f32 %v1282_v16, %v233_v60  ;;  %v1284_v24 = vpop.f32.mrb[11].mxu0  ;;  %v1503_v25 = vpop.f32.mrb[11].mxu1  ;;  %v1612_v36 = vadd.f32 %v1611_v10, %v1578_v11  ;;  %v3254_v37 = vadd.f32 %v1501_v18, %v233_v60 }
 0x189   :  { %v1536_v21 = vadd.f32 %v3233_v13, %v3226_v3  ;;  %v1581_v27 = vmul.f32 %v3233_v13, %v3233_v13  ;;  %v3249_v29 = vadd.f32 %v1284_v24, %v233_v60  ;;  %v1582_v45 = vmul.f32 %v3237_v20, %v3237_v20  ;;  %1609 = vadd.xlane.f32.xlu1 %v1608_v32 }
 0x18a   :  { %v1584_v30 = vmul.f32 %v3239_v22, %v3239_v22  ;;  %v1586_v61 = vmul.f32 %v3254_v37, %v3254_v37  ;;  %v3271_v62 = vadd.f32 %v1503_v25, %v233_v60  ;;  %v1613_v4 = vadd.f32 %v1612_v36, %v1579_v52 }
 0x18b   :  { %v1541_v38 = vadd.f32 %v3249_v29, %v3239_v22  ;;  %v1585_v39 = vmul.f32 %v3249_v29, %v3249_v29  ;;  %v1537_v40 = vadd.f32 %v3237_v20, %v1536_v21  ;;  %1534 = vadd.xlane.f32.xlu0 %v1533_v33  ;;  %v1616_v46 = vadd.f32 %v1581_v27, %v1580_v19 }
 0x18c   :  { %v1583_v16 = vmul.f32 %v3247_v28, %v3247_v28 }
 0x18d   :  { %v1288_v47 = vpop.f32.mrb[12].mxu0  ;;  %v1507_v48 = vpop.f32.mrb[12].mxu1  ;;  %v1538_v50 = vadd.f32 %v3247_v28, %v1537_v40  ;;  %v1617_v57 = vadd.f32 %v1616_v46, %v1582_v45  ;;  %v1542_v58 = vadd.f32 %v3254_v37, %v1541_v38  ;;  %v1621_v59 = vadd.f32 %v1585_v39, %v1584_v30 }
 0x18e   :  { %v3266_v54 = vadd.f32 %v1288_v47, %v238_v41  ;;  %v1290_v55 = vpop.f32.mrb[13].mxu0  ;;  %v1509_v56 = vpop.f32.mrb[13].mxu1  ;;  %v3277_v6 = vadd.f32 %v1507_v48, %v238_v41 }
 0x18f   :  { %v3273_v63 = vadd.f32 %v1290_v55, %v238_v41  ;;  %v1292_v0 = vpop.f32.mrb[14].mxu0  ;;  %v1511_v1 = vpop.f32.mrb[14].mxu1  ;;  %1539 = vadd.xlane.f32.xlu1 %v1538_v50  ;;  %1614 = vadd.xlane.f32.xlu0 %v1613_v4  ;;  %v3289_v24 = vadd.f32 %v1509_v56, %v238_v41  ;;  %v1618_v25 = vadd.f32 %v1617_v57, %v1583_v16 }
 0x190   :  { %v1588_v34 = vmul.f32 %v3266_v54, %v3266_v54  ;;  %3724 = vst [vmem:[#allocation4_spill] sm:$0xff] %v3277_v6  ;;  %v3279_v7 = vadd.f32 %v1292_v0, %v243_v44  ;;  %v1294_v10 = vpop.f32.mrb[15].mxu0  ;;  %v1513_v11 = vpop.f32.mrb[15].mxu1  ;;  %v1543_v26 = vadd.f32 %v3271_v62, %v1542_v58  ;;  %v1622_v21 = vadd.f32 %v1621_v59, %v1586_v61  ;;  %v1835_v0 = vld [vmem:[%s3712_s5 + $0x38] sm:$0xff] }
 0x191   :  { %3723 = vst [vmem:[#allocation3_spill] sm:$0xff] %v3273_v63  ;;  %v1546_v60 = vadd.f32 %v3273_v63, %v3266_v54  ;;  %v1589_v18 = vmul.f32 %v3273_v63, %v3273_v63  ;;  %v3287_v19 = vadd.f32 %v1294_v10, %v243_v44  ;;  %3725 = vst [vmem:[#allocation5_spill] sm:$0xff] %v3289_v24 }
 0x192   :  { %v1592_v27 = vmul.f32 %v3279_v7, %v3279_v7  ;;  %v1590_v36 = vmul.f32 %v3277_v6, %v3277_v6  ;;  %v3301_v39 = vadd.f32 %v1511_v1, %v243_v44  ;;  %v1587_v41 = vmul.f32 %v3271_v62, %v3271_v62  ;;  %v3322_v1 = vpop.permute.xlu1 %1758 }
 0x193   :  { %v1551_v30 = vadd.f32 %v3287_v19, %v3279_v7  ;;  %v1593_v32 = vmul.f32 %v3287_v19, %v3287_v19  ;;  %v1547_v33 = vadd.f32 %v3277_v6, %v1546_v60  ;;  %1619 = vadd.xlane.f32.xlu1 %v1618_v25  ;;  %v1626_v38 = vadd.f32 %v1589_v18, %v1588_v34  ;;  %v3326_v34 = vpop.permute.xlu0 %1763 }
 0x194   :  { %1544 = vadd.xlane.f32.xlu0 %v1543_v26  ;;  %v1623_v46 = vadd.f32 %v1622_v21, %v1587_v41  ;;  %v1591_v50 = vmul.f32 %v3289_v24, %v3289_v24  ;;  %v1594_v52 = vmul.f32 %v3301_v39, %v3301_v39  ;;  %v3311_v55 = vadd.f32 %v1513_v11, %v243_v44  ;;  %v1834_v44 = vld [vmem:[%s3712_s5 + $0x30] sm:$0xff] }
 0x195   :  { %v1548_v40 = vadd.f32 %v3289_v24, %v1547_v33  ;;  %v1627_v45 = vadd.f32 %v1626_v38, %v1590_v36  ;;  %v1552_v47 = vadd.f32 %v3301_v39, %v1551_v30  ;;  %v1631_v48 = vadd.f32 %v1593_v32, %v1592_v27 }
 0x196   :  { %v1595_v59 = vmul.f32 %v3311_v55, %v3311_v55  ;;  %v3324_v4 = vpop.permute.xlu1 %1768 }
 0x197   :  { %1549 = vadd.xlane.f32.xlu1 %v1548_v40  ;;  %v1628_v56 = vadd.f32 %v1627_v45, %v1591_v50  ;;  %v1553_v57 = vadd.f32 %v3311_v55, %v1552_v47  ;;  %v1632_v58 = vadd.f32 %v1631_v48, %v1594_v52  ;;  %v3330_v11 = vpop.permute.xlu0 %1778 }
 0x198   :  { %1624 = vadd.xlane.f32.xlu0 %v1623_v46 }
 0x199   :  { %v1633_v61 = vadd.f32 %v1632_v58, %v1595_v59 }
 0x19a   :  { %v3328_v10 = vpop.permute.xlu1 %1773 }
 0x19b   :  { %1629 = vadd.xlane.f32.xlu1 %v1628_v56  ;;  %v3334_v60 = vpop.permute.xlu0 %1788 }
 0x19c   :  { %1554 = vadd.xlane.f32.xlu0 %v1553_v57  ;;  %3727 = vst [vmem:[#allocation7_spill] sm:$0xff] %v3334_v60 }
 0x19e   :  { %v3332_v16 = vpop.permute.xlu1 %1783 }
 0x19f   :  { %3726 = vst [vmem:[#allocation6_spill] sm:$0xff] %v3332_v16  ;;  %v3338_v25 = vpop.permute.xlu0 %1838 }
 0x1a0   :  { %1634 = vadd.xlane.f32.xlu0 %v1633_v61 }
 0x1a2   :  { %v3336_v18 = vpop.permute.xlu1 %1793 }
 0x1a3   :  { %3728 = vst [vmem:[#allocation8_spill] sm:$0xff] %v3336_v18  ;;  %v3342_v21 = vpop.permute.xlu0 %1848 }
 0x1a6   :  { %v3340_v26 = vpop.permute.xlu1 %1843 }
 0x1a7   :  { %v3346_v30 = vpop.permute.xlu0 %1858 }
 0x1a8   :  { %3729 = vst [vmem:[#allocation9_spill] sm:$0xff] %v3346_v30 }
 0x1aa   :  { %v3344_v27 = vpop.permute.xlu1 %1853 }
 0x1ac   :  { %1873 = vperm.xlu1 %2278, %v1835_v0  }
 0x1ae   :  { %v3348_v32 = vpop.permute.xlu1 %1863 }
 0x1af   :  { %3730 = vst [vmem:[#allocation10_spill] sm:$0xff] %v3348_v32 }
 0x1b6   :  { %1868 = vperm.xlu0 %2277, %v1834_v44  }
 0x20c   :  { %v1520_v33 = vpop.xlane.xlu0 %1519 }
 0x20d   :  { %v3350_v38 = vmul.f32 0.001953125, %v1520_v33 }
 0x20e   :  { %v1525_v36 = vpop.xlane.xlu1 %1524 }
 0x20f   :  { %v1557_v40 = vmul.f32 0.001953125, %v1525_v36  ;;  %v1644_v50 = vmul.f32 %v3350_v38, %v3350_v38 }
 0x210   :  { %v1605_v41 = vpop.xlane.xlu0 %1604 }
 0x211   :  { %v1645_v46 = vmul.f32 %v1557_v40, %v1557_v40  ;;  %v1637_v47 = vmul.f32 0.001953125, %v1605_v41 }
 0x212   :  { %v1600_v45 = vpop.xlane.xlu1 %1599 }
 0x213   :  { %v1636_v48 = vmul.f32 0.001953125, %v1600_v45  ;;  %v1653_v52 = vsub.f32 %v1637_v47, %v1645_v46 }
 0x214   :  { %v1530_v57 = vpop.xlane.xlu0 %1529 }
 0x215   :  { %v1652_v56 = vsub.f32 %v1636_v48, %v1644_v50  ;;  %v3354_v58 = vmul.f32 0.001953125, %v1530_v57  ;;  %v1661_v59 = vmax.f32 %v1653_v52, 0.0 }
 0x216   :  { %v1610_v33 = vpop.xlane.xlu1 %1609 }
 0x217   :  { %v1660_v61 = vmax.f32 %v1652_v56, 0.0  ;;  %v1701_v0 = vadd.f32 1e-05, %v1661_v59  ;;  %v1646_v36 = vmul.f32 %v3354_v58, %v3354_v58  ;;  %v1638_v60 = vmul.f32 0.001953125, %v1610_v33 }
 0x218   :  { %v1535_v18 = vpop.xlane.xlu0 %1534  ;;  %v1668_v59 = vsub.f32 %v3156_v2, %v3350_v38  ;;  %v1672_v33 = vsub.f32 %v3164_v9, %v1557_v40  ;;  %v1674_v2 = vsub.f32 %v3170_v14, %v1557_v40  ;;  %v1677_v9 = vsub.f32 %v3193_v35, %v3354_v58 }
 0x219   :  { %v1700_v44 = vadd.f32 1e-05, %v1660_v61  ;;  %2523 = vrsqrt.f32 %v1701_v0  ;;  %v3358_v41 = vmul.f32 0.001953125, %v1535_v18  ;;  %v1654_v45 = vsub.f32 %v1638_v60, %v1646_v36 }
 0x21a   :  { %v1669_v61 = vsub.f32 %v3158_v5, %v3350_v38  ;;  %v1670_v18 = vsub.f32 %v3162_v8, %v3350_v38  ;;  %v1675_v8 = vsub.f32 %v3185_v23, %v1557_v40  ;;  %v1679_v14 = vsub.f32 %v3212_v51, %v3354_v58  ;;  %v1912_v51 = vld [vmem:[%s3713_s6 + $0x20] sm:$0xff] }
 0x21b   :  { %2525 = vrsqrt.f32 %v1700_v44  ;;  %v1662_v47 = vmax.f32 %v1654_v45, 0.0  ;;  %v1647_v52 = vmul.f32 %v3358_v41, %v3358_v41  ;;  %v1671_v44 = vsub.f32 %v3176_v17, %v3350_v38 }
 0x21c   :  { %v1540_v46 = vpop.xlane.xlu1 %1539  ;;  %v1615_v48 = vpop.xlane.xlu0 %1614  ;;  %v1676_v17 = vsub.f32 %v3191_v31, %v3354_v58  ;;  %v1678_v38 = vsub.f32 %v3198_v42, %v3354_v58  ;;  %v1913_v58 = vld [vmem:[%s3713_s6 + $0x28] sm:$0xff] }
 0x21d   :  { %v3360_v50 = vmul.f32 0.001953125, %v1540_v46  ;;  %v1639_v56 = vmul.f32 0.001953125, %v1615_v48  ;;  %v1702_v57 = vadd.f32 1e-05, %v1662_v47  ;;  %v1673_v46 = vsub.f32 %v3172_v15, %v1557_v40 }
 0x21f   :  { %v1655_v60 = vsub.f32 %v1639_v56, %v1647_v52  ;;  %2527 = vrsqrt.f32 %v1702_v57  ;;  %v3379_v5 = vmul.f32 %v3360_v50, %v3360_v50 }
 0x220   :  { %v1620_v0 = vpop.xlane.xlu1 %1619 }
 0x221   :  { %v3373_v36 = vmul.f32 0.001953125, %v1620_v0  ;;  %v1545_v45 = vpop.xlane.xlu0 %1544  ;;  %v1663_v47 = vmax.f32 %v1655_v60, 0.0 }
 0x222   :  { %v3392_v56 = vmul.f32 0.001953125, %v1545_v45 }
 0x223   :  { %v2524_v48 = vpop.eup %2523  ;;  %v1703_v15 = vadd.f32 1e-05, %v1663_v47  ;;  %v1656_v52 = vsub.f32 %v3373_v36, %v3379_v5 }
 0x224   :  { %v1720_v40 = vmul.f32 %v2524_v48, %v1672_v33  ;;  %v1721_v57 = vmul.f32 %v2524_v48, %v1673_v46  ;;  %v1722_v31 = vmul.f32 %v2524_v48, %v1674_v2  ;;  %v1723_v60 = vmul.f32 %v2524_v48, %v1675_v8 }
 0x225   :  { %v2526_v23 = vpop.eup %2525  ;;  %v3394_v42 = vpop.xlane.xlu0 %1624  ;;  %2529 = vrsqrt.f32 %v1703_v15  ;;  %v1918_v15 = vld [vmem:[%s3713_s6 + $0x50] sm:$0xff] }
 0x226   :  { %v1716_v0 = vmul.f32 %v2526_v23, %v1668_v59  ;;  %v1717_v35 = vmul.f32 %v2526_v23, %v1669_v61  ;;  %v1718_v32 = vmul.f32 %v2526_v23, %v1670_v18  ;;  %v1719_v16 = vmul.f32 %v2526_v23, %v1671_v44  ;;  %v1914_v61 = vld [vmem:[%s3713_s6 + $0x30] sm:$0xff]  ;;  %v1915_v18 = vld [vmem:[%s3713_s6 + $0x38] sm:$0xff]  ;;  %v1908_v44 = vld [vmem:[%s3713_s6] sm:$0xff] }
 0x227   :  { %v1800_v36 = vmul.f32 %v3326_v34, %v1720_v40  ;;  %v1801_v33 = vmul.f32 %v3326_v34, %v1721_v57  ;;  %v1802_v45 = vmul.f32 %v3326_v34, %v1722_v31  ;;  %v1803_v59 = vmul.f32 %v3326_v34, %v1723_v60  ;;  %v1909_v40 = vld [vmem:[%s3713_s6 + $0x8] sm:$0xff]  ;;  %v1910_v57 = vld [vmem:[%s3713_s6 + $0x10] sm:$0xff] }
 0x228   :  { %v1796_v46 = vmul.f32 %v3322_v1, %v1716_v0  ;;  %v1797_v2 = vmul.f32 %v3322_v1, %v1717_v35  ;;  %v1798_v47 = vmul.f32 %v3322_v1, %v1718_v32  ;;  %v1799_v34 = vmul.f32 %v3322_v1, %v1719_v16  ;;  %v1911_v1 = vld [vmem:[%s3713_s6 + $0x18] sm:$0xff]  ;;  %v1550_v16 = vpop.xlane.xlu1 %1549 }
 0x229   :  { %v1880_v5 = vadd.f32 %v3340_v26, %v1800_v36  ;;  %v1881_v8 = vadd.f32 %v3340_v26, %v1801_v33  ;;  %v1882_v48 = vadd.f32 %v3340_v26, %v1802_v45  ;;  %v1883_v23 = vadd.f32 %v3340_v26, %v1803_v59  ;;  %v2528_v0 = vpop.eup %2527  ;;  %v1555_v63 = vpop.xlane.xlu0 %1554 }
 0x22a   :  { %v1876_v32 = vadd.f32 %v3338_v25, %v1796_v46  ;;  %v1877_v31 = vadd.f32 %v3338_v25, %v1797_v2  ;;  %v1878_v60 = vadd.f32 %v3338_v25, %v1798_v47  ;;  %v1879_v26 = vadd.f32 %v3338_v25, %v1799_v34 }
 0x22b   :  { %v1944_v35 = vadd.f32 %v1912_v51, %v1880_v5  ;;  %v1945_v36 = vadd.f32 %v1913_v58, %v1881_v8  ;;  %v1946_v33 = vadd.f32 %v1914_v61, %v1882_v48  ;;  %v1947_v45 = vadd.f32 %v1915_v18, %v1883_v23 }
 0x22c   :  { %v1940_v59 = vadd.f32 %v1908_v44, %v1876_v32  ;;  %v1941_v30 = vadd.f32 %v1909_v40, %v1877_v31  ;;  %v1942_v24 = vadd.f32 %v1910_v57, %v1878_v60  ;;  %v1943_v6 = vadd.f32 %v1911_v1, %v1879_v26 }
 0x22d   :  { %1976 = vst [vmem:[%s3714_s7 + $0x20] sm:$0xff] %v1944_v35  ;;  %1977 = vst [vmem:[%s3714_s7 + $0x28] sm:$0xff] %v1945_v36  ;;  %v1724_v25 = vmul.f32 %v2528_v0, %v1676_v17  ;;  %v1725_v51 = vmul.f32 %v2528_v0, %v1677_v9  ;;  %v1726_v58 = vmul.f32 %v2528_v0, %v1678_v38  ;;  %v1664_v9 = vmax.f32 %v1656_v52, 0.0  ;;  %v1919_v52 = vld [vmem:[%s3713_s6 + $0x58] sm:$0xff]  ;;  %v1635_v1 = vpop.xlane.xlu0 %1634 }
 0x22e   :  { %1978 = vst [vmem:[%s3714_s7 + $0x30] sm:$0xff] %v1946_v33  ;;  %1979 = vst [vmem:[%s3714_s7 + $0x38] sm:$0xff] %v1947_v45  ;;  %v1727_v61 = vmul.f32 %v2528_v0, %v1679_v14  ;;  %v1680_v17 = vsub.f32 %v3200_v43, %v3358_v41  ;;  %v3462_v38 = vmul.f32 0.001953125, %v1550_v16  ;;  %v1916_v14 = vld [vmem:[%s3713_s6 + $0x40] sm:$0xff]  ;;  %v1917_v43 = vld [vmem:[%s3713_s6 + $0x48] sm:$0xff]  ;;  %v1649_v2 = vmul.f32 %v3392_v56, %v3392_v56 }
 0x22f   :  { %1972 = vst [vmem:[%s3714_s7] sm:$0xff] %v1940_v59  ;;  %1973 = vst [vmem:[%s3714_s7 + $0x8] sm:$0xff] %v1941_v30  ;;  %v1804_v30 = vmul.f32 %v3324_v4, %v1724_v25  ;;  %v1805_v18 = vmul.f32 %v3324_v4, %v1725_v51  ;;  %v1704_v46 = vadd.f32 1e-05, %v1664_v9  ;;  %v1641_v47 = vmul.f32 0.001953125, %v3394_v42  ;;  %v2530_v51 = vpop.eup %2529 }
 0x230   :  { %1974 = vst [vmem:[%s3714_s7 + $0x10] sm:$0xff] %v1942_v24  ;;  %1975 = vst [vmem:[%s3714_s7 + $0x18] sm:$0xff] %v1943_v6  ;;  %v1806_v24 = vmul.f32 %v3324_v4, %v1726_v58  ;;  %v1807_v44 = vmul.f32 %v3324_v4, %v1727_v61  ;;  %v1630_v6 = vpop.xlane.xlu1 %1629  ;;  %v1650_v4 = vmul.f32 %v3462_v38, %v3462_v38  ;;  %v3489_v57 = vmul.f32 0.001953125, %v1555_v63 }
 0x231   :  { %v1884_v34 = vadd.f32 %v3342_v21, %v1804_v30  ;;  %v1885_v5 = vadd.f32 %v3342_v21, %v1805_v18  ;;  %2531 = vrsqrt.f32 %v1704_v46  ;;  %v1657_v23 = vsub.f32 %v1641_v47, %v1649_v2 }
 0x232   :  { %v1886_v8 = vadd.f32 %v3342_v21, %v1806_v24  ;;  %v1887_v48 = vadd.f32 %v3342_v21, %v1807_v44  ;;  %v1642_v40 = vmul.f32 0.001953125, %v1630_v6  ;;  %v1681_v60 = vsub.f32 %v3208_v49, %v3358_v41  ;;  %v1921_v24 = vld [vmem:[%s3713_s6 + $0x68] sm:$0xff]  ;;  %v1922_v44 = vld [vmem:[%s3713_s6 + $0x70] sm:$0xff]  ;;  %v1923_v6 = vld [vmem:[%s3713_s6 + $0x78] sm:$0xff] }
 0x233   :  { %v1948_v16 = vadd.f32 %v1916_v14, %v1884_v34  ;;  %v1949_v32 = vadd.f32 %v1917_v43, %v1885_v5  ;;  %v1682_v26 = vsub.f32 %v3216_v53, %v3358_v41  ;;  %v1665_v0 = vmax.f32 %v1657_v23, 0.0 }
 0x234   :  { %v1950_v42 = vadd.f32 %v1918_v15, %v1886_v8  ;;  %v1951_v31 = vadd.f32 %v1919_v52, %v1887_v48  ;;  %v1658_v35 = vsub.f32 %v1642_v40, %v1650_v4  ;;  %v1683_v49 = vsub.f32 %v3231_v12, %v3358_v41 }
 0x235   :  { %1980 = vst [vmem:[%s3714_s7 + $0x40] sm:$0xff] %v1948_v16  ;;  %1981 = vst [vmem:[%s3714_s7 + $0x48] sm:$0xff] %v1949_v32  ;;  %v1684_v53 = vsub.f32 %v3226_v3, %v3360_v50  ;;  %v1651_v63 = vmul.f32 %v3489_v57, %v3489_v57  ;;  %v1643_v21 = vmul.f32 0.001953125, %v1635_v1  ;;  %v1685_v36 = vsub.f32 %v3233_v13, %v3360_v50 }
 0x236   :  { %1982 = vst [vmem:[%s3714_s7 + $0x50] sm:$0xff] %v1950_v42  ;;  %1983 = vst [vmem:[%s3714_s7 + $0x58] sm:$0xff] %v1951_v31  ;;  %v1686_v33 = vsub.f32 %v3237_v20, %v3360_v50  ;;  %v1705_v45 = vadd.f32 1e-05, %v1665_v0  ;;  %v1666_v59 = vmax.f32 %v1658_v35, 0.0  ;;  %v1687_v25 = vsub.f32 %v3247_v28, %v3360_v50  ;;  %v3731_v0 = vld [vmem:[#allocation3_spill] sm:$0xff] }
 0x237   :  { %v1688_v12 = vsub.f32 %v3239_v22, %v3392_v56  ;;  %v1689_v3 = vsub.f32 %v3249_v29, %v3392_v56  ;;  %v1659_v41 = vsub.f32 %v1643_v21, %v1651_v63  ;;  %v1690_v58 = vsub.f32 %v3254_v37, %v3392_v56  ;;  %v1920_v37 = vld [vmem:[%s3713_s6 + $0x60] sm:$0xff]  ;;  %v3733_v63 = vld [vmem:[#allocation5_spill] sm:$0xff] }
 0x238   :  { %v1691_v13 = vsub.f32 %v3271_v62, %v3392_v56  ;;  %2533 = vrsqrt.f32 %v1705_v45  ;;  %v1706_v20 = vadd.f32 1e-05, %v1666_v59  ;;  %v1728_v61 = vmul.f32 %v2530_v51, %v1680_v17 }
 0x239   :  { %v1729_v9 = vmul.f32 %v2530_v51, %v1681_v60  ;;  %v1730_v14 = vmul.f32 %v2530_v51, %v1682_v26  ;;  %v1731_v28 = vmul.f32 %v2530_v51, %v1683_v49  ;;  %v1696_v22 = vsub.f32 %v3279_v7, %v3489_v57  ;;  %v1926_v60 = vld [vmem:[%s3713_s6 + $0x90] sm:$0xff]  ;;  %v1927_v26 = vld [vmem:[%s3713_s6 + $0x98] sm:$0xff]  ;;  %v3732_v49 = vld [vmem:[#allocation4_spill] sm:$0xff] }
 0x23a   :  { %2535 = vrsqrt.f32 %v1706_v20  ;;  %v1697_v29 = vsub.f32 %v3287_v19, %v3489_v57  ;;  %v1667_v50 = vmax.f32 %v1659_v41, 0.0  ;;  %v1808_v62 = vmul.f32 %v3328_v10, %v1728_v61  ;;  %v1936_v7 = vld [vmem:[%s3713_s6 + $0xe0] sm:$0xff] }
 0x23b   :  { %v1809_v56 = vmul.f32 %v3328_v10, %v1729_v9  ;;  %v1810_v17 = vmul.f32 %v3328_v10, %v1730_v14  ;;  %v1811_v30 = vmul.f32 %v3328_v10, %v1731_v28  ;;  %v2532_v18 = vpop.eup %2531  ;;  %v1698_v43 = vsub.f32 %v3301_v39, %v3489_v57 }
 0x23c   :  { %v1699_v15 = vsub.f32 %v3311_v55, %v3489_v57  ;;  %v1707_v10 = vadd.f32 1e-05, %v1667_v50  ;;  %v1692_v52 = vsub.f32 %v3266_v54, %v3462_v38  ;;  %v1888_v46 = vadd.f32 %v3344_v27, %v1808_v62  ;;  %v1924_v54 = vld [vmem:[%s3713_s6 + $0x80] sm:$0xff]  ;;  %v1937_v55 = vld [vmem:[%s3713_s6 + $0xe8] sm:$0xff]  ;;  %v1938_v57 = vld [vmem:[%s3713_s6 + $0xf0] sm:$0xff] }
 0x23d   :  { %v1889_v2 = vadd.f32 %v3344_v27, %v1809_v56  ;;  %v1890_v47 = vadd.f32 %v3344_v27, %v1810_v17  ;;  %v1891_v4 = vadd.f32 %v3344_v27, %v1811_v30  ;;  %v1732_v34 = vmul.f32 %v2532_v18, %v1684_v53  ;;  %v3735_v56 = vld [vmem:[#allocation6_spill] sm:$0xff] }
 0x23e   :  { %v1733_v5 = vmul.f32 %v2532_v18, %v1685_v36  ;;  %v1734_v8 = vmul.f32 %v2532_v18, %v1686_v33  ;;  %v1735_v48 = vmul.f32 %v2532_v18, %v1687_v25  ;;  %v1952_v23 = vadd.f32 %v1920_v37, %v1888_v46  ;;  %v3734_v33 = vld [vmem:[#allocation9_spill] sm:$0xff]  ;;  %v3736_v46 = vld [vmem:[#allocation10_spill] sm:$0xff] }
 0x23f   :  { %v1953_v40 = vadd.f32 %v1921_v24, %v1889_v2  ;;  %v1954_v1 = vadd.f32 %v1922_v44, %v1890_v47  ;;  %v1955_v16 = vadd.f32 %v1923_v6, %v1891_v4  ;;  %v1812_v32 = vmul.f32 %v3330_v11, %v1732_v34 }
 0x240   :  { %v1813_v42 = vmul.f32 %v3330_v11, %v1733_v5  ;;  %v1814_v31 = vmul.f32 %v3330_v11, %v1734_v8  ;;  %v1815_v27 = vmul.f32 %v3330_v11, %v1735_v48  ;;  %1984 = vst [vmem:[%s3714_s7 + $0x60] sm:$0xff] %v1952_v23  ;;  %v1925_v11 = vld [vmem:[%s3713_s6 + $0x88] sm:$0xff]  ;;  %2537 = vrsqrt.f32 %v1707_v10  ;;  %v3737_v5 = vld [vmem:[#allocation7_spill] sm:$0xff] }
 0x241   :  { %1985 = vst [vmem:[%s3714_s7 + $0x68] sm:$0xff] %v1953_v40  ;;  %1986 = vst [vmem:[%s3714_s7 + $0x70] sm:$0xff] %v1954_v1  ;;  %v1693_v35 = vsub.f32 %v3731_v0, %v3462_v38  ;;  %v1694_v53 = vsub.f32 %v3732_v49, %v3462_v38  ;;  %v1695_v21 = vsub.f32 %v3733_v63, %v3462_v38  ;;  %v1928_v38 = vld [vmem:[%s3713_s6 + $0xa0] sm:$0xff] }
 0x242   :  { %1987 = vst [vmem:[%s3714_s7 + $0x78] sm:$0xff] %v1955_v16  ;;  %v2534_v36 = vpop.eup %2533  ;;  %v1892_v45 = vadd.f32 %v3734_v33, %v1812_v32  ;;  %v1893_v59 = vadd.f32 %v3734_v33, %v1813_v42  ;;  %v1894_v25 = vadd.f32 %v3734_v33, %v1814_v31  ;;  %v1895_v41 = vadd.f32 %v3734_v33, %v1815_v27  ;;  %v1932_v32 = vld [vmem:[%s3713_s6 + $0xc0] sm:$0xff]  ;;  %v1869_v42 = vpop.permute.xlu0 %1868  ;;  %v1933_v31 = vld [vmem:[%s3713_s6 + $0xc8] sm:$0xff]  ;;  %v1934_v27 = vld [vmem:[%s3713_s6 + $0xd0] sm:$0xff] }
 0x243   :  { %v1736_v51 = vmul.f32 %v2534_v36, %v1688_v12  ;;  %v1737_v20 = vmul.f32 %v2534_v36, %v1689_v3  ;;  %v1738_v61 = vmul.f32 %v2534_v36, %v1690_v58  ;;  %v1739_v9 = vmul.f32 %v2534_v36, %v1691_v13  ;;  %v1929_v3 = vld [vmem:[%s3713_s6 + $0xa8] sm:$0xff]  ;;  %v1930_v58 = vld [vmem:[%s3713_s6 + $0xb0] sm:$0xff]  ;;  %v1931_v13 = vld [vmem:[%s3713_s6 + $0xb8] sm:$0xff] }
 0x244   :  { %v2536_v14 = vpop.eup %2535  ;;  %v1956_v28 = vadd.f32 %v1924_v54, %v1892_v45  ;;  %v1957_v50 = vadd.f32 %v1925_v11, %v1893_v59  ;;  %v1958_v37 = vadd.f32 %v1926_v60, %v1894_v25  ;;  %v1959_v62 = vadd.f32 %v1927_v26, %v1895_v41  ;;  %v1935_v11 = vld [vmem:[%s3713_s6 + $0xd8] sm:$0xff] }
 0x245   :  { %v1816_v17 = vmul.f32 %v3735_v56, %v1736_v51  ;;  %v1817_v30 = vmul.f32 %v3735_v56, %v1737_v20  ;;  %v1818_v18 = vmul.f32 %v3735_v56, %v1738_v61  ;;  %v1819_v12 = vmul.f32 %v3735_v56, %v1739_v9 }
 0x246   :  { %1988 = vst [vmem:[%s3714_s7 + $0x80] sm:$0xff] %v1956_v28  ;;  %1989 = vst [vmem:[%s3714_s7 + $0x88] sm:$0xff] %v1957_v50  ;;  %v1740_v24 = vmul.f32 %v2536_v14, %v1692_v52  ;;  %v1741_v44 = vmul.f32 %v2536_v14, %v1693_v35  ;;  %v1742_v6 = vmul.f32 %v2536_v14, %v1694_v53 }
 0x247   :  { %1990 = vst [vmem:[%s3714_s7 + $0x90] sm:$0xff] %v1958_v37  ;;  %1991 = vst [vmem:[%s3714_s7 + $0x98] sm:$0xff] %v1959_v62  ;;  %v1743_v10 = vmul.f32 %v2536_v14, %v1695_v21  ;;  %v1896_v2 = vadd.f32 %v3736_v46, %v1816_v17  ;;  %v1897_v47 = vadd.f32 %v3736_v46, %v1817_v30 }
 0x248   :  { %v1898_v4 = vadd.f32 %v3736_v46, %v1818_v18  ;;  %v1899_v34 = vadd.f32 %v3736_v46, %v1819_v12  ;;  %v1820_v8 = vmul.f32 %v3737_v5, %v1740_v24  ;;  %v1821_v48 = vmul.f32 %v3737_v5, %v1741_v44 }
 0x249   :  { %v1822_v23 = vmul.f32 %v3737_v5, %v1742_v6  ;;  %v1823_v40 = vmul.f32 %v3737_v5, %v1743_v10  ;;  %v1960_v52 = vadd.f32 %v1928_v38, %v1896_v2  ;;  %v1961_v1 = vadd.f32 %v1929_v3, %v1897_v47 }
 0x24a   :  { %v1962_v16 = vadd.f32 %v1930_v58, %v1898_v4  ;;  %v1963_v54 = vadd.f32 %v1931_v13, %v1899_v34  ;;  %v1900_v60 = vadd.f32 %v1869_v42, %v1820_v8  ;;  %v1901_v26 = vadd.f32 %v1869_v42, %v1821_v48  ;;  %v2538_v49 = vpop.eup %2537 }
 0x24b   :  { %v1902_v0 = vadd.f32 %v1869_v42, %v1822_v23  ;;  %v1903_v35 = vadd.f32 %v1869_v42, %v1823_v40  ;;  %1992 = vst [vmem:[%s3714_s7 + $0xa0] sm:$0xff] %v1960_v52  ;;  %1993 = vst [vmem:[%s3714_s7 + $0xa8] sm:$0xff] %v1961_v1  ;;  %v1744_v53 = vmul.f32 %v2538_v49, %v1696_v22  ;;  %v3738_v22 = vld [vmem:[#allocation8_spill] sm:$0xff] }
 0x24c   :  { %1994 = vst [vmem:[%s3714_s7 + $0xb0] sm:$0xff] %v1962_v16  ;;  %1995 = vst [vmem:[%s3714_s7 + $0xb8] sm:$0xff] %v1963_v54  ;;  %v1745_v63 = vmul.f32 %v2538_v49, %v1697_v29  ;;  %v1746_v21 = vmul.f32 %v2538_v49, %v1698_v43  ;;  %v1747_v36 = vmul.f32 %v2538_v49, %v1699_v15  ;;  %v1874_v43 = vpop.permute.xlu1 %1873  ;;  %v1939_v15 = vld [vmem:[%s3713_s6 + $0xf8] sm:$0xff] }
 0x24d   :  { %v1964_v33 = vadd.f32 %v1932_v32, %v1900_v60  ;;  %v1965_v45 = vadd.f32 %v1933_v31, %v1901_v26  ;;  %v1966_v59 = vadd.f32 %v1934_v27, %v1902_v0  ;;  %v1967_v25 = vadd.f32 %v1935_v11, %v1903_v35 }
 0x24e   :  { %v1824_v41 = vmul.f32 %v3738_v22, %v1744_v53  ;;  %v1825_v19 = vmul.f32 %v3738_v22, %v1745_v63  ;;  %v1826_v29 = vmul.f32 %v3738_v22, %v1746_v21  ;;  %v1827_v39 = vmul.f32 %v3738_v22, %v1747_v36 }
 0x24f   :  { %1996 = vst [vmem:[%s3714_s7 + $0xc0] sm:$0xff] %v1964_v33  ;;  %1997 = vst [vmem:[%s3714_s7 + $0xc8] sm:$0xff] %v1965_v45 }
 0x250   :  { %1998 = vst [vmem:[%s3714_s7 + $0xd0] sm:$0xff] %v1966_v59  ;;  %1999 = vst [vmem:[%s3714_s7 + $0xd8] sm:$0xff] %v1967_v25  ;;  %v1904_v51 = vadd.f32 %v1874_v43, %v1824_v41  ;;  %v1905_v20 = vadd.f32 %v1874_v43, %v1825_v19  ;;  %v1906_v61 = vadd.f32 %v1874_v43, %v1826_v29 }
 0x251   :  { %v1907_v9 = vadd.f32 %v1874_v43, %v1827_v39 }
 0x252   :  { %v1968_v14 = vadd.f32 %v1936_v7, %v1904_v51  ;;  %v1969_v28 = vadd.f32 %v1937_v55, %v1905_v20  ;;  %v1970_v50 = vadd.f32 %v1938_v57, %v1906_v61 }
 0x253   :  { %v1971_v37 = vadd.f32 %v1939_v15, %v1907_v9 }
 0x254   :  { %2000 = vst [vmem:[%s3714_s7 + $0xe0] sm:$0xff] %v1968_v14  ;;  %2001 = vst [vmem:[%s3714_s7 + $0xe8] sm:$0xff] %v1969_v28 }
 0x255   :  { %2002 = vst [vmem:[%s3714_s7 + $0xf0] sm:$0xff] %v1970_v50  ;;  %2003 = vst [vmem:[%s3714_s7 + $0xf8] sm:$0xff] %v1971_v37 }

// kernel: csnet_forward.26
= control target key start
LH: loop header
LB: loop body
LE: loop exit
PB: predicated region body
PF: predicated region fallthrough
CT: control target
= control target key end

     0   :  { %v2232_v34 = vmov 0   ;;  %vm1059_vm0 = vcmask 523264   ;;  %s3047_s1 = inlined_call_operand.vmem [shape: bf16[576,512], index: 1, kind: input, shape index: {}]   ;;  %s3048_s0 = inlined_call_operand.vmem [shape: bf16[64,576], index: 0, kind: input, shape index: {}]   ;;  %s3049_s3 = inlined_call_operand.<no memory space> [shape: f32[1,1], index: 3, kind: input, shape index: {}]   ;;  %s3050_s2 = inlined_call_operand.vmem [shape: f32[64,1], index: 2, kind: input, shape index: {}]   ;;  %s3051_s4 = inlined_call_operand.vmem [shape: f32[64,512], index: 4, kind: input, shape index: {}]   ;;  %s3052_s5 = inlined_call_operand.vmem [shape: f32[64,512], index: 5, kind: output, shape index: {}]  }
   0x1   :  { %v1988_v0 = vld [vmem:[%s3047_s1 + $0x4] ss:$16 sps:$4 sm:$0xff]   ;;  %v1990_v1 = vld [vmem:[%s3047_s1 + $0xc] ss:$16 sps:$4 sm:$0xff]   ;;  %v1992_v2 = vld [vmem:[%s3047_s1] ss:$16 sps:$4 sm:$0xff]   ;;  %1986 = vset.pattern.permute.xlu0 %v2232_v34  ;;  %1987 = vset.pattern.permute.xlu1 %v2232_v34 }
   0x2   :  { %1072 = vmatprep.subr.bf16.mxu0 %v1988_v0  ;;  %v1993_v3 = vld [vmem:[%s3047_s1 + $0x8] ss:$16 sps:$4 sm:$0xff]   ;;  %1291 = vmatprep.subr.bf16.mxu1 %v1990_v1  ;;  %v1994_v4 = vld [vmem:[%s3047_s1 + $0x24] ss:$16 sps:$4 sm:$0xff]   ;;  %v1996_v5 = vld [vmem:[%s3047_s1 + $0x2c] ss:$16 sps:$4 sm:$0xff]  }
   0x3   :  { %1073 = vmatpush1.bf16.msra.mxu0 %v1992_v2  ;;  %1292 = vmatpush1.bf16.msra.mxu1 %v1993_v3  ;;  %v1998_v6 = vld [vmem:[%s3047_s1 + $0x20] ss:$16 sps:$4 sm:$0xff]   ;;  %v1999_v7 = vld [vmem:[%s3047_s1 + $0x28] ss:$16 sps:$4 sm:$0xff]   ;;  %v2000_v8 = vld [vmem:[%s3047_s1 + $0x44] ss:$16 sps:$4 sm:$0xff]   ;;  %v10_v3 = vstv %s3049_s3 }
   0x4   :  { %1074 = vmatprep.subr.bf16.mxu0 %v1994_v4  ;;  %1293 = vmatprep.subr.bf16.mxu1 %v1996_v5  ;;  %v2002_v9 = vld [vmem:[%s3047_s1 + $0x4c] ss:$16 sps:$4 sm:$0xff]   ;;  %v2004_v10 = vld [vmem:[%s3047_s1 + $0x40] ss:$16 sps:$4 sm:$0xff]   ;;  %v2005_v11 = vld [vmem:[%s3047_s1 + $0x48] ss:$16 sps:$4 sm:$0xff]  }
   0x5   :  { %v2006_v12 = vld [vmem:[%s3047_s1 + $0x64] ss:$16 sps:$4 sm:$0xff]   ;;  %v2008_v13 = vld [vmem:[%s3047_s1 + $0x6c] ss:$16 sps:$4 sm:$0xff]   ;;  %v2010_v14 = vld [vmem:[%s3047_s1 + $0x60] ss:$16 sps:$4 sm:$0xff]  }
   0x6   :  { %v2011_v15 = vld [vmem:[%s3047_s1 + $0x68] ss:$16 sps:$4 sm:$0xff]   ;;  %v2012_v16 = vld [vmem:[%s3047_s1 + $0x84] ss:$16 sps:$4 sm:$0xff]   ;;  %v2014_v17 = vld [vmem:[%s3047_s1 + $0x8c] ss:$16 sps:$4 sm:$0xff]  }
   0x7   :  { %1075 = vmatpush1.bf16.msra.mxu0 %v1998_v6  ;;  %1294 = vmatpush1.bf16.msra.mxu1 %v1999_v7  ;;  %v2016_v18 = vld [vmem:[%s3047_s1 + $0x80] ss:$16 sps:$4 sm:$0xff]   ;;  %v2017_v19 = vld [vmem:[%s3047_s1 + $0x88] ss:$16 sps:$4 sm:$0xff]   ;;  %v2018_v20 = vld [vmem:[%s3047_s1 + $0xa4] ss:$16 sps:$4 sm:$0xff]  }
   0x8   :  { %1076 = vmatprep.subr.bf16.mxu0 %v2000_v8  ;;  %1295 = vmatprep.subr.bf16.mxu1 %v2002_v9  ;;  %v2020_v21 = vld [vmem:[%s3047_s1 + $0xac] ss:$16 sps:$4 sm:$0xff]   ;;  %v2022_v22 = vld [vmem:[%s3047_s1 + $0xa0] ss:$16 sps:$4 sm:$0xff]   ;;  %v2023_v23 = vld [vmem:[%s3047_s1 + $0xa8] ss:$16 sps:$4 sm:$0xff]  }
   0x9   :  { %v2024_v24 = vld [vmem:[%s3047_s1 + $0xc4] ss:$16 sps:$4 sm:$0xff]   ;;  %v2026_v25 = vld [vmem:[%s3047_s1 + $0xcc] ss:$16 sps:$4 sm:$0xff]   ;;  %v2028_v26 = vld [vmem:[%s3047_s1 + $0xc0] ss:$16 sps:$4 sm:$0xff]  }
   0xa   :  { %v2029_v27 = vld [vmem:[%s3047_s1 + $0xc8] ss:$16 sps:$4 sm:$0xff]   ;;  %v2030_v28 = vld [vmem:[%s3047_s1 + $0xe4] ss:$16 sps:$4 sm:$0xff]   ;;  %v2032_v29 = vld [vmem:[%s3047_s1 + $0xec] ss:$16 sps:$4 sm:$0xff]  }
   0xb   :  { %1077 = vmatpush1.bf16.msra.mxu0 %v2004_v10  ;;  %1296 = vmatpush1.bf16.msra.mxu1 %v2005_v11  ;;  %v2034_v30 = vld [vmem:[%s3047_s1 + $0xe0] ss:$16 sps:$4 sm:$0xff]   ;;  %v2035_v31 = vld [vmem:[%s3047_s1 + $0xe8] ss:$16 sps:$4 sm:$0xff]   ;;  %v2036_v32 = vld [vmem:[%s3047_s1 + $0x104] ss:$16 sps:$4 sm:$0xff]  }
   0xc   :  { %1078 = vmatprep.subr.bf16.mxu0 %v2006_v12  ;;  %1297 = vmatprep.subr.bf16.mxu1 %v2008_v13  ;;  %v2038_v33 = vld [vmem:[%s3047_s1 + $0x10c] ss:$16 sps:$4 sm:$0xff]   ;;  %v2040_v35 = vld [vmem:[%s3047_s1 + $0x100] ss:$16 sps:$4 sm:$0xff]   ;;  %v2041_v36 = vld [vmem:[%s3047_s1 + $0x108] ss:$16 sps:$4 sm:$0xff]  }
   0xd   :  { %v2042_v37 = vld [vmem:[%s3047_s1 + $0x124] ss:$16 sps:$4 sm:$0xff]   ;;  %v2044_v38 = vld [vmem:[%s3047_s1 + $0x12c] ss:$16 sps:$4 sm:$0xff]   ;;  %v2046_v39 = vld [vmem:[%s3047_s1 + $0x120] ss:$16 sps:$4 sm:$0xff]  }
   0xe   :  { %v2047_v40 = vld [vmem:[%s3047_s1 + $0x128] ss:$16 sps:$4 sm:$0xff]   ;;  %v2048_v41 = vld [vmem:[%s3047_s1 + $0x144] ss:$16 sps:$4 sm:$0xff]   ;;  %v2050_v42 = vld [vmem:[%s3047_s1 + $0x14c] ss:$16 sps:$4 sm:$0xff]  }
   0xf   :  { %1079 = vmatpush1.bf16.msra.mxu0 %v2010_v14  ;;  %1298 = vmatpush1.bf16.msra.mxu1 %v2011_v15  ;;  %v2052_v43 = vld [vmem:[%s3047_s1 + $0x140] ss:$16 sps:$4 sm:$0xff]   ;;  %v2053_v44 = vld [vmem:[%s3047_s1 + $0x148] ss:$16 sps:$4 sm:$0xff]   ;;  %v2054_v45 = vld [vmem:[%s3047_s1 + $0x164] ss:$16 sps:$4 sm:$0xff]  }
  0x10   :  { %1080 = vmatprep.subr.bf16.mxu0 %v2012_v16  ;;  %1299 = vmatprep.subr.bf16.mxu1 %v2014_v17  ;;  %v2056_v46 = vld [vmem:[%s3047_s1 + $0x16c] ss:$16 sps:$4 sm:$0xff]   ;;  %v2058_v47 = vld [vmem:[%s3047_s1 + $0x160] ss:$16 sps:$4 sm:$0xff]   ;;  %v2059_v48 = vld [vmem:[%s3047_s1 + $0x168] ss:$16 sps:$4 sm:$0xff]  }
  0x11   :  { %v2086_v49 = vld [vmem:[%s3048_s0 + $0x4] ss:$20 sps:$4 sm:$0xff]   ;;  %v2062_v51 = vld [vmem:[%s3047_s1 + $0x18c] ss:$16 sps:$4 sm:$0xff]   ;;  %v2064_v52 = vld [vmem:[%s3047_s1 + $0x180] ss:$16 sps:$4 sm:$0xff]  }
  0x12   :  { %v2060_v50 = vld [vmem:[%s3047_s1 + $0x184] ss:$16 sps:$4 sm:$0xff]   ;;  %1104 = vmatprep.mubr.bf16.mxu0 %v2086_v49  ;;  %1323 = vmatprep.mubr.bf16.mxu1 %v2086_v49  ;;  %v2065_v53 = vld [vmem:[%s3047_s1 + $0x188] ss:$16 sps:$4 sm:$0xff]   ;;  %v2068_v55 = vld [vmem:[%s3047_s1 + $0x1ac] ss:$16 sps:$4 sm:$0xff]  }
  0x13   :  { %1081 = vmatpush1.bf16.msra.mxu0 %v2016_v18  ;;  %1300 = vmatpush1.bf16.msra.mxu1 %v2017_v19  ;;  %v2066_v54 = vld [vmem:[%s3047_s1 + $0x1a4] ss:$16 sps:$4 sm:$0xff]   ;;  %v2070_v56 = vld [vmem:[%s3047_s1 + $0x1a0] ss:$16 sps:$4 sm:$0xff]   ;;  %v2071_v57 = vld [vmem:[%s3047_s1 + $0x1a8] ss:$16 sps:$4 sm:$0xff]  }
  0x14   :  { %1082 = vmatprep.subr.bf16.mxu0 %v2018_v20  ;;  %1301 = vmatprep.subr.bf16.mxu1 %v2020_v21  ;;  %v2072_v58 = vld [vmem:[%s3047_s1 + $0x1c4] ss:$16 sps:$4 sm:$0xff]   ;;  %v2074_v59 = vld [vmem:[%s3047_s1 + $0x1cc] ss:$16 sps:$4 sm:$0xff]   ;;  %v2076_v60 = vld [vmem:[%s3047_s1 + $0x1c0] ss:$16 sps:$4 sm:$0xff]  }
  0x15   :  { %v2077_v61 = vld [vmem:[%s3047_s1 + $0x1c8] ss:$16 sps:$4 sm:$0xff]   ;;  %v2078_v62 = vld [vmem:[%s3047_s1 + $0x1e4] ss:$16 sps:$4 sm:$0xff]   ;;  %v2080_v63 = vld [vmem:[%s3047_s1 + $0x1ec] ss:$16 sps:$4 sm:$0xff]  }
  0x16   :  { %v2082_v0 = vld [vmem:[%s3047_s1 + $0x1e0] ss:$16 sps:$4 sm:$0xff]   ;;  %v2083_v1 = vld [vmem:[%s3047_s1 + $0x1e8] ss:$16 sps:$4 sm:$0xff]   ;;  %v2089_v2 = vld [vmem:[%s3047_s1 + $0x204] ss:$16 sps:$4 sm:$0xff]  }
  0x17   :  { %1083 = vmatpush1.bf16.msra.mxu0 %v2022_v22  ;;  %1302 = vmatpush1.bf16.msra.mxu1 %v2023_v23  ;;  %v2092_v4 = vld [vmem:[%s3047_s1 + $0x20c] ss:$16 sps:$4 sm:$0xff]   ;;  %11 = vst [vmem:[#allocation2] sm:$0x1] %v10_v3  ;;  %v2084_v5 = vld [vmem:[%s3048_s0] ss:$20 sps:$4 sm:$0xff]  }
  0x18   :  { %1084 = vmatprep.subr.bf16.mxu0 %v2024_v24  ;;  %1303 = vmatprep.subr.bf16.mxu1 %v2026_v25  ;;  %v2087_v6 = vld [vmem:[%s3047_s1 + $0x200] ss:$16 sps:$4 sm:$0xff]   ;;  %v2090_v7 = vld [vmem:[%s3047_s1 + $0x208] ss:$16 sps:$4 sm:$0xff]   ;;  %v2095_v8 = vld [vmem:[%s3047_s1 + $0x224] ss:$16 sps:$4 sm:$0xff]  }
  0x19   :  { %v2098_v9 = vld [vmem:[%s3047_s1 + $0x22c] ss:$16 sps:$4 sm:$0xff]   ;;  %v2093_v10 = vld [vmem:[%s3047_s1 + $0x220] ss:$16 sps:$4 sm:$0xff]   ;;  %v2096_v11 = vld [vmem:[%s3047_s1 + $0x228] ss:$16 sps:$4 sm:$0xff]  }
  0x1a   :  { %v2101_v12 = vld [vmem:[%s3047_s1 + $0x244] ss:$16 sps:$4 sm:$0xff]   ;;  %v2104_v13 = vld [vmem:[%s3047_s1 + $0x24c] ss:$16 sps:$4 sm:$0xff]   ;;  %v2099_v14 = vld [vmem:[%s3047_s1 + $0x240] ss:$16 sps:$4 sm:$0xff]  }
  0x1b   :  { %1085 = vmatpush1.bf16.msra.mxu0 %v2028_v26  ;;  %1304 = vmatpush1.bf16.msra.mxu1 %v2029_v27  ;;  %v2102_v15 = vld [vmem:[%s3047_s1 + $0x248] ss:$16 sps:$4 sm:$0xff]   ;;  %v2147_v16 = vld [vmem:[%s3048_s0 + $0x2c] ss:$20 sps:$4 sm:$0xff]   ;;  %v2107_v18 = vld [vmem:[%s3047_s1 + $0x264] ss:$16 sps:$4 sm:$0xff]  }
  0x1c   :  { %1086 = vmatprep.subr.bf16.mxu0 %v2030_v28  ;;  %1305 = vmatprep.subr.bf16.mxu1 %v2032_v29  ;;  %v2149_v17 = vld [vmem:[%s3048_s0 + $0x28] ss:$20 sps:$4 sm:$0xff]   ;;  %v2105_v20 = vld [vmem:[%s3047_s1 + $0x260] ss:$16 sps:$4 sm:$0xff]   ;;  %v2113_v22 = vld [vmem:[%s3047_s1 + $0x284] ss:$16 sps:$4 sm:$0xff]  }
  0x1d   :  { %v2110_v19 = vld [vmem:[%s3047_s1 + $0x26c] ss:$16 sps:$4 sm:$0xff]   ;;  %v2108_v21 = vld [vmem:[%s3047_s1 + $0x268] ss:$16 sps:$4 sm:$0xff]   ;;  %v2111_v24 = vld [vmem:[%s3047_s1 + $0x280] ss:$16 sps:$4 sm:$0xff]  }
  0x1e   :  { %v2116_v23 = vld [vmem:[%s3047_s1 + $0x28c] ss:$16 sps:$4 sm:$0xff]   ;;  %v2162_v25 = vld [vmem:[%s3048_s0 + $0x54] ss:$20 sps:$4 sm:$0xff]   ;;  %v2164_v27 = vld [vmem:[%s3048_s0 + $0x50] ss:$20 sps:$4 sm:$0xff]  }
  0x1f   :  { %1087 = vmatpush1.bf16.msra.mxu0 %v2034_v30  ;;  %1306 = vmatpush1.bf16.msra.mxu1 %v2035_v31  ;;  %v2114_v26 = vld [vmem:[%s3047_s1 + $0x288] ss:$16 sps:$4 sm:$0xff]   ;;  %v2119_v28 = vld [vmem:[%s3047_s1 + $0x2a4] ss:$16 sps:$4 sm:$0xff]   ;;  %v2122_v29 = vld [vmem:[%s3047_s1 + $0x2ac] ss:$16 sps:$4 sm:$0xff]  }
  0x20   :  { %1088 = vmatprep.subr.bf16.mxu0 %v2036_v32  ;;  %1307 = vmatprep.subr.bf16.mxu1 %v2038_v33  ;;  %v2117_v30 = vld [vmem:[%s3047_s1 + $0x2a0] ss:$16 sps:$4 sm:$0xff]   ;;  %v2120_v31 = vld [vmem:[%s3047_s1 + $0x2a8] ss:$16 sps:$4 sm:$0xff]   ;;  %v2125_v32 = vld [vmem:[%s3047_s1 + $0x2c4] ss:$16 sps:$4 sm:$0xff]  }
  0x21   :  { %v2177_v33 = vld [vmem:[%s3048_s0 + $0x7c] ss:$20 sps:$4 sm:$0xff]   ;;  %v2173_v3 = vld [vmem:[%s3047_s1 + $0x3a4] ss:$16 sps:$4 sm:$0xff]  }
  0x22   :  { %v2146_v49 = vld [vmem:[%s3047_s1 + $0x32c] ss:$16 sps:$4 sm:$0xff]  }
  0x23   :  { %1089 = vmatpush1.bf16.msra.mxu0 %v2040_v35  ;;  %1308 = vmatpush1.bf16.msra.mxu1 %v2041_v36  ;;  %v2128_v35 = vld [vmem:[%s3047_s1 + $0x2cc] ss:$16 sps:$4 sm:$0xff]   ;;  %v2123_v36 = vld [vmem:[%s3047_s1 + $0x2c0] ss:$16 sps:$4 sm:$0xff]  }
  0x24   :  { %1090 = vmatprep.subr.bf16.mxu0 %v2042_v37  ;;  %1309 = vmatprep.subr.bf16.mxu1 %v2044_v38  ;;  %v2126_v37 = vld [vmem:[%s3047_s1 + $0x2c8] ss:$16 sps:$4 sm:$0xff]  }
  0x25   :  { %v2179_v38 = vld [vmem:[%s3048_s0 + $0x78] ss:$20 sps:$4 sm:$0xff]  }
  0x27   :  { %1091 = vmatpush1.bf16.msra.mxu0 %v2046_v39  ;;  %1310 = vmatpush1.bf16.msra.mxu1 %v2047_v40  ;;  %v2131_v39 = vld [vmem:[%s3047_s1 + $0x2e4] ss:$16 sps:$4 sm:$0xff]   ;;  %v2134_v40 = vld [vmem:[%s3047_s1 + $0x2ec] ss:$16 sps:$4 sm:$0xff]  }
  0x28   :  { %1092 = vmatprep.subr.bf16.mxu0 %v2048_v41  ;;  %1311 = vmatprep.subr.bf16.mxu1 %v2050_v42  ;;  %v2129_v41 = vld [vmem:[%s3047_s1 + $0x2e0] ss:$16 sps:$4 sm:$0xff]   ;;  %v2132_v42 = vld [vmem:[%s3047_s1 + $0x2e8] ss:$16 sps:$4 sm:$0xff]  }
  0x2b   :  { %1093 = vmatpush1.bf16.msra.mxu0 %v2052_v43  ;;  %1312 = vmatpush1.bf16.msra.mxu1 %v2053_v44  ;;  %v2194_v43 = vld [vmem:[%s3048_s0 + $0xc] ss:$20 sps:$4 sm:$0xff]   ;;  %v2137_v44 = vld [vmem:[%s3047_s1 + $0x304] ss:$16 sps:$4 sm:$0xff]  }
  0x2c   :  { %1094 = vmatprep.subr.bf16.mxu0 %v2054_v45  ;;  %1313 = vmatprep.subr.bf16.mxu1 %v2056_v46  ;;  %v2140_v45 = vld [vmem:[%s3047_s1 + $0x30c] ss:$16 sps:$4 sm:$0xff]   ;;  %v2135_v46 = vld [vmem:[%s3047_s1 + $0x300] ss:$16 sps:$4 sm:$0xff]  }
  0x2f   :  { %1095 = vmatpush1.bf16.msra.mxu0 %v2058_v47  ;;  %1314 = vmatpush1.bf16.msra.mxu1 %v2059_v48  ;;  %v2138_v47 = vld [vmem:[%s3047_s1 + $0x308] ss:$16 sps:$4 sm:$0xff]   ;;  %v2143_v48 = vld [vmem:[%s3047_s1 + $0x324] ss:$16 sps:$4 sm:$0xff]  }
  0x30   :  { %1096 = vmatprep.subr.bf16.mxu0 %v2060_v50  ;;  %1315 = vmatprep.subr.bf16.mxu1 %v2062_v51  ;;  %v2141_v50 = vld [vmem:[%s3047_s1 + $0x320] ss:$16 sps:$4 sm:$0xff]   ;;  %v2144_v51 = vld [vmem:[%s3047_s1 + $0x328] ss:$16 sps:$4 sm:$0xff]  }
  0x33   :  { %1097 = vmatpush1.bf16.msra.mxu0 %v2064_v52  ;;  %1316 = vmatpush1.bf16.msra.mxu1 %v2065_v53  ;;  %v2152_v52 = vld [vmem:[%s3047_s1 + $0x344] ss:$16 sps:$4 sm:$0xff]   ;;  %v2155_v53 = vld [vmem:[%s3047_s1 + $0x34c] ss:$16 sps:$4 sm:$0xff]  }
  0x34   :  { %1098 = vmatprep.subr.bf16.mxu0 %v2066_v54  ;;  %1317 = vmatprep.subr.bf16.mxu1 %v2068_v55  ;;  %v2150_v54 = vld [vmem:[%s3047_s1 + $0x340] ss:$16 sps:$4 sm:$0xff]   ;;  %v2153_v55 = vld [vmem:[%s3047_s1 + $0x348] ss:$16 sps:$4 sm:$0xff]  }
  0x37   :  { %1099 = vmatpush1.bf16.msra.mxu0 %v2070_v56  ;;  %1318 = vmatpush1.bf16.msra.mxu1 %v2071_v57  ;;  %v2158_v56 = vld [vmem:[%s3047_s1 + $0x364] ss:$16 sps:$4 sm:$0xff]   ;;  %v2161_v57 = vld [vmem:[%s3047_s1 + $0x36c] ss:$16 sps:$4 sm:$0xff]  }
  0x38   :  { %1100 = vmatprep.subr.bf16.mxu0 %v2072_v58  ;;  %1319 = vmatprep.subr.bf16.mxu1 %v2074_v59  ;;  %v2156_v58 = vld [vmem:[%s3047_s1 + $0x360] ss:$16 sps:$4 sm:$0xff]   ;;  %v2159_v59 = vld [vmem:[%s3047_s1 + $0x368] ss:$16 sps:$4 sm:$0xff]  }
  0x3b   :  { %1101 = vmatpush1.bf16.msra.mxu0 %v2076_v60  ;;  %1320 = vmatpush1.bf16.msra.mxu1 %v2077_v61  ;;  %v2167_v60 = vld [vmem:[%s3047_s1 + $0x384] ss:$16 sps:$4 sm:$0xff]   ;;  %v2170_v61 = vld [vmem:[%s3047_s1 + $0x38c] ss:$16 sps:$4 sm:$0xff]  }
  0x3c   :  { %1102 = vmatprep.subr.bf16.mxu0 %v2078_v62  ;;  %1321 = vmatprep.subr.bf16.mxu1 %v2080_v63  ;;  %v191_v62 = vld [vmem:[%s3050_s2] sm:$0xff] }
  0x3d   :  { %v2165_v63 = vld [vmem:[%s3047_s1 + $0x380] ss:$16 sps:$4 sm:$0xff]   ;;  %201 = vperm.xlu0 %1986, %v191_v62  }
  0x3f   :  { %1103 = vmatpush1.bf16.msra.mxu0 %v2082_v0  ;;  %1322 = vmatpush1.bf16.msra.mxu1 %v2083_v1  ;;  %v2168_v0 = vld [vmem:[%s3047_s1 + $0x388] ss:$16 sps:$4 sm:$0xff]  }
  0x40   :  { %1145 = vmatprep.subr.bf16.mxu0 %v2089_v2  ;;  %1364 = vmatprep.subr.bf16.mxu1 %v2092_v4  ;;  %v192_v1 = vld [vmem:[%s3050_s2 + $0x8] sm:$0xff]  ;;  %v193_v2 = vld [vmem:[%s3050_s2 + $0x10] sm:$0xff] }
  0x41   :  { %v2176_v4 = vld [vmem:[%s3047_s1 + $0x3ac] ss:$16 sps:$4 sm:$0xff]   ;;  %211 = vperm.xlu1 %1987, %v193_v2   ;;  %206 = vperm.xlu0 %1986, %v192_v1  }
  0x42   :  { %1105 = vmatmul.mubr.bf16.vlgmr.msra.gmra.mrb[0].mxu0 %v2084_v5  ;;  %1324 = vmatmul.mubr.bf16.vlgmr.msra.gmra.mrb[0].mxu1 %v2084_v5  ;;  %v194_v5 = vld [vmem:[%s3050_s2 + $0x18] sm:$0xff] }
  0x43   :  { %1146 = vmatpush1.bf16.msra.mxu0 %v2087_v6  ;;  %1365 = vmatpush1.bf16.msra.mxu1 %v2090_v7  ;;  %v2171_v6 = vld [vmem:[%s3047_s1 + $0x3a0] ss:$16 sps:$4 sm:$0xff]   ;;  %v2174_v7 = vld [vmem:[%s3047_s1 + $0x3a8] ss:$16 sps:$4 sm:$0xff]  }
  0x44   :  { %1147 = vmatprep.subr.bf16.mxu0 %v2095_v8  ;;  %1366 = vmatprep.subr.bf16.mxu1 %v2098_v9  ;;  %v195_v8 = vld [vmem:[%s3050_s2 + $0x20] sm:$0xff] }
  0x45   :  { %1114 = vmatprep.mubr.bf16.mxu0 %v2147_v16  ;;  %1333 = vmatprep.mubr.bf16.mxu1 %v2147_v16  ;;  %v2182_v9 = vld [vmem:[%s3047_s1 + $0x3c4] ss:$16 sps:$4 sm:$0xff]   ;;  %v2191_v16 = vld [vmem:[%s3047_s1 + $0x3ec] ss:$16 sps:$4 sm:$0xff]  }
  0x46   :  { %216 = vperm.xlu1 %1987, %v194_v5   ;;  %221 = vperm.xlu0 %1986, %v195_v8   ;;  %v1617_v5 = vld [vmem:[%s3051_s4 + $0x8] sm:$0xff] }
  0x47   :  { %1148 = vmatpush1.bf16.msra.mxu0 %v2093_v10  ;;  %1367 = vmatpush1.bf16.msra.mxu1 %v2096_v11  ;;  %v2185_v10 = vld [vmem:[%s3047_s1 + $0x3cc] ss:$16 sps:$4 sm:$0xff]  }
  0x48   :  { %1149 = vmatprep.subr.bf16.mxu0 %v2101_v12  ;;  %1368 = vmatprep.subr.bf16.mxu1 %v2104_v13  ;;  %v196_v11 = vld [vmem:[%s3050_s2 + $0x28] sm:$0xff]  ;;  %v2180_v12 = vld [vmem:[%s3047_s1 + $0x3c0] ss:$16 sps:$4 sm:$0xff]  }
  0x49   :  { %v2183_v13 = vld [vmem:[%s3047_s1 + $0x3c8] ss:$16 sps:$4 sm:$0xff]  }
  0x4a   :  { %1115 = vmatmul.mubr.bf16.gmra.mrb[4].mxu0 %v2149_v17  ;;  %1334 = vmatmul.mubr.bf16.gmra.mrb[4].mxu1 %v2149_v17  ;;  %v198_v17 = vld [vmem:[%s3050_s2 + $0x38] sm:$0xff] }
  0x4b   :  { %1150 = vmatpush1.bf16.msra.mxu0 %v2099_v14  ;;  %1369 = vmatpush1.bf16.msra.mxu1 %v2102_v15  ;;  %v197_v14 = vld [vmem:[%s3050_s2 + $0x30] sm:$0xff] }
  0x4c   :  { %1151 = vmatprep.subr.bf16.mxu0 %v2107_v18  ;;  %1370 = vmatprep.subr.bf16.mxu1 %v2110_v19  ;;  %v2188_v15 = vld [vmem:[%s3047_s1 + $0x3e4] ss:$16 sps:$4 sm:$0xff]   ;;  %v2186_v18 = vld [vmem:[%s3047_s1 + $0x3e0] ss:$16 sps:$4 sm:$0xff]   ;;  %v2189_v19 = vld [vmem:[%s3047_s1 + $0x3e8] ss:$16 sps:$4 sm:$0xff]  }
  0x4d   :  { %1124 = vmatprep.mubr.bf16.mxu0 %v2162_v25  ;;  %1343 = vmatprep.mubr.bf16.mxu1 %v2162_v25  ;;  %v2198_v25 = vld [vmem:[%s3047_s1 + $0x408] ss:$16 sps:$4 sm:$0xff]  }
  0x4e   :  { %226 = vperm.xlu1 %1987, %v196_v11   ;;  %231 = vperm.xlu0 %1986, %v197_v14  }
  0x4f   :  { %1152 = vmatpush1.bf16.msra.mxu0 %v2105_v20  ;;  %1371 = vmatpush1.bf16.msra.mxu1 %v2108_v21  ;;  %v1888_v20 = vld [vmem:[#allocation2] ss:$0 sm:$0xff]  ;;  %v2197_v21 = vld [vmem:[%s3047_s1 + $0x404] ss:$16 sps:$4 sm:$0xff]  }
  0x50   :  { %1153 = vmatprep.subr.bf16.mxu0 %v2113_v22  ;;  %1372 = vmatprep.subr.bf16.mxu1 %v2116_v23  ;;  %v2200_v22 = vld [vmem:[%s3047_s1 + $0x40c] ss:$16 sps:$4 sm:$0xff]  }
  0x51   :  { %v2192_v23 = vld [vmem:[%s3048_s0 + $0x8] ss:$20 sps:$4 sm:$0xff]  }
  0x52   :  { %1125 = vmatmul.mubr.bf16.gmra.mrb[8].mxu0 %v2164_v27  ;;  %1344 = vmatmul.mubr.bf16.gmra.mrb[8].mxu1 %v2164_v27  ;;  %v2206_v27 = vld [vmem:[%s3047_s1 + $0x424] ss:$16 sps:$4 sm:$0xff]  }
  0x53   :  { %1154 = vmatpush1.bf16.msra.mxu0 %v2111_v24  ;;  %1373 = vmatpush1.bf16.msra.mxu1 %v2114_v26  ;;  %v2195_v24 = vld [vmem:[%s3047_s1 + $0x400] ss:$16 sps:$4 sm:$0xff]   ;;  %v2201_v26 = vld [vmem:[%s3048_s0 + $0x34] ss:$20 sps:$4 sm:$0xff]  }
  0x54   :  { %1155 = vmatprep.subr.bf16.mxu0 %v2119_v28  ;;  %1374 = vmatprep.subr.bf16.mxu1 %v2122_v29  ;;  %v2209_v28 = vld [vmem:[%s3047_s1 + $0x42c] ss:$16 sps:$4 sm:$0xff]   ;;  %v2204_v29 = vld [vmem:[%s3047_s1 + $0x420] ss:$16 sps:$4 sm:$0xff]  }
  0x55   :  { %1134 = vmatprep.mubr.bf16.mxu0 %v2177_v33  ;;  %1353 = vmatprep.mubr.bf16.mxu1 %v2177_v33  ;;  %v2203_v33 = vld [vmem:[%s3048_s0 + $0x30] ss:$20 sps:$4 sm:$0xff]  }
  0x56   :  { %236 = vperm.xlu1 %1987, %v198_v17   ;;  %1549 = vperm.xlu0 %1986, %v1888_v20   ;;  %v1620_v20 = vld [vmem:[%s3051_s4 + $0x20] sm:$0xff] }
  0x57   :  { %1156 = vmatpush1.bf16.msra.mxu0 %v2117_v30  ;;  %1375 = vmatpush1.bf16.msra.mxu1 %v2120_v31  ;;  %v2207_v30 = vld [vmem:[%s3047_s1 + $0x428] ss:$16 sps:$4 sm:$0xff]   ;;  %v2215_v31 = vld [vmem:[%s3047_s1 + $0x444] ss:$16 sps:$4 sm:$0xff]  }
  0x58   :  { %1157 = vmatprep.subr.bf16.mxu0 %v2125_v32  ;;  %1376 = vmatprep.subr.bf16.mxu1 %v2128_v35  ;;  %v2218_v32 = vld [vmem:[%s3047_s1 + $0x44c] ss:$16 sps:$4 sm:$0xff]  }
  0x59   :  { %v2210_v35 = vld [vmem:[%s3048_s0 + $0x5c] ss:$20 sps:$4 sm:$0xff]  }
  0x5a   :  { %1135 = vmatmul.mubr.bf16.gmra.mrb[12].mxu0 %v2179_v38  ;;  %1354 = vmatmul.mubr.bf16.gmra.mrb[12].mxu1 %v2179_v38  ;;  %v2224_v38 = vld [vmem:[%s3047_s1 + $0x464] ss:$16 sps:$4 sm:$0xff]  }
  0x5b   :  { %1158 = vmatpush1.bf16.msra.mxu0 %v2123_v36  ;;  %1377 = vmatpush1.bf16.msra.mxu1 %v2126_v37  ;;  %v2213_v36 = vld [vmem:[%s3047_s1 + $0x440] ss:$16 sps:$4 sm:$0xff]   ;;  %v2216_v37 = vld [vmem:[%s3047_s1 + $0x448] ss:$16 sps:$4 sm:$0xff]  }
  0x5c   :  { %1159 = vmatprep.subr.bf16.mxu0 %v2131_v39  ;;  %1378 = vmatprep.subr.bf16.mxu1 %v2134_v40  ;;  %v2227_v39 = vld [vmem:[%s3047_s1 + $0x46c] ss:$16 sps:$4 sm:$0xff]   ;;  %v2222_v40 = vld [vmem:[%s3047_s1 + $0x460] ss:$16 sps:$4 sm:$0xff]  }
  0x5d   :  { %1177 = vmatprep.mubr.bf16.mxu0 %v2194_v43  ;;  %1396 = vmatprep.mubr.bf16.mxu1 %v2194_v43  ;;  %v2219_v43 = vld [vmem:[%s3048_s0 + $0x84] ss:$20 sps:$4 sm:$0xff]  }
  0x5f   :  { %1160 = vmatpush1.bf16.msra.mxu0 %v2129_v41  ;;  %1379 = vmatpush1.bf16.msra.mxu1 %v2132_v42  ;;  %v2225_v41 = vld [vmem:[%s3047_s1 + $0x468] ss:$16 sps:$4 sm:$0xff]  }
  0x60   :  { %1161 = vmatprep.subr.bf16.mxu0 %v2137_v44  ;;  %1380 = vmatprep.subr.bf16.mxu1 %v2140_v45  ;;  %v2212_v42 = vld [vmem:[%s3048_s0 + $0x58] ss:$20 sps:$4 sm:$0xff]   ;;  %v2221_v44 = vld [vmem:[%s3048_s0 + $0x80] ss:$20 sps:$4 sm:$0xff]   ;;  %v2228_v45 = vld [vmem:[%s3048_s0 + $0x10] ss:$20 sps:$4 sm:$0xff]  }
  0x63   :  { %1162 = vmatpush1.bf16.msra.mxu0 %v2135_v46  ;;  %1381 = vmatpush1.bf16.msra.mxu1 %v2138_v47  ;;  %v2229_v46 = vld [vmem:[%s3048_s0 + $0x38] ss:$20 sps:$4 sm:$0xff]   ;;  %v2230_v47 = vld [vmem:[%s3048_s0 + $0x60] ss:$20 sps:$4 sm:$0xff]  }
  0x64   :  { %1163 = vmatprep.subr.bf16.mxu0 %v2143_v48  ;;  %1382 = vmatprep.subr.bf16.mxu1 %v2146_v49  ;;  %v2231_v48 = vld [vmem:[%s3048_s0 + $0x88] ss:$20 sps:$4 sm:$0xff]  }
  0x67   :  { %1164 = vmatpush1.bf16.msra.mxu0 %v2141_v50  ;;  %1383 = vmatpush1.bf16.msra.mxu1 %v2144_v51 }
  0x68   :  { %1165 = vmatprep.subr.bf16.mxu0 %v2152_v52  ;;  %1384 = vmatprep.subr.bf16.mxu1 %v2155_v53 }
  0x6b   :  { %1166 = vmatpush1.bf16.msra.mxu0 %v2150_v54  ;;  %1385 = vmatpush1.bf16.msra.mxu1 %v2153_v55 }
  0x6c   :  { %1167 = vmatprep.subr.bf16.mxu0 %v2158_v56  ;;  %1386 = vmatprep.subr.bf16.mxu1 %v2161_v57 }
  0x6f   :  { %1168 = vmatpush1.bf16.msra.mxu0 %v2156_v58  ;;  %1387 = vmatpush1.bf16.msra.mxu1 %v2159_v59 }
  0x70   :  { %1169 = vmatprep.subr.bf16.mxu0 %v2167_v60  ;;  %1388 = vmatprep.subr.bf16.mxu1 %v2170_v61 }
  0x73   :  { %1170 = vmatpush1.bf16.msra.mxu0 %v2165_v63  ;;  %1389 = vmatpush1.bf16.msra.mxu1 %v2168_v0  ;;  %v1616_v63 = vld [vmem:[%s3051_s4] sm:$0xff]  ;;  %v1618_v0 = vld [vmem:[%s3051_s4 + $0x10] sm:$0xff] }
  0x74   :  { %1171 = vmatprep.subr.bf16.mxu0 %v2173_v3  ;;  %1390 = vmatprep.subr.bf16.mxu1 %v2176_v4 }
  0x77   :  { %1172 = vmatpush1.bf16.msra.mxu0 %v2171_v6  ;;  %1391 = vmatpush1.bf16.msra.mxu1 %v2174_v7  ;;  %v1619_v6 = vld [vmem:[%s3051_s4 + $0x18] sm:$0xff] }
  0x78   :  { %1173 = vmatprep.subr.bf16.mxu0 %v2182_v9  ;;  %1392 = vmatprep.subr.bf16.mxu1 %v2185_v10 }
  0x7b   :  { %1174 = vmatpush1.bf16.msra.mxu0 %v2180_v12  ;;  %1393 = vmatpush1.bf16.msra.mxu1 %v2183_v13 }
  0x7c   :  { %1175 = vmatprep.subr.bf16.mxu0 %v2188_v15  ;;  %1394 = vmatprep.subr.bf16.mxu1 %v2191_v16 }
  0x7f   :  { %1176 = vmatpush1.bf16.msra.mxu0 %v2186_v18  ;;  %1395 = vmatpush1.bf16.msra.mxu1 %v2189_v19 }
  0x80   :  { %1218 = vmatprep.subr.bf16.mxu0 %v2197_v21  ;;  %1437 = vmatprep.subr.bf16.mxu1 %v2200_v22 }
  0x82   :  { %1178 = vmatmul.mubr.bf16.vlgmr.msra.gmra.mrb[0].mxu0 %v2192_v23  ;;  %1397 = vmatmul.mubr.bf16.vlgmr.msra.gmra.mrb[0].mxu1 %v2192_v23  ;;  %v1622_v23 = vld [vmem:[%s3051_s4 + $0x30] sm:$0xff] }
  0x83   :  { %1219 = vmatpush1.bf16.msra.mxu0 %v2195_v24  ;;  %1438 = vmatpush1.bf16.msra.mxu1 %v2198_v25 }
  0x84   :  { %1187 = vmatprep.mubr.bf16.mxu0 %v2201_v26  ;;  %1406 = vmatprep.mubr.bf16.mxu1 %v2201_v26 }
  0x85   :  { %1220 = vmatprep.subr.bf16.mxu0 %v2206_v27  ;;  %1439 = vmatprep.subr.bf16.mxu1 %v2209_v28 }
  0x87   :  { %1221 = vmatpush1.bf16.msra.mxu0 %v2204_v29  ;;  %1440 = vmatpush1.bf16.msra.mxu1 %v2207_v30 }
  0x88   :  { %1222 = vmatprep.subr.bf16.mxu0 %v2215_v31  ;;  %1441 = vmatprep.subr.bf16.mxu1 %v2218_v32 }
  0x8a   :  { %1188 = vmatmul.mubr.bf16.gmra.mrb[4].mxu0 %v2203_v33  ;;  %1407 = vmatmul.mubr.bf16.gmra.mrb[4].mxu1 %v2203_v33 }
  0x8b   :  { %1197 = vmatprep.mubr.bf16.mxu0 %v2210_v35  ;;  %1416 = vmatprep.mubr.bf16.mxu1 %v2210_v35 }
  0x8c   :  { %1223 = vmatpush1.bf16.msra.mxu0 %v2213_v36  ;;  %1442 = vmatpush1.bf16.msra.mxu1 %v2216_v37  ;;  %v1621_v37 = vld [vmem:[%s3051_s4 + $0x28] sm:$0xff] }
  0x8d   :  { %1224 = vmatprep.subr.bf16.mxu0 %v2224_v38  ;;  %1443 = vmatprep.subr.bf16.mxu1 %v2227_v39 }
  0x90   :  { %1225 = vmatpush1.bf16.msra.mxu0 %v2222_v40  ;;  %1444 = vmatpush1.bf16.msra.mxu1 %v2225_v41 }
  0x92   :  { %1198 = vmatmul.mubr.bf16.gmra.mrb[8].mxu0 %v2212_v42  ;;  %1417 = vmatmul.mubr.bf16.gmra.mrb[8].mxu1 %v2212_v42  ;;  %v1623_v42 = vld [vmem:[%s3051_s4 + $0x38] sm:$0xff] }
  0x93   :  { %1207 = vmatprep.mubr.bf16.mxu0 %v2219_v43  ;;  %1426 = vmatprep.mubr.bf16.mxu1 %v2219_v43 }
  0x9a   :  { %1208 = vmatmul.mubr.bf16.gmra.mrb[12].mxu0 %v2221_v44  ;;  %1427 = vmatmul.mubr.bf16.gmra.mrb[12].mxu1 %v2221_v44 }
  0x9b   :  { %1250 = vmatprep.mubr.bf16.mxu0 %v2232_v34  ;;  %1469 = vmatprep.mubr.bf16.mxu1 %v2232_v34 }
  0xa2   :  { %1880 = vmatmul.mubr.msk.bf16.vlgmr.msra.gmra.mrb[0].mxu0 %vm1059_vm0, %v2228_v45  ;;  %1884 = vmatmul.mubr.msk.bf16.vlgmr.msra.gmra.mrb[0].mxu1 %vm1059_vm0, %v2228_v45 }
  0xa3   :  { %1260 = vmatprep.mubr.bf16.mxu0 %v2232_v34  ;;  %1479 = vmatprep.mubr.bf16.mxu1 %v2232_v34 }
  0xaa   :  { %1881 = vmatmul.mubr.msk.bf16.gmra.mrb[4].mxu0 %vm1059_vm0, %v2229_v46  ;;  %1885 = vmatmul.mubr.msk.bf16.gmra.mrb[4].mxu1 %vm1059_vm0, %v2229_v46 }
  0xab   :  { %1270 = vmatprep.mubr.bf16.mxu0 %v2232_v34  ;;  %1489 = vmatprep.mubr.bf16.mxu1 %v2232_v34 }
  0xb2   :  { %1882 = vmatmul.mubr.msk.bf16.gmra.mrb[8].mxu0 %vm1059_vm0, %v2230_v47  ;;  %1886 = vmatmul.mubr.msk.bf16.gmra.mrb[8].mxu1 %vm1059_vm0, %v2230_v47  ;;  %v1624_v47 = vld [vmem:[%s3051_s4 + $0x40] sm:$0xff] }
  0xb3   :  { %1280 = vmatprep.mubr.bf16.mxu0 %v2232_v34  ;;  %1499 = vmatprep.mubr.bf16.mxu1 %v2232_v34 }
  0xba   :  { %1883 = vmatmul.mubr.msk.bf16.gmra.mrb[12].mxu0 %vm1059_vm0, %v2231_v48  ;;  %1887 = vmatmul.mubr.msk.bf16.gmra.mrb[12].mxu1 %vm1059_vm0, %v2231_v48 }
  0xbc   :  { %v202_v49 = vpop.permute.xlu0 %201 }
  0xc0   :  { %v207_v50 = vpop.permute.xlu0 %206  ;;  %v212_v21 = vpop.permute.xlu1 %211 }
  0xc5   :  { %v2800_v51 = vpop.permute.xlu0 %221 }
  0xcd   :  { %v2802_v52 = vpop.permute.xlu0 %231 }
  0xd5   :  { %v2804_v53 = vpop.permute.xlu0 %1549 }
 0x175   :  { %v1252_v54 = vpop.f32.mrb[0].mxu0  ;;  %v1471_v55 = vpop.f32.mrb[0].mxu1 }
 0x176   :  { %v1889_v56 = vadd.f32 %v1252_v54, %v202_v49  ;;  %v1905_v34 = vadd.f32 %v1471_v55, %v202_v49  ;;  %v1254_v57 = vpop.f32.mrb[1].mxu0  ;;  %v1473_v58 = vpop.f32.mrb[1].mxu1 }
 0x177   :  { %v1890_v59 = vadd.f32 %v1254_v57, %v202_v49  ;;  %v1906_v60 = vadd.f32 %v1473_v58, %v202_v49  ;;  %v1256_v61 = vpop.f32.mrb[2].mxu0  ;;  %v1475_v62 = vpop.f32.mrb[2].mxu1  ;;  %v1626_v49 = vld [vmem:[%s3051_s4 + $0x50] sm:$0xff] }
 0x178   :  { %vm1511_vm1 = vcmp.gt.f32.partialorder %v1889_v56, 0.0  ;;  %vm1513_vm2 = vcmp.gt.f32.partialorder %v1905_v34, 0.0  ;;  %v1552_v1 = vmul.f32 %v1889_v56, %v2804_v53  ;;  %v1554_v2 = vmul.f32 %v1905_v34, %v2804_v53  ;;  %v1258_v3 = vpop.f32.mrb[3].mxu0  ;;  %v1477_v4 = vpop.f32.mrb[3].mxu1 }
 0x179   :  { %vm1512_vm3 = vcmp.gt.f32.partialorder %v1890_v59, 0.0  ;;  %vm1514_vm4 = vcmp.gt.f32.partialorder %v1906_v60, 0.0  ;;  %v1553_v7 = vmul.f32 %v1890_v59, %v2804_v53  ;;  %v1555_v8 = vmul.f32 %v1906_v60, %v2804_v53  ;;  %v217_v55 = vpop.permute.xlu1 %216 }
 0x17a   :  { %v1584_v9 = vsel %vm1511_vm1, %v1889_v56, %v1552_v1  ;;  %v1586_v10 = vsel %vm1513_vm2, %v1905_v34, %v1554_v2  ;;  %v1891_v11 = vadd.f32 %v1256_v61, %v207_v50  ;;  %v1907_v12 = vadd.f32 %v1475_v62, %v207_v50  ;;  %v1627_v2 = vld [vmem:[%s3051_s4 + $0x58] sm:$0xff] }
 0x17b   :  { %v1585_v13 = vsel %vm1512_vm3, %v1890_v59, %v1553_v7  ;;  %v1587_v14 = vsel %vm1514_vm4, %v1906_v60, %v1555_v8  ;;  %v1648_v15 = vadd.f32 %v1616_v63, %v1584_v9  ;;  %v1650_v16 = vadd.f32 %v1618_v0, %v1586_v10  ;;  %v1625_v0 = vld [vmem:[%s3051_s4 + $0x48] sm:$0xff] }
 0x17c   :  { %v1649_v17 = vadd.f32 %v1617_v5, %v1585_v13  ;;  %v1651_v18 = vadd.f32 %v1619_v6, %v1587_v14  ;;  %vm1515_vm5 = vcmp.gt.f32.partialorder %v1891_v11, 0.0  ;;  %v1556_v19 = vmul.f32 %v1891_v11, %v2804_v53 }
 0x17d   :  { %1680 = vst [vmem:[%s3052_s5] sm:$0xff] %v1648_v15  ;;  %1682 = vst [vmem:[%s3052_s5 + $0x10] sm:$0xff] %v1650_v16  ;;  %vm1517_vm6 = vcmp.gt.f32.partialorder %v1907_v12, 0.0  ;;  %v1558_v22 = vmul.f32 %v1907_v12, %v2804_v53  ;;  %v1892_v24 = vadd.f32 %v1258_v3, %v207_v50  ;;  %v1908_v25 = vadd.f32 %v1477_v4, %v207_v50  ;;  %v1262_v26 = vpop.f32.mrb[4].mxu0  ;;  %v1481_v27 = vpop.f32.mrb[4].mxu1  ;;  %v1628_v4 = vld [vmem:[%s3051_s4 + $0x60] sm:$0xff] }
 0x17e   :  { %1681 = vst [vmem:[%s3052_s5 + $0x8] sm:$0xff] %v1649_v17  ;;  %1683 = vst [vmem:[%s3052_s5 + $0x18] sm:$0xff] %v1651_v18  ;;  %v1588_v28 = vsel %vm1515_vm5, %v1891_v11, %v1556_v19  ;;  %v1893_v29 = vadd.f32 %v1262_v26, %v212_v21  ;;  %v1909_v30 = vadd.f32 %v1481_v27, %v212_v21  ;;  %v1264_v31 = vpop.f32.mrb[5].mxu0  ;;  %v1483_v32 = vpop.f32.mrb[5].mxu1  ;;  %v1629_v26 = vld [vmem:[%s3051_s4 + $0x68] sm:$0xff] }
 0x17f   :  { %v1652_v33 = vadd.f32 %v1620_v20, %v1588_v28  ;;  %v1590_v35 = vsel %vm1517_vm6, %v1907_v12, %v1558_v22  ;;  %vm1516_vm7 = vcmp.gt.f32.partialorder %v1892_v24, 0.0  ;;  %v1557_v36 = vmul.f32 %v1892_v24, %v2804_v53  ;;  %v1266_v38 = vpop.f32.mrb[6].mxu0  ;;  %v1485_v39 = vpop.f32.mrb[6].mxu1  ;;  %v1630_v22 = vld [vmem:[%s3051_s4 + $0x70] sm:$0xff]  ;;  %v1631_v28 = vld [vmem:[%s3051_s4 + $0x78] sm:$0xff] }
 0x180   :  { %v1654_v40 = vadd.f32 %v1622_v23, %v1590_v35  ;;  %vm1518_vm8 = vcmp.gt.f32.partialorder %v1908_v25, 0.0  ;;  %v1559_v41 = vmul.f32 %v1908_v25, %v2804_v53  ;;  %vm1519_vm9 = vcmp.gt.f32.partialorder %v1893_v29, 0.0  ;;  %v1268_v43 = vpop.f32.mrb[7].mxu0  ;;  %v1487_v44 = vpop.f32.mrb[7].mxu1 }
 0x181   :  { %1684 = vst [vmem:[%s3052_s5 + $0x20] sm:$0xff] %v1652_v33  ;;  %v1589_v45 = vsel %vm1516_vm7, %v1892_v24, %v1557_v36  ;;  %v1560_v46 = vmul.f32 %v1893_v29, %v2804_v53  ;;  %vm1521_vm10 = vcmp.gt.f32.partialorder %v1909_v30, 0.0  ;;  %v1562_v48 = vmul.f32 %v1909_v30, %v2804_v53 }
 0x182   :  { %1686 = vst [vmem:[%s3052_s5 + $0x30] sm:$0xff] %v1654_v40  ;;  %v1653_v50 = vadd.f32 %v1621_v37, %v1589_v45  ;;  %v1591_v54 = vsel %vm1518_vm8, %v1908_v25, %v1559_v41  ;;  %v1894_v56 = vadd.f32 %v1264_v31, %v212_v21  ;;  %v1910_v34 = vadd.f32 %v1483_v32, %v212_v21  ;;  %v1632_v31 = vld [vmem:[%s3051_s4 + $0x80] sm:$0xff]  ;;  %v227_v40 = vpop.permute.xlu1 %226 }
 0x183   :  { %v1655_v57 = vadd.f32 %v1623_v42, %v1591_v54  ;;  %v1592_v58 = vsel %vm1519_vm9, %v1893_v29, %v1560_v46  ;;  %v1594_v59 = vsel %vm1521_vm10, %v1909_v30, %v1562_v48  ;;  %v1895_v60 = vadd.f32 %v1266_v38, %v217_v55  ;;  %v1633_v46 = vld [vmem:[%s3051_s4 + $0x88] sm:$0xff] }
 0x184   :  { %1685 = vst [vmem:[%s3052_s5 + $0x28] sm:$0xff] %v1653_v50  ;;  %v1656_v61 = vadd.f32 %v1624_v47, %v1592_v58  ;;  %v1658_v62 = vadd.f32 %v1626_v49, %v1594_v59  ;;  %vm1520_vm11 = vcmp.gt.f32.partialorder %v1894_v56, 0.0  ;;  %v1561_v63 = vmul.f32 %v1894_v56, %v2804_v53 }
 0x185   :  { %1687 = vst [vmem:[%s3052_s5 + $0x38] sm:$0xff] %v1655_v57  ;;  %vm1522_vm12 = vcmp.gt.f32.partialorder %v1910_v34, 0.0  ;;  %v1563_v1 = vmul.f32 %v1910_v34, %v2804_v53  ;;  %vm1523_vm13 = vcmp.gt.f32.partialorder %v1895_v60, 0.0  ;;  %v1564_v3 = vmul.f32 %v1895_v60, %v2804_v53  ;;  %v1272_v5 = vpop.f32.mrb[8].mxu0  ;;  %v1491_v6 = vpop.f32.mrb[8].mxu1 }
 0x186   :  { %1688 = vst [vmem:[%s3052_s5 + $0x40] sm:$0xff] %v1656_v61  ;;  %1690 = vst [vmem:[%s3052_s5 + $0x50] sm:$0xff] %v1658_v62  ;;  %v1593_v7 = vsel %vm1520_vm11, %v1894_v56, %v1561_v63  ;;  %v1911_v8 = vadd.f32 %v1485_v39, %v217_v55  ;;  %v1896_v9 = vadd.f32 %v1268_v43, %v217_v55  ;;  %v1274_v11 = vpop.f32.mrb[9].mxu0  ;;  %v1493_v12 = vpop.f32.mrb[9].mxu1 }
 0x187   :  { %v1912_v10 = vadd.f32 %v1487_v44, %v217_v55  ;;  %v1657_v13 = vadd.f32 %v1625_v0, %v1593_v7  ;;  %v1595_v14 = vsel %vm1522_vm12, %v1910_v34, %v1563_v1  ;;  %v1596_v15 = vsel %vm1523_vm13, %v1895_v60, %v1564_v3  ;;  %v1276_v17 = vpop.f32.mrb[10].mxu0  ;;  %v1495_v18 = vpop.f32.mrb[10].mxu1  ;;  %v1634_v44 = vld [vmem:[%s3051_s4 + $0x90] sm:$0xff]  ;;  %v1635_v1 = vld [vmem:[%s3051_s4 + $0x98] sm:$0xff] }
 0x188   :  { %v1897_v16 = vadd.f32 %v1272_v5, %v2800_v51  ;;  %v1659_v19 = vadd.f32 %v1627_v2, %v1595_v14  ;;  %v1660_v20 = vadd.f32 %v1628_v4, %v1596_v15  ;;  %vm1525_vm14 = vcmp.gt.f32.partialorder %v1911_v8, 0.0  ;;  %v1278_v23 = vpop.f32.mrb[11].mxu0  ;;  %v1497_v24 = vpop.f32.mrb[11].mxu1  ;;  %v1636_v5 = vld [vmem:[%s3051_s4 + $0xa0] sm:$0xff]  ;;  %v1638_v7 = vld [vmem:[%s3051_s4 + $0xb0] sm:$0xff]  ;;  %v1639_v15 = vld [vmem:[%s3051_s4 + $0xb8] sm:$0xff] }
 0x189   :  { %v1566_v21 = vmul.f32 %v1911_v8, %v2804_v53  ;;  %1689 = vst [vmem:[%s3052_s5 + $0x48] sm:$0xff] %v1657_v13  ;;  %vm1524_vm15 = vcmp.gt.f32.partialorder %v1896_v9, 0.0  ;;  %v1565_v25 = vmul.f32 %v1896_v9, %v2804_v53  ;;  %vm1526_vm0 = vcmp.gt.f32.partialorder %v1912_v10, 0.0 }
 0x18a   :  { %v1567_v27 = vmul.f32 %v1912_v10, %v2804_v53  ;;  %1691 = vst [vmem:[%s3052_s5 + $0x58] sm:$0xff] %v1659_v19  ;;  %1692 = vst [vmem:[%s3052_s5 + $0x60] sm:$0xff] %v1660_v20  ;;  %vm1527_vm1 = vcmp.gt.f32.partialorder %v1897_v16, 0.0  ;;  %v1568_v30 = vmul.f32 %v1897_v16, %v2804_v53  ;;  %v1913_v32 = vadd.f32 %v1491_v6, %v2800_v51  ;;  %v237_v19 = vpop.permute.xlu1 %236 }
 0x18b   :  { %v1598_v29 = vsel %vm1525_vm14, %v1911_v8, %v1566_v21  ;;  %v1597_v35 = vsel %vm1524_vm15, %v1896_v9, %v1565_v25  ;;  %v1898_v37 = vadd.f32 %v1274_v11, %v2800_v51  ;;  %v1914_v49 = vadd.f32 %v1493_v12, %v2800_v51 }
 0x18c   :  { %v1662_v33 = vadd.f32 %v1630_v22, %v1598_v29  ;;  %v1599_v36 = vsel %vm1526_vm0, %v1912_v10, %v1567_v27  ;;  %v1661_v38 = vadd.f32 %v1629_v26, %v1597_v35  ;;  %v1600_v41 = vsel %vm1527_vm1, %v1897_v16, %v1568_v30  ;;  %v1637_v10 = vld [vmem:[%s3051_s4 + $0xa8] sm:$0xff] }
 0x18d   :  { %v1663_v39 = vadd.f32 %v1631_v28, %v1599_v36  ;;  %vm1529_vm2 = vcmp.gt.f32.partialorder %v1913_v32, 0.0  ;;  %v1664_v42 = vadd.f32 %v1632_v31, %v1600_v41  ;;  %v1570_v43 = vmul.f32 %v1913_v32, %v2804_v53  ;;  %v1282_v47 = vpop.f32.mrb[12].mxu0  ;;  %v1501_v48 = vpop.f32.mrb[12].mxu1  ;;  %v1642_v31 = vld [vmem:[%s3051_s4 + $0xd0] sm:$0xff]  ;;  %v1641_v35 = vld [vmem:[%s3051_s4 + $0xc8] sm:$0xff] }
 0x18e   :  { %1694 = vst [vmem:[%s3052_s5 + $0x70] sm:$0xff] %v1662_v33  ;;  %vm1528_vm3 = vcmp.gt.f32.partialorder %v1898_v37, 0.0  ;;  %v1569_v45 = vmul.f32 %v1898_v37, %v2804_v53  ;;  %1693 = vst [vmem:[%s3052_s5 + $0x68] sm:$0xff] %v1661_v38  ;;  %v1899_v50 = vadd.f32 %v1276_v17, %v227_v40  ;;  %v1915_v54 = vadd.f32 %v1495_v18, %v227_v40  ;;  %v1284_v56 = vpop.f32.mrb[13].mxu0  ;;  %v1503_v34 = vpop.f32.mrb[13].mxu1  ;;  %v1643_v38 = vld [vmem:[%s3051_s4 + $0xd8] sm:$0xff] }
 0x18f   :  { %1695 = vst [vmem:[%s3052_s5 + $0x78] sm:$0xff] %v1663_v39  ;;  %v1900_v55 = vadd.f32 %v1278_v23, %v227_v40  ;;  %1696 = vst [vmem:[%s3052_s5 + $0x80] sm:$0xff] %v1664_v42  ;;  %v1602_v57 = vsel %vm1529_vm2, %v1913_v32, %v1570_v43  ;;  %v1916_v59 = vadd.f32 %v1497_v24, %v227_v40  ;;  %v1286_v61 = vpop.f32.mrb[14].mxu0  ;;  %v1505_v62 = vpop.f32.mrb[14].mxu1  ;;  %vm1530_vm4 = vcmp.gt.f32.partialorder %v1914_v49, 0.0  ;;  %v1640_v23 = vld [vmem:[%s3051_s4 + $0xc0] sm:$0xff] }
 0x190   :  { %v1601_v58 = vsel %vm1528_vm3, %v1898_v37, %v1569_v45  ;;  %v1901_v60 = vadd.f32 %v1282_v47, %v2802_v52  ;;  %v1666_v63 = vadd.f32 %v1634_v44, %v1602_v57  ;;  %v1571_v51 = vmul.f32 %v1914_v49, %v2804_v53  ;;  %v2945_v2 = vpop.f32.mrb[15].mxu0  ;;  %v2947_v3 = vpop.f32.mrb[15].mxu1  ;;  %v1644_v40 = vld [vmem:[%s3051_s4 + $0xe0] sm:$0xff]  ;;  %v1646_v44 = vld [vmem:[%s3051_s4 + $0xf0] sm:$0xff]  ;;  %v1645_v57 = vld [vmem:[%s3051_s4 + $0xe8] sm:$0xff] }
 0x191   :  { %v1665_v0 = vadd.f32 %v1633_v46, %v1601_v58  ;;  %vm1531_vm5 = vcmp.gt.f32.partialorder %v1899_v50, 0.0  ;;  %v1572_v4 = vmul.f32 %v1899_v50, %v2804_v53  ;;  %vm1533_vm6 = vcmp.gt.f32.partialorder %v1915_v54, 0.0 }
 0x192   :  { %v1574_v6 = vmul.f32 %v1915_v54, %v2804_v53  ;;  %1698 = vst [vmem:[%s3052_s5 + $0x90] sm:$0xff] %v1666_v63  ;;  %v1603_v8 = vsel %vm1530_vm4, %v1914_v49, %v1571_v51  ;;  %vm1532_vm7 = vcmp.gt.f32.partialorder %v1900_v55, 0.0  ;;  %v1573_v9 = vmul.f32 %v1900_v55, %v2804_v53 }
 0x193   :  { %1697 = vst [vmem:[%s3052_s5 + $0x88] sm:$0xff] %v1665_v0  ;;  %vm1534_vm8 = vcmp.gt.f32.partialorder %v1916_v59, 0.0  ;;  %v1667_v11 = vadd.f32 %v1635_v1, %v1603_v8  ;;  %v1604_v12 = vsel %vm1531_vm5, %v1899_v50, %v1572_v4  ;;  %v1575_v14 = vmul.f32 %v1916_v59, %v2804_v53 }
 0x194   :  { %v1606_v13 = vsel %vm1533_vm6, %v1915_v54, %v1574_v6  ;;  %v1668_v16 = vadd.f32 %v1636_v5, %v1604_v12  ;;  %v1605_v18 = vsel %vm1532_vm7, %v1900_v55, %v1573_v9  ;;  %vm1535_vm9 = vcmp.gt.f32.partialorder %v1901_v60, 0.0 }
 0x195   :  { %v1670_v17 = vadd.f32 %v1638_v7, %v1606_v13  ;;  %1699 = vst [vmem:[%s3052_s5 + $0x98] sm:$0xff] %v1667_v11  ;;  %v1669_v20 = vadd.f32 %v1637_v10, %v1605_v18  ;;  %v1607_v21 = vsel %vm1534_vm8, %v1916_v59, %v1575_v14  ;;  %v1576_v22 = vmul.f32 %v1901_v60, %v2804_v53  ;;  %v1647_v59 = vld [vmem:[%s3051_s4 + $0xf8] sm:$0xff] }
 0x196   :  { %v1917_v24 = vadd.f32 %v1501_v48, %v2802_v52  ;;  %1700 = vst [vmem:[%s3052_s5 + $0xa0] sm:$0xff] %v1668_v16  ;;  %v1671_v25 = vadd.f32 %v1639_v15, %v1607_v21  ;;  %v1902_v26 = vadd.f32 %v1284_v56, %v2802_v52  ;;  %v1918_v27 = vadd.f32 %v1503_v34, %v2802_v52 }
 0x197   :  { %1702 = vst [vmem:[%s3052_s5 + $0xb0] sm:$0xff] %v1670_v17  ;;  %v1903_v28 = vadd.f32 %v1286_v61, %v237_v19  ;;  %1701 = vst [vmem:[%s3052_s5 + $0xa8] sm:$0xff] %v1669_v20  ;;  %v1608_v29 = vsel %vm1535_vm9, %v1901_v60, %v1576_v22  ;;  %v1919_v32 = vadd.f32 %v1505_v62, %v237_v19 }
 0x198   :  { %vm1537_vm10 = vcmp.gt.f32.partialorder %v1917_v24, 0.0  ;;  %v1578_v30 = vmul.f32 %v1917_v24, %v2804_v53  ;;  %1703 = vst [vmem:[%s3052_s5 + $0xb8] sm:$0xff] %v1671_v25  ;;  %v1672_v33 = vadd.f32 %v1640_v23, %v1608_v29  ;;  %vm1536_vm11 = vcmp.gt.f32.partialorder %v1902_v26, 0.0 }
 0x199   :  { %v1577_v52 = vmul.f32 %v1902_v26, %v2804_v53  ;;  %vm1538_vm12 = vcmp.gt.f32.partialorder %v1918_v27, 0.0  ;;  %v1579_v37 = vmul.f32 %v1918_v27, %v2804_v53  ;;  %vm1539_vm13 = vcmp.gt.f32.partialorder %v1903_v28, 0.0 }
 0x19a   :  { %v1610_v36 = vsel %vm1537_vm10, %v1917_v24, %v1578_v30  ;;  %v1580_v39 = vmul.f32 %v1903_v28, %v2804_v53  ;;  %1704 = vst [vmem:[%s3052_s5 + $0xc0] sm:$0xff] %v1672_v33  ;;  %vm1541_vm14 = vcmp.gt.f32.partialorder %v1919_v32, 0.0  ;;  %v1582_v43 = vmul.f32 %v1919_v32, %v2804_v53 }
 0x19b   :  { %v1674_v41 = vadd.f32 %v1642_v31, %v1610_v36  ;;  %v1609_v42 = vsel %vm1536_vm11, %v1902_v26, %v1577_v52  ;;  %v1611_v46 = vsel %vm1538_vm12, %v1918_v27, %v1579_v37  ;;  %v1904_v48 = vadd.f32 %v2945_v2, %v237_v19 }
 0x19c   :  { %v1673_v45 = vadd.f32 %v1641_v35, %v1609_v42  ;;  %v1612_v47 = vsel %vm1539_vm13, %v1903_v28, %v1580_v39  ;;  %v1675_v49 = vadd.f32 %v1643_v38, %v1611_v46  ;;  %v1614_v54 = vsel %vm1541_vm14, %v1919_v32, %v1582_v43 }
 0x19d   :  { %1706 = vst [vmem:[%s3052_s5 + $0xd0] sm:$0xff] %v1674_v41  ;;  %v1676_v50 = vadd.f32 %v1644_v40, %v1612_v47  ;;  %v1920_v55 = vadd.f32 %v2947_v3, %v237_v19  ;;  %v1678_v56 = vadd.f32 %v1646_v44, %v1614_v54  ;;  %vm1540_vm15 = vcmp.gt.f32.partialorder %v1904_v48, 0.0 }
 0x19e   :  { %1705 = vst [vmem:[%s3052_s5 + $0xc8] sm:$0xff] %v1673_v45  ;;  %v1581_v34 = vmul.f32 %v1904_v48, %v2804_v53  ;;  %1707 = vst [vmem:[%s3052_s5 + $0xd8] sm:$0xff] %v1675_v49 }
 0x19f   :  { %1708 = vst [vmem:[%s3052_s5 + $0xe0] sm:$0xff] %v1676_v50  ;;  %vm1542_vm0 = vcmp.gt.f32.partialorder %v1920_v55, 0.0  ;;  %v1583_v58 = vmul.f32 %v1920_v55, %v2804_v53  ;;  %1710 = vst [vmem:[%s3052_s5 + $0xf0] sm:$0xff] %v1678_v56 }
 0x1a0   :  { %v1613_v60 = vsel %vm1540_vm15, %v1904_v48, %v1581_v34 }
 0x1a1   :  { %v1677_v61 = vadd.f32 %v1645_v57, %v1613_v60  ;;  %v1615_v62 = vsel %vm1542_vm0, %v1920_v55, %v1583_v58 }
 0x1a2   :  { %v1679_v63 = vadd.f32 %v1647_v59, %v1615_v62 }
 0x1a3   :  { %1709 = vst [vmem:[%s3052_s5 + $0xe8] sm:$0xff] %v1677_v61 }
 0x1a4   :  { %1711 = vst [vmem:[%s3052_s5 + $0xf8] sm:$0xff] %v1679_v63 }

// kernel: csnet_forward.27
= control target key start
LH: loop header
LB: loop body
LE: loop exit
PB: predicated region body
PF: predicated region fallthrough
CT: control target
= control target key end

     0   :  { %v1615_v22 = vmov 0   ;;  %v173_v38 = vlaneseq  ;;  %v1616_v39 = vmov 1966171168   ;;  %vm941_vm0 = vcmask 523264   ;;  %s2113_s1 = inlined_call_operand.vmem [shape: bf16[576,512], index: 1, kind: input, shape index: {}]   ;;  %s2114_s3 = inlined_call_operand.<no memory space> [shape: f32[1,1], index: 3, kind: input, shape index: {}]   ;;  %s2115_s2 = inlined_call_operand.<no memory space> [shape: f32[1,1], index: 2, kind: input, shape index: {}]   ;;  %s2116_s0 = inlined_call_operand.vmem [shape: bf16[1,576], index: 0, kind: input, shape index: {}]   ;;  %s2117_s4 = inlined_call_operand.vmem [shape: f32[1,512], index: 4, kind: output, shape index: {}]  }
   0x1   :  { %v1398_v0 = vld [vmem:[%s2113_s1 + $0x4] ss:$16 sps:$4 sm:$0xff]   ;;  %v1400_v1 = vld [vmem:[%s2113_s1 + $0xc] ss:$16 sps:$4 sm:$0xff]   ;;  %v1402_v2 = vld [vmem:[%s2113_s1] ss:$16 sps:$4 sm:$0xff]   ;;  %1397 = vset.pattern.permute.xlu0 %v1615_v22  ;;  %v9_v26 = vstv %s2115_s2  ;;  %v180_v40 = vunpack.c.l.s4 %v1616_v39 }
   0x2   :  { %945 = vmatprep.subr.bf16.mxu0 %v1398_v0  ;;  %v1403_v3 = vld [vmem:[%s2113_s1 + $0x8] ss:$16 sps:$4 sm:$0xff]   ;;  %1068 = vmatprep.subr.bf16.mxu1 %v1400_v1  ;;  %v1404_v4 = vld [vmem:[%s2113_s1 + $0x24] ss:$16 sps:$4 sm:$0xff]   ;;  %v1406_v5 = vld [vmem:[%s2113_s1 + $0x2c] ss:$16 sps:$4 sm:$0xff]  }
   0x3   :  { %946 = vmatpush1.bf16.msra.mxu0 %v1402_v2  ;;  %1069 = vmatpush1.bf16.msra.mxu1 %v1403_v3  ;;  %v1408_v6 = vld [vmem:[%s2113_s1 + $0x20] ss:$16 sps:$4 sm:$0xff]   ;;  %v1409_v7 = vld [vmem:[%s2113_s1 + $0x28] ss:$16 sps:$4 sm:$0xff]   ;;  %v1410_v8 = vld [vmem:[%s2113_s1 + $0x44] ss:$16 sps:$4 sm:$0xff]   ;;  %v181_v45 = vunpack.c.0.s8 %v180_v40 }
   0x4   :  { %947 = vmatprep.subr.bf16.mxu0 %v1404_v4  ;;  %1070 = vmatprep.subr.bf16.mxu1 %v1406_v5  ;;  %v1412_v9 = vld [vmem:[%s2113_s1 + $0x4c] ss:$16 sps:$4 sm:$0xff]   ;;  %v1414_v10 = vld [vmem:[%s2113_s1 + $0x40] ss:$16 sps:$4 sm:$0xff]   ;;  %v1415_v11 = vld [vmem:[%s2113_s1 + $0x48] ss:$16 sps:$4 sm:$0xff]  }
   0x5   :  { %v1416_v12 = vld [vmem:[%s2113_s1 + $0x64] ss:$16 sps:$4 sm:$0xff]   ;;  %v1418_v13 = vld [vmem:[%s2113_s1 + $0x6c] ss:$16 sps:$4 sm:$0xff]   ;;  %v1420_v14 = vld [vmem:[%s2113_s1 + $0x60] ss:$16 sps:$4 sm:$0xff]  }
   0x6   :  { %v1421_v15 = vld [vmem:[%s2113_s1 + $0x68] ss:$16 sps:$4 sm:$0xff]   ;;  %v1422_v16 = vld [vmem:[%s2113_s1 + $0x84] ss:$16 sps:$4 sm:$0xff]   ;;  %v1424_v17 = vld [vmem:[%s2113_s1 + $0x8c] ss:$16 sps:$4 sm:$0xff]  }
   0x7   :  { %948 = vmatpush1.bf16.msra.mxu0 %v1408_v6  ;;  %1071 = vmatpush1.bf16.msra.mxu1 %v1409_v7  ;;  %v1426_v18 = vld [vmem:[%s2113_s1 + $0x80] ss:$16 sps:$4 sm:$0xff]   ;;  %v1427_v19 = vld [vmem:[%s2113_s1 + $0x88] ss:$16 sps:$4 sm:$0xff]   ;;  %v1428_v20 = vld [vmem:[%s2113_s1 + $0xa4] ss:$16 sps:$4 sm:$0xff]  }
   0x8   :  { %949 = vmatprep.subr.bf16.mxu0 %v1410_v8  ;;  %1072 = vmatprep.subr.bf16.mxu1 %v1412_v9  ;;  %v1430_v21 = vld [vmem:[%s2113_s1 + $0xac] ss:$16 sps:$4 sm:$0xff]   ;;  %v1432_v23 = vld [vmem:[%s2113_s1 + $0xa0] ss:$16 sps:$4 sm:$0xff]   ;;  %v1433_v24 = vld [vmem:[%s2113_s1 + $0xa8] ss:$16 sps:$4 sm:$0xff]  }
   0x9   :  { %v1434_v25 = vld [vmem:[%s2113_s1 + $0xc4] ss:$16 sps:$4 sm:$0xff]   ;;  %v1436_v27 = vld [vmem:[%s2113_s1 + $0xcc] ss:$16 sps:$4 sm:$0xff]   ;;  %10 = vst [vmem:[#allocation2] sm:$0x1] %v9_v26 }
   0xa   :  { %v1438_v28 = vld [vmem:[%s2113_s1 + $0xc0] ss:$16 sps:$4 sm:$0xff]   ;;  %v1439_v29 = vld [vmem:[%s2113_s1 + $0xc8] ss:$16 sps:$4 sm:$0xff]   ;;  %v1440_v30 = vld [vmem:[%s2113_s1 + $0xe4] ss:$16 sps:$4 sm:$0xff]  }
   0xb   :  { %950 = vmatpush1.bf16.msra.mxu0 %v1414_v10  ;;  %1073 = vmatpush1.bf16.msra.mxu1 %v1415_v11  ;;  %v1442_v31 = vld [vmem:[%s2113_s1 + $0xec] ss:$16 sps:$4 sm:$0xff]   ;;  %v1444_v32 = vld [vmem:[%s2113_s1 + $0xe0] ss:$16 sps:$4 sm:$0xff]   ;;  %v1445_v33 = vld [vmem:[%s2113_s1 + $0xe8] ss:$16 sps:$4 sm:$0xff]  }
   0xc   :  { %951 = vmatprep.subr.bf16.mxu0 %v1416_v12  ;;  %1074 = vmatprep.subr.bf16.mxu1 %v1418_v13  ;;  %v1446_v34 = vld [vmem:[%s2113_s1 + $0x104] ss:$16 sps:$4 sm:$0xff]   ;;  %v1448_v35 = vld [vmem:[%s2113_s1 + $0x10c] ss:$16 sps:$4 sm:$0xff]   ;;  %v1450_v36 = vld [vmem:[%s2113_s1 + $0x100] ss:$16 sps:$4 sm:$0xff]  }
   0xd   :  { %v1451_v37 = vld [vmem:[%s2113_s1 + $0x108] ss:$16 sps:$4 sm:$0xff]   ;;  %v1452_v41 = vld [vmem:[%s2113_s1 + $0x124] ss:$16 sps:$4 sm:$0xff]   ;;  %v1454_v42 = vld [vmem:[%s2113_s1 + $0x12c] ss:$16 sps:$4 sm:$0xff]  }
   0xe   :  { %v1456_v43 = vld [vmem:[%s2113_s1 + $0x120] ss:$16 sps:$4 sm:$0xff]   ;;  %v1764_v44 = vshrl.u32 %v173_v38, 7  ;;  %v1457_v46 = vld [vmem:[%s2113_s1 + $0x128] ss:$16 sps:$4 sm:$0xff]   ;;  %vm1222_vm1 = vcmp.lt.s32.totalorder %v173_v38, 512 }
   0xf   :  { %952 = vmatpush1.bf16.msra.mxu0 %v1420_v14  ;;  %1075 = vmatpush1.bf16.msra.mxu1 %v1421_v15  ;;  %v1458_v47 = vld [vmem:[%s2113_s1 + $0x144] ss:$16 sps:$4 sm:$0xff]   ;;  %v1460_v48 = vld [vmem:[%s2113_s1 + $0x14c] ss:$16 sps:$4 sm:$0xff]   ;;  %v1462_v49 = vld [vmem:[%s2113_s1 + $0x140] ss:$16 sps:$4 sm:$0xff]  }
  0x10   :  { %953 = vmatprep.subr.bf16.mxu0 %v1422_v16  ;;  %1076 = vmatprep.subr.bf16.mxu1 %v1424_v17  ;;  %v1463_v50 = vld [vmem:[%s2113_s1 + $0x148] ss:$16 sps:$4 sm:$0xff]   ;;  %v1782_v51 = vsub.s32 %v181_v45, %v1764_v44  ;;  %v1464_v52 = vld [vmem:[%s2113_s1 + $0x164] ss:$16 sps:$4 sm:$0xff]   ;;  %v1466_v53 = vld [vmem:[%s2113_s1 + $0x16c] ss:$16 sps:$4 sm:$0xff]  }
  0x11   :  { %v1793_v54 = vld [vmem:[%s2116_s0] sm:$0x1f]  ;;  %v1469_v57 = vld [vmem:[%s2113_s1 + $0x168] ss:$16 sps:$4 sm:$0xff]   ;;  %v1472_v59 = vld [vmem:[%s2113_s1 + $0x18c] ss:$16 sps:$4 sm:$0xff]  }
  0x12   :  { %v1468_v55 = vld [vmem:[%s2113_s1 + $0x160] ss:$16 sps:$4 sm:$0xff]   ;;  %v185_v56 = vrot.slane %v1793_v54, %v1782_v51  ;;  %v1470_v58 = vld [vmem:[%s2113_s1 + $0x184] ss:$16 sps:$4 sm:$0xff]   ;;  %v1475_v63 = vld [vmem:[%s2113_s1 + $0x188] ss:$16 sps:$4 sm:$0xff]  }
  0x13   :  { %954 = vmatpush1.bf16.msra.mxu0 %v1426_v18  ;;  %1077 = vmatpush1.bf16.msra.mxu1 %v1427_v19  ;;  %v1474_v61 = vld [vmem:[%s2113_s1 + $0x180] ss:$16 sps:$4 sm:$0xff]   ;;  %v1476_v0 = vld [vmem:[%s2113_s1 + $0x1a4] ss:$16 sps:$4 sm:$0xff]   ;;  %v1478_v1 = vld [vmem:[%s2113_s1 + $0x1ac] ss:$16 sps:$4 sm:$0xff]  }
  0x14   :  { %955 = vmatprep.subr.bf16.mxu0 %v1428_v20  ;;  %1078 = vmatprep.subr.bf16.mxu1 %v1430_v21  ;;  %v193_v60 = vcombine.high %v185_v56, %v185_v56  ;;  %v1480_v2 = vld [vmem:[%s2113_s1 + $0x1a0] ss:$16 sps:$4 sm:$0xff]   ;;  %v1481_v3 = vld [vmem:[%s2113_s1 + $0x1a8] ss:$16 sps:$4 sm:$0xff]   ;;  %v1482_v4 = vld [vmem:[%s2113_s1 + $0x1c4] ss:$16 sps:$4 sm:$0xff]   ;;  %v1862_v15 = vrot.slane %v185_v56, %v1782_v51 }
  0x15   :  { %v1484_v5 = vld [vmem:[%s2113_s1 + $0x1cc] ss:$16 sps:$4 sm:$0xff]   ;;  %v1486_v6 = vld [vmem:[%s2113_s1 + $0x1c0] ss:$16 sps:$4 sm:$0xff]   ;;  %v1487_v7 = vld [vmem:[%s2113_s1 + $0x1c8] ss:$16 sps:$4 sm:$0xff]  }
  0x16   :  { %v214_v62 = vrot.slane %v193_v60, %v1782_v51  ;;  %v1488_v8 = vld [vmem:[%s2113_s1 + $0x1e4] ss:$16 sps:$4 sm:$0xff]   ;;  %v1490_v9 = vld [vmem:[%s2113_s1 + $0x1ec] ss:$16 sps:$4 sm:$0xff]   ;;  %v1492_v10 = vld [vmem:[%s2113_s1 + $0x1e0] ss:$16 sps:$4 sm:$0xff]  }
  0x17   :  { %956 = vmatpush1.bf16.msra.mxu0 %v1432_v23  ;;  %1079 = vmatpush1.bf16.msra.mxu1 %v1433_v24  ;;  %v1493_v11 = vld [vmem:[%s2113_s1 + $0x1e8] ss:$16 sps:$4 sm:$0xff]   ;;  %v1497_v12 = vld [vmem:[%s2113_s1 + $0x204] ss:$16 sps:$4 sm:$0xff]   ;;  %v1500_v13 = vld [vmem:[%s2113_s1 + $0x20c] ss:$16 sps:$4 sm:$0xff]  }
  0x18   :  { %957 = vmatprep.subr.bf16.mxu0 %v1434_v25  ;;  %1080 = vmatprep.subr.bf16.mxu1 %v1436_v27  ;;  %v1495_v14 = vld [vmem:[%s2113_s1 + $0x200] ss:$16 sps:$4 sm:$0xff]   ;;  %v1498_v16 = vld [vmem:[%s2113_s1 + $0x208] ss:$16 sps:$4 sm:$0xff]   ;;  %v1503_v17 = vld [vmem:[%s2113_s1 + $0x224] ss:$16 sps:$4 sm:$0xff]   ;;  %v216_v19 = vcombine.high %v214_v62, %v214_v62 }
  0x19   :  { %977 = vmatprep.mubr.bf16.mxu0 %v214_v62  ;;  %1100 = vmatprep.mubr.bf16.mxu1 %v214_v62  ;;  %v1506_v18 = vld [vmem:[%s2113_s1 + $0x22c] ss:$16 sps:$4 sm:$0xff]   ;;  %v1501_v20 = vld [vmem:[%s2113_s1 + $0x220] ss:$16 sps:$4 sm:$0xff]   ;;  %v1504_v21 = vld [vmem:[%s2113_s1 + $0x228] ss:$16 sps:$4 sm:$0xff]  }
  0x1a   :  { %v1509_v23 = vld [vmem:[%s2113_s1 + $0x244] ss:$16 sps:$4 sm:$0xff]   ;;  %v1512_v24 = vld [vmem:[%s2113_s1 + $0x24c] ss:$16 sps:$4 sm:$0xff]   ;;  %v1507_v25 = vld [vmem:[%s2113_s1 + $0x240] ss:$16 sps:$4 sm:$0xff]  }
  0x1b   :  { %958 = vmatpush1.bf16.msra.mxu0 %v1438_v28  ;;  %1081 = vmatpush1.bf16.msra.mxu1 %v1439_v29  ;;  %v1510_v26 = vld [vmem:[%s2113_s1 + $0x248] ss:$16 sps:$4 sm:$0xff]   ;;  %v1515_v27 = vld [vmem:[%s2113_s1 + $0x264] ss:$16 sps:$4 sm:$0xff]   ;;  %v1518_v28 = vld [vmem:[%s2113_s1 + $0x26c] ss:$16 sps:$4 sm:$0xff]  }
  0x1c   :  { %959 = vmatprep.subr.bf16.mxu0 %v1440_v30  ;;  %1082 = vmatprep.subr.bf16.mxu1 %v1442_v31  ;;  %v1513_v29 = vld [vmem:[%s2113_s1 + $0x260] ss:$16 sps:$4 sm:$0xff]   ;;  %v1516_v30 = vld [vmem:[%s2113_s1 + $0x268] ss:$16 sps:$4 sm:$0xff]   ;;  %v1521_v31 = vld [vmem:[%s2113_s1 + $0x284] ss:$16 sps:$4 sm:$0xff]  }
  0x1d   :  { %v1528_v39 = vld [vmem:[%s2113_s1 + $0x2a8] ss:$16 sps:$4 sm:$0xff]   ;;  %v1533_v40 = vld [vmem:[%s2113_s1 + $0x2c4] ss:$16 sps:$4 sm:$0xff]   ;;  %v1555_v62 = vld [vmem:[%s2113_s1 + $0x340] ss:$16 sps:$4 sm:$0xff]  }
  0x1e   :  { %v1539_v45 = vld [vmem:[%s2113_s1 + $0x2e4] ss:$16 sps:$4 sm:$0xff]  }
  0x1f   :  { %960 = vmatpush1.bf16.msra.mxu0 %v1444_v32  ;;  %1083 = vmatpush1.bf16.msra.mxu1 %v1445_v33  ;;  %v1524_v32 = vld [vmem:[%s2113_s1 + $0x28c] ss:$16 sps:$4 sm:$0xff]   ;;  %v1519_v33 = vld [vmem:[%s2113_s1 + $0x280] ss:$16 sps:$4 sm:$0xff]   ;;  %v1551_v56 = vld [vmem:[%s2113_s1 + $0x324] ss:$16 sps:$4 sm:$0xff]  }
  0x20   :  { %961 = vmatprep.subr.bf16.mxu0 %v1446_v34  ;;  %1084 = vmatprep.subr.bf16.mxu1 %v1448_v35  ;;  %v1522_v34 = vld [vmem:[%s2113_s1 + $0x288] ss:$16 sps:$4 sm:$0xff]   ;;  %v1527_v35 = vld [vmem:[%s2113_s1 + $0x2a4] ss:$16 sps:$4 sm:$0xff]  }
  0x21   :  { %v1557_v60 = vld [vmem:[%s2113_s1 + $0x344] ss:$16 sps:$4 sm:$0xff]  }
  0x23   :  { %962 = vmatpush1.bf16.msra.mxu0 %v1450_v36  ;;  %1085 = vmatpush1.bf16.msra.mxu1 %v1451_v37  ;;  %v1530_v36 = vld [vmem:[%s2113_s1 + $0x2ac] ss:$16 sps:$4 sm:$0xff]   ;;  %v1525_v37 = vld [vmem:[%s2113_s1 + $0x2a0] ss:$16 sps:$4 sm:$0xff]  }
  0x24   :  { %963 = vmatprep.subr.bf16.mxu0 %v1452_v41  ;;  %1086 = vmatprep.subr.bf16.mxu1 %v1454_v42  ;;  %v1536_v41 = vld [vmem:[%s2113_s1 + $0x2cc] ss:$16 sps:$4 sm:$0xff]   ;;  %v1531_v42 = vld [vmem:[%s2113_s1 + $0x2c0] ss:$16 sps:$4 sm:$0xff]  }
  0x27   :  { %964 = vmatpush1.bf16.msra.mxu0 %v1456_v43  ;;  %1087 = vmatpush1.bf16.msra.mxu1 %v1457_v46  ;;  %v1534_v43 = vld [vmem:[%s2113_s1 + $0x2c8] ss:$16 sps:$4 sm:$0xff]   ;;  %v1542_v46 = vld [vmem:[%s2113_s1 + $0x2ec] ss:$16 sps:$4 sm:$0xff]  }
  0x28   :  { %965 = vmatprep.subr.bf16.mxu0 %v1458_v47  ;;  %1088 = vmatprep.subr.bf16.mxu1 %v1460_v48  ;;  %v1537_v47 = vld [vmem:[%s2113_s1 + $0x2e0] ss:$16 sps:$4 sm:$0xff]   ;;  %v1540_v48 = vld [vmem:[%s2113_s1 + $0x2e8] ss:$16 sps:$4 sm:$0xff]  }
  0x2b   :  { %966 = vmatpush1.bf16.msra.mxu0 %v1462_v49  ;;  %1089 = vmatpush1.bf16.msra.mxu1 %v1463_v50  ;;  %v1545_v49 = vld [vmem:[%s2113_s1 + $0x304] ss:$16 sps:$4 sm:$0xff]   ;;  %v1548_v50 = vld [vmem:[%s2113_s1 + $0x30c] ss:$16 sps:$4 sm:$0xff]  }
  0x2c   :  { %967 = vmatprep.subr.bf16.mxu0 %v1464_v52  ;;  %1090 = vmatprep.subr.bf16.mxu1 %v1466_v53  ;;  %v1543_v52 = vld [vmem:[%s2113_s1 + $0x300] ss:$16 sps:$4 sm:$0xff]   ;;  %v1546_v53 = vld [vmem:[%s2113_s1 + $0x308] ss:$16 sps:$4 sm:$0xff]  }
  0x2f   :  { %968 = vmatpush1.bf16.msra.mxu0 %v1468_v55  ;;  %1091 = vmatpush1.bf16.msra.mxu1 %v1469_v57  ;;  %v167_v55 = vld [vmem:[#allocation2] sm:$0x1]  ;;  %v1554_v57 = vld [vmem:[%s2113_s1 + $0x32c] ss:$16 sps:$4 sm:$0xff]  }
  0x30   :  { %969 = vmatprep.subr.bf16.mxu0 %v1470_v58  ;;  %1092 = vmatprep.subr.bf16.mxu1 %v1472_v59  ;;  %v1549_v58 = vld [vmem:[%s2113_s1 + $0x320] ss:$16 sps:$4 sm:$0xff]   ;;  %v1552_v59 = vld [vmem:[%s2113_s1 + $0x328] ss:$16 sps:$4 sm:$0xff]  }
  0x31   :  { %170 = vperm.xlu0 %1397, %v167_v55  }
  0x33   :  { %970 = vmatpush1.bf16.msra.mxu0 %v1474_v61  ;;  %1093 = vmatpush1.bf16.msra.mxu1 %v1475_v63  ;;  %v1560_v61 = vld [vmem:[%s2113_s1 + $0x34c] ss:$16 sps:$4 sm:$0xff]   ;;  %v1558_v63 = vld [vmem:[%s2113_s1 + $0x348] ss:$16 sps:$4 sm:$0xff]  }
  0x34   :  { %971 = vmatprep.subr.bf16.mxu0 %v1476_v0  ;;  %1094 = vmatprep.subr.bf16.mxu1 %v1478_v1  ;;  %v1563_v0 = vld [vmem:[%s2113_s1 + $0x364] ss:$16 sps:$4 sm:$0xff]   ;;  %v1566_v1 = vld [vmem:[%s2113_s1 + $0x36c] ss:$16 sps:$4 sm:$0xff]  }
  0x37   :  { %972 = vmatpush1.bf16.msra.mxu0 %v1480_v2  ;;  %1095 = vmatpush1.bf16.msra.mxu1 %v1481_v3  ;;  %v1561_v2 = vld [vmem:[%s2113_s1 + $0x360] ss:$16 sps:$4 sm:$0xff]   ;;  %v1564_v3 = vld [vmem:[%s2113_s1 + $0x368] ss:$16 sps:$4 sm:$0xff]  }
  0x38   :  { %973 = vmatprep.subr.bf16.mxu0 %v1482_v4  ;;  %1096 = vmatprep.subr.bf16.mxu1 %v1484_v5  ;;  %v1569_v4 = vld [vmem:[%s2113_s1 + $0x384] ss:$16 sps:$4 sm:$0xff]   ;;  %v1572_v5 = vld [vmem:[%s2113_s1 + $0x38c] ss:$16 sps:$4 sm:$0xff]  }
  0x3b   :  { %974 = vmatpush1.bf16.msra.mxu0 %v1486_v6  ;;  %1097 = vmatpush1.bf16.msra.mxu1 %v1487_v7  ;;  %v1567_v6 = vld [vmem:[%s2113_s1 + $0x380] ss:$16 sps:$4 sm:$0xff]   ;;  %v1570_v7 = vld [vmem:[%s2113_s1 + $0x388] ss:$16 sps:$4 sm:$0xff]  }
  0x3c   :  { %975 = vmatprep.subr.bf16.mxu0 %v1488_v8  ;;  %1098 = vmatprep.subr.bf16.mxu1 %v1490_v9  ;;  %v1575_v8 = vld [vmem:[%s2113_s1 + $0x3a4] ss:$16 sps:$4 sm:$0xff]   ;;  %v1578_v9 = vld [vmem:[%s2113_s1 + $0x3ac] ss:$16 sps:$4 sm:$0xff]  }
  0x3f   :  { %976 = vmatpush1.bf16.msra.mxu0 %v1492_v10  ;;  %1099 = vmatpush1.bf16.msra.mxu1 %v1493_v11  ;;  %v1573_v10 = vld [vmem:[%s2113_s1 + $0x3a0] ss:$16 sps:$4 sm:$0xff]   ;;  %v1576_v11 = vld [vmem:[%s2113_s1 + $0x3a8] ss:$16 sps:$4 sm:$0xff]  }
  0x40   :  { %986 = vmatprep.subr.bf16.mxu0 %v1497_v12  ;;  %1109 = vmatprep.subr.bf16.mxu1 %v1500_v13  ;;  %v1581_v12 = vld [vmem:[%s2113_s1 + $0x3c4] ss:$16 sps:$4 sm:$0xff]   ;;  %v1584_v13 = vld [vmem:[%s2113_s1 + $0x3cc] ss:$16 sps:$4 sm:$0xff]  }
  0x42   :  { %978 = vmatmul.mubr.bf16.vlgmr.msra.gmra.mrb[0].mxu0 %v1862_v15  ;;  %1101 = vmatmul.mubr.bf16.vlgmr.msra.gmra.mrb[0].mxu1 %v1862_v15 }
  0x43   :  { %987 = vmatpush1.bf16.msra.mxu0 %v1495_v14  ;;  %1110 = vmatpush1.bf16.msra.mxu1 %v1498_v16  ;;  %v1579_v14 = vld [vmem:[%s2113_s1 + $0x3c0] ss:$16 sps:$4 sm:$0xff]   ;;  %v1582_v16 = vld [vmem:[%s2113_s1 + $0x3c8] ss:$16 sps:$4 sm:$0xff]  }
  0x44   :  { %988 = vmatprep.subr.bf16.mxu0 %v1503_v17  ;;  %1111 = vmatprep.subr.bf16.mxu1 %v1506_v18  ;;  %v1587_v17 = vld [vmem:[%s2113_s1 + $0x3e4] ss:$16 sps:$4 sm:$0xff]   ;;  %v1590_v18 = vld [vmem:[%s2113_s1 + $0x3ec] ss:$16 sps:$4 sm:$0xff]  }
  0x45   :  { %1018 = vmatprep.mubr.bf16.mxu0 %v216_v19  ;;  %1141 = vmatprep.mubr.bf16.mxu1 %v216_v19  ;;  %v1585_v19 = vld [vmem:[%s2113_s1 + $0x3e0] ss:$16 sps:$4 sm:$0xff]  }
  0x47   :  { %989 = vmatpush1.bf16.msra.mxu0 %v1501_v20  ;;  %1112 = vmatpush1.bf16.msra.mxu1 %v1504_v21  ;;  %v1588_v20 = vld [vmem:[%s2113_s1 + $0x3e8] ss:$16 sps:$4 sm:$0xff]   ;;  %v1593_v21 = vld [vmem:[%s2113_s1 + $0x404] ss:$16 sps:$4 sm:$0xff]  }
  0x48   :  { %990 = vmatprep.subr.bf16.mxu0 %v1509_v23  ;;  %1113 = vmatprep.subr.bf16.mxu1 %v1512_v24  ;;  %v1596_v23 = vld [vmem:[%s2113_s1 + $0x40c] ss:$16 sps:$4 sm:$0xff]   ;;  %v215_v24 = vcombine.high %v1862_v15, %v1862_v15 }
  0x49   :  { %v1602_v15 = vld [vmem:[%s2113_s1 + $0x42c] ss:$16 sps:$4 sm:$0xff]  }
  0x4b   :  { %991 = vmatpush1.bf16.msra.mxu0 %v1507_v25  ;;  %1114 = vmatpush1.bf16.msra.mxu1 %v1510_v26  ;;  %v1591_v25 = vld [vmem:[%s2113_s1 + $0x400] ss:$16 sps:$4 sm:$0xff]   ;;  %v1594_v26 = vld [vmem:[%s2113_s1 + $0x408] ss:$16 sps:$4 sm:$0xff]  }
  0x4c   :  { %992 = vmatprep.subr.bf16.mxu0 %v1515_v27  ;;  %1115 = vmatprep.subr.bf16.mxu1 %v1518_v28  ;;  %v1599_v27 = vld [vmem:[%s2113_s1 + $0x424] ss:$16 sps:$4 sm:$0xff]   ;;  %v1597_v28 = vld [vmem:[%s2113_s1 + $0x420] ss:$16 sps:$4 sm:$0xff]  }
  0x4f   :  { %993 = vmatpush1.bf16.msra.mxu0 %v1513_v29  ;;  %1116 = vmatpush1.bf16.msra.mxu1 %v1516_v30  ;;  %v1600_v29 = vld [vmem:[%s2113_s1 + $0x428] ss:$16 sps:$4 sm:$0xff]   ;;  %v1605_v30 = vld [vmem:[%s2113_s1 + $0x444] ss:$16 sps:$4 sm:$0xff]  }
  0x50   :  { %994 = vmatprep.subr.bf16.mxu0 %v1521_v31  ;;  %1117 = vmatprep.subr.bf16.mxu1 %v1524_v32  ;;  %v1608_v31 = vld [vmem:[%s2113_s1 + $0x44c] ss:$16 sps:$4 sm:$0xff]   ;;  %v178_v32 = vcombine.high %v1793_v54, %v1793_v54 }
  0x52   :  { %v192_v54 = vrot.slane %v178_v32, %v1782_v51 }
  0x53   :  { %995 = vmatpush1.bf16.msra.mxu0 %v1519_v33  ;;  %1118 = vmatpush1.bf16.msra.mxu1 %v1522_v34  ;;  %v1603_v33 = vld [vmem:[%s2113_s1 + $0x440] ss:$16 sps:$4 sm:$0xff]   ;;  %v1606_v34 = vld [vmem:[%s2113_s1 + $0x448] ss:$16 sps:$4 sm:$0xff]  }
  0x54   :  { %996 = vmatprep.subr.bf16.mxu0 %v1527_v35  ;;  %1119 = vmatprep.subr.bf16.mxu1 %v1530_v36  ;;  %v1611_v35 = vld [vmem:[%s2113_s1 + $0x464] ss:$16 sps:$4 sm:$0xff]   ;;  %v1609_v36 = vld [vmem:[%s2113_s1 + $0x460] ss:$16 sps:$4 sm:$0xff]  }
  0x57   :  { %997 = vmatpush1.bf16.msra.mxu0 %v1525_v37  ;;  %1120 = vmatpush1.bf16.msra.mxu1 %v1528_v39  ;;  %v1612_v37 = vld [vmem:[%s2113_s1 + $0x468] ss:$16 sps:$4 sm:$0xff]   ;;  %v207_v39 = vrot.slane %v192_v54, %v1782_v51 }
  0x58   :  { %998 = vmatprep.subr.bf16.mxu0 %v1533_v40  ;;  %1121 = vmatprep.subr.bf16.mxu1 %v1536_v41  ;;  %v175_v40 = vsub.s32 0, %v1764_v44 }
  0x5b   :  { %999 = vmatpush1.bf16.msra.mxu0 %v1531_v42  ;;  %1122 = vmatpush1.bf16.msra.mxu1 %v1534_v43 }
  0x5c   :  { %1000 = vmatprep.subr.bf16.mxu0 %v1539_v45  ;;  %1123 = vmatprep.subr.bf16.mxu1 %v1542_v46 }
  0x5f   :  { %1001 = vmatpush1.bf16.msra.mxu0 %v1537_v47  ;;  %1124 = vmatpush1.bf16.msra.mxu1 %v1540_v48 }
  0x60   :  { %1002 = vmatprep.subr.bf16.mxu0 %v1545_v49  ;;  %1125 = vmatprep.subr.bf16.mxu1 %v1548_v50 }
  0x63   :  { %1003 = vmatpush1.bf16.msra.mxu0 %v1543_v52  ;;  %1126 = vmatpush1.bf16.msra.mxu1 %v1546_v53 }
  0x64   :  { %1004 = vmatprep.subr.bf16.mxu0 %v1551_v56  ;;  %1127 = vmatprep.subr.bf16.mxu1 %v1554_v57 }
  0x67   :  { %1005 = vmatpush1.bf16.msra.mxu0 %v1549_v58  ;;  %1128 = vmatpush1.bf16.msra.mxu1 %v1552_v59 }
  0x68   :  { %1006 = vmatprep.subr.bf16.mxu0 %v1557_v60  ;;  %1129 = vmatprep.subr.bf16.mxu1 %v1560_v61 }
  0x6b   :  { %1007 = vmatpush1.bf16.msra.mxu0 %v1555_v62  ;;  %1130 = vmatpush1.bf16.msra.mxu1 %v1558_v63 }
  0x6c   :  { %1008 = vmatprep.subr.bf16.mxu0 %v1563_v0  ;;  %1131 = vmatprep.subr.bf16.mxu1 %v1566_v1 }
  0x6f   :  { %1009 = vmatpush1.bf16.msra.mxu0 %v1561_v2  ;;  %1132 = vmatpush1.bf16.msra.mxu1 %v1564_v3 }
  0x70   :  { %1010 = vmatprep.subr.bf16.mxu0 %v1569_v4  ;;  %1133 = vmatprep.subr.bf16.mxu1 %v1572_v5 }
  0x73   :  { %1011 = vmatpush1.bf16.msra.mxu0 %v1567_v6  ;;  %1134 = vmatpush1.bf16.msra.mxu1 %v1570_v7 }
  0x74   :  { %1012 = vmatprep.subr.bf16.mxu0 %v1575_v8  ;;  %1135 = vmatprep.subr.bf16.mxu1 %v1578_v9 }
  0x77   :  { %1013 = vmatpush1.bf16.msra.mxu0 %v1573_v10  ;;  %1136 = vmatpush1.bf16.msra.mxu1 %v1576_v11 }
  0x78   :  { %1014 = vmatprep.subr.bf16.mxu0 %v1581_v12  ;;  %1137 = vmatprep.subr.bf16.mxu1 %v1584_v13 }
  0x7b   :  { %1015 = vmatpush1.bf16.msra.mxu0 %v1579_v14  ;;  %1138 = vmatpush1.bf16.msra.mxu1 %v1582_v16 }
  0x7c   :  { %1016 = vmatprep.subr.bf16.mxu0 %v1587_v17  ;;  %1139 = vmatprep.subr.bf16.mxu1 %v1590_v18 }
  0x7f   :  { %1017 = vmatpush1.bf16.msra.mxu0 %v1585_v19  ;;  %1140 = vmatpush1.bf16.msra.mxu1 %v1588_v20 }
  0x80   :  { %1027 = vmatprep.subr.bf16.mxu0 %v1593_v21  ;;  %1150 = vmatprep.subr.bf16.mxu1 %v1596_v23 }
  0x82   :  { %1019 = vmatmul.mubr.bf16.vlgmr.msra.gmra.mrb[0].mxu0 %v215_v24  ;;  %1142 = vmatmul.mubr.bf16.vlgmr.msra.gmra.mrb[0].mxu1 %v215_v24 }
  0x83   :  { %1028 = vmatpush1.bf16.msra.mxu0 %v1591_v25  ;;  %1151 = vmatpush1.bf16.msra.mxu1 %v1594_v26 }
  0x84   :  { %1029 = vmatprep.subr.bf16.mxu0 %v1599_v27  ;;  %1152 = vmatprep.subr.bf16.mxu1 %v1602_v15 }
  0x85   :  { %1059 = vmatprep.mubr.bf16.mxu0 %v1615_v22  ;;  %1182 = vmatprep.mubr.bf16.mxu1 %v1615_v22  ;;  %v1614_v22 = vld [vmem:[%s2113_s1 + $0x46c] ss:$16 sps:$4 sm:$0xff]  }
  0x87   :  { %1030 = vmatpush1.bf16.msra.mxu0 %v1597_v28  ;;  %1153 = vmatpush1.bf16.msra.mxu1 %v1600_v29 }
  0x88   :  { %1031 = vmatprep.subr.bf16.mxu0 %v1605_v30  ;;  %1154 = vmatprep.subr.bf16.mxu1 %v1608_v31 }
  0x8b   :  { %1032 = vmatpush1.bf16.msra.mxu0 %v1603_v33  ;;  %1155 = vmatpush1.bf16.msra.mxu1 %v1606_v34 }
  0x8c   :  { %1033 = vmatprep.subr.bf16.mxu0 %v1611_v35  ;;  %1156 = vmatprep.subr.bf16.mxu1 %v1614_v22 }
  0x8f   :  { %1034 = vmatpush1.bf16.msra.mxu0 %v1609_v36  ;;  %1157 = vmatpush1.bf16.msra.mxu1 %v1612_v37 }
  0x92   :  { %1373 = vmatmul.mubr.msk.bf16.vlgmr.msra.gmra.mrb[0].mxu0 %vm941_vm0, %v207_v39  ;;  %1374 = vmatmul.mubr.msk.bf16.vlgmr.msra.gmra.mrb[0].mxu1 %vm941_vm0, %v207_v39 }
  0xb0   :  { %v171_v41 = vpop.permute.xlu0 %170 }
  0xb1   :  { %v176_v42 = vrot.slane %v171_v41, %v175_v40 }
 0x165   :  { %v1061_v43 = vpop.f32.mrb[0].mxu0  ;;  %v1184_v45 = vpop.f32.mrb[0].mxu1 }
 0x166   :  { %v1375_v46 = vadd.f32 %v1061_v43, %v176_v42  ;;  %v1377_v47 = vadd.f32 %v1184_v45, %v176_v42  ;;  %v1063_v48 = vpop.f32.mrb[1].mxu0  ;;  %v1186_v49 = vpop.f32.mrb[1].mxu1 }
 0x167   :  { %v1376_v50 = vadd.f32 %v1063_v48, %v176_v42  ;;  %v1378_v52 = vadd.f32 %v1186_v49, %v176_v42  ;;  %v1065_v53 = vpop.f32.mrb[2].mxu0  ;;  %v1188_v55 = vpop.f32.mrb[2].mxu1 }
 0x168   :  { %v1066_v56 = vpop.f32.mrb[3].mxu0  ;;  %v1189_v57 = vpop.f32.mrb[3].mxu1 }
 0x169   :  { %v1195_v58 = vcombine.low %v1375_v46, %v1376_v50  ;;  %v1196_v59 = vcombine.low %v1377_v47, %v1378_v52 }
 0x16b   :  { %v1203_v60 = vrot.slane %v1195_v58, %v1782_v51  ;;  %v1210_v44 = vrot.slane %v1196_v59, %v1782_v51 }
 0x16d   :  { %v1211_v61 = vcombine.low %v1203_v60, %v1210_v44 }
 0x16f   :  { %v1218_v62 = vrot.slane %v1211_v61, %v1782_v51 }
 0x171   :  { %1224 = vst.msk [vmem:[%s2117_s4] sm:$0xf] %vm1222_vm1, %v1218_v62 }

</bundles_post_ra>
